<compile_context>
chip_gen: v7x
topology: tpu7x:2x2x1
jax: 0.10.0
libtpu: 0.0.40
codegen_flags: <defaults>
</compile_context>

<pallas_src>
import functools

import jax
import jax.numpy as jnp
from jax.experimental import pallas as pl
from jax.experimental.pallas import tpu as pltpu

SEQ_LENGTH = 48            # fixed in Rejector.__init__
SEQ_PAD = 64               # per-head K padded 48 -> 64 (group K = 128)
HIDDEN_DIM = 256           # fixed in Rejector.__init__
GROUP = 2                  # heads per column tile (one feature: approx+detail)
COL_TILE = GROUP * HIDDEN_DIM   # 512 lanes per column step
FUSE_DIM = 1024
VAE_WEIGHT = 2.0           # default arg of Rejector.forward


# --------------------------------------------------------------------------- #
# Kernel
# --------------------------------------------------------------------------- #
def _rejector_kernel(group_size,
                     head_x_ref,                 # (TB, G*64)       bf16
                     w1g_ref, b1g_ref,           # (G*64, 512) bf16, (1, 512) f32
                     hw2_ref, hb2_ref,           # (G, 256, 256) bf16, (G, 1, 256) f32
                     vae_x_ref, recon_ref,       # (TB, 2L) bf16, (TB, 1) f32
                     vw1_ref, vb1_ref,           # (2L, T) bf16, (1, T) f32
                     vw2_ref, vb2_ref,           # (T, 512) bf16, (1, 512) f32
                     rw_ref, rb_ref,             # (1, 512) f32, (1, 512) f32
                     fw1_ref, fb1_ref,           # (512, 1024) bf16, (1, 1024) f32
                     fw2_ref, fb2_ref,           # (1, 1024) f32, (1, 1) f32
                     out_ref,                    # (TB, 1) f32
                     v1_ref,                     # (TB, T)    bf16 scratch (VAE hidden)
                     facc_ref,                   # (TB, 1024) f32  scratch (fusion acc)
                     z_ref):                     # (TB, 512)  bf16 scratch (fused column block)
    H = HIDDEN_DIM
    f32, bf16 = jnp.float32, jnp.bfloat16
    j = pl.program_id(1)

    # --- once per batch tile: VAE first layer (full T width) + zero accumulator ---
    @pl.when(j == 0)
    def _init():
        v1 = jnp.maximum(
            jnp.dot(vae_x_ref[...], vw1_ref[...], preferred_element_type=f32)
            + vb1_ref[...], 0.0)
        v1_ref[...] = v1.astype(bf16)
        facc_ref[...] = jnp.zeros_like(facc_ref)

    # --- VAE second layer for this column block: (TB, T) @ (T, 512) ---
    v2 = (jnp.dot(v1_ref[...], vw2_ref[...], preferred_element_type=f32)
          + vb2_ref[...])
    recon_lin = recon_ref[...] * rw_ref[...] + rb_ref[...]           # (TB, 512)
    vae_part = (v2 + recon_lin) * VAE_WEIGHT

    # --- grouped block-diagonal head first layer: (TB, 128) @ (128, 512) ---
    h1 = jnp.maximum(
        jnp.dot(head_x_ref[...], w1g_ref[...], preferred_element_type=f32)
        + b1g_ref[...], 0.0)
    h1 = h1.astype(bf16)            # single cast, hoisted out of the head loop

    # --- per-head second layer; write each 256-lane slab of z exactly once ---
    for g in range(group_size):
        lo, hi = g * H, (g + 1) * H
        head_out = (jnp.dot(h1[:, lo:hi], hw2_ref[g],
                            preferred_element_type=f32) + hb2_ref[g])
        z_ref[:, lo:hi] = (head_out + vae_part[:, lo:hi]).astype(bf16)

    # --- K-tiled fusion first layer: accumulate this column block ---
    facc_ref[...] += jnp.dot(z_ref[...], fw1_ref[...],
                             preferred_element_type=f32)

    # --- finalize on the last column step ---
    @pl.when(j == pl.num_programs(1) - 1)
    def _finish():
        f1 = jnp.maximum(facc_ref[...] + fb1_ref[...], 0.0)
        f2 = jnp.sum(f1 * fw2_ref[...], axis=-1, keepdims=True) + fb2_ref[...]
        out_ref[...] = jax.nn.sigmoid(f2)


# --------------------------------------------------------------------------- #
# Parameter init / packing
# --------------------------------------------------------------------------- #
def init_params(key, num_features, latent_dim,
                seq_length=SEQ_LENGTH, hidden=HIDDEN_DIM):
    """Master f32 params, torch-style U(-1/sqrt(fan_in), 1/sqrt(fan_in))."""
    nh = 2 * num_features
    T = hidden * num_features * 2

    def lin(k, fan_in, shape):
        bound = 1.0 / jnp.sqrt(jnp.float32(fan_in))
        return jax.random.uniform(k, shape, jnp.float32, -bound, bound)

    ks = iter(jax.random.split(key, 32))
    return dict(
        hw1=lin(next(ks), seq_length, (nh, seq_length, hidden)),
        hb1=lin(next(ks), seq_length, (nh, 1, hidden)),
        hw2=lin(next(ks), hidden, (nh, hidden, hidden)),
        hb2=lin(next(ks), hidden, (nh, 1, hidden)),
        vw1=lin(next(ks), 2 * latent_dim, (2 * latent_dim, T)),
        vb1=lin(next(ks), 2 * latent_dim, (1, T)),
        vw2=lin(next(ks), T, (T, T)),
        vb2=lin(next(ks), T, (1, T)),
        rw=lin(next(ks), 1, (1, T)),
        rb=lin(next(ks), 1, (1, T)),
        fw1=lin(next(ks), T, (T, FUSE_DIM)),
        fb1=lin(next(ks), T, (1, FUSE_DIM)),
        fw2=lin(next(ks), FUSE_DIM, (FUSE_DIM, 1)),
        fb2=lin(next(ks), FUSE_DIM, (1, 1)),
    )


def pack_params(p):
    """Kernel-ready params: bf16 matmul weights, grouped block-diag first layer."""
    bf = jnp.bfloat16
    nh = p["hw1"].shape[0]
    ng = nh // GROUP
    H, S, SP = HIDDEN_DIM, SEQ_LENGTH, SEQ_PAD

    # Grouped block-diagonal first-layer weights; per-head K zero-padded 48 -> 64.
    w1g = jnp.zeros((ng, GROUP * SP, GROUP * H), jnp.float32)
    b1g = jnp.zeros((ng, 1, GROUP * H), jnp.float32)
    for j in range(ng):
        for g in range(GROUP):
            h = j * GROUP + g
            w1g = w1g.at[j, g * SP:g * SP + S, g * H:(g + 1) * H].set(p["hw1"][h])
            b1g = b1g.at[j, 0, g * H:(g + 1) * H].set(p["hb1"][h, 0])

    return dict(
        w1g=w1g.astype(bf), b1g=b1g,
        hw2=p["hw2"].astype(bf), hb2=p["hb2"],
        vw1=p["vw1"].astype(bf), vb1=p["vb1"],
        vw2=p["vw2"].astype(bf), vb2=p["vb2"],
        rw=p["rw"], rb=p["rb"],
        fw1=p["fw1"].astype(bf), fb1=p["fb1"],
        fw2=p["fw2"].reshape(1, -1),            # (1, 1024) f32 row vector
        fb2=p["fb2"],
    )


# --------------------------------------------------------------------------- #
# Sizing helpers (generation aware)
# --------------------------------------------------------------------------- #
def _round_up(x, m):
    return ((x + m - 1) // m) * m


def _vmem_capacity_bytes():
    try:
        return int(pltpu.get_tpu_info().vmem_capacity_bytes)
    except Exception:
        return 64 << 20            # conservative: v7x per-TC VMEM


def _vmem_limit_bytes(TB, T, L2, vmem_cap):
    # Single-buffered resident weights.
    resident = L2 * T * 2 + T * 4 + FUSE_DIM * 4 + FUSE_DIM * 4 + 4
    # Double-buffered streamed tiles + batch-tile inputs/output.
    streaming = 2 * (T * COL_TILE * 2
                     + COL_TILE * FUSE_DIM * 2
                     + GROUP * SEQ_PAD * COL_TILE * 2
                     + GROUP * HIDDEN_DIM * HIDDEN_DIM * 2
                     + 4 * COL_TILE * 4
                     + GROUP * HIDDEN_DIM * 4
                     + TB * (GROUP * SEQ_PAD * 2 + L2 * 2 + 4 + 4))
    scratch = TB * T * 2 + TB * FUSE_DIM * 4 + TB * COL_TILE * 2
    temps = 4 * TB * COL_TILE * 4 + (4 << 20)      # f32 activation values + margin
    est = resident + streaming + scratch + temps
    cap = max(min(vmem_cap - (8 << 20), 100 << 20), 32 << 20)
    return int(min(max(est, 32 << 20), cap))


# --------------------------------------------------------------------------- #
# Forward wrapper
# --------------------------------------------------------------------------- #
def rejector_forward(kparams, approx_coeffs, detail_coeffs, recon_error, mu, log_var):
    B, S, F = approx_coeffs.shape
    nh = 2 * F
    ng = nh // GROUP                      # column tiles (= F)
    T = HIDDEN_DIM * nh
    L2 = mu.shape[1] + log_var.shape[1]
    H, SP, TN = HIDDEN_DIM, SEQ_PAD, COL_TILE

    vmem_cap = _vmem_capacity_bytes()

    # Batch tile: multiple of 8; >=2 grid steps when B>=16 (megacore sharding);
    # larger cap on 128-MiB-VMEM chips (v5e/v6e), smaller on v7x.
    tb_cap = 512 if vmem_cap >= (100 << 20) else 256
    Bp = _round_up(B, 8)
    if B >= 16:
        TB = min(tb_cap, _round_up(pl.cdiv(Bp, 2), 8))
    else:
        TB = Bp
    TB = min(TB, tb_cap)
    Bp = _round_up(Bp, TB)                # pad so batch blocks divide evenly

    # ---- pack & pad batch inputs (torch concat order [a0, d0, a1, d1, ...]) ----
    stacked = jnp.stack([approx_coeffs, detail_coeffs], axis=-1)      # (B, S, F, 2)
    head_x = jnp.transpose(stacked, (0, 2, 3, 1)).reshape(B, nh, S)   # (B, NH, 48)
    head_x = jnp.pad(head_x, ((0, Bp - B), (0, 0), (0, SP - S)))
    head_x = head_x.reshape(Bp, nh * SP).astype(jnp.bfloat16)
    vae_x = jnp.concatenate([mu, log_var], axis=1)
    vae_x = jnp.pad(vae_x, ((0, Bp - B), (0, 0))).astype(jnp.bfloat16)
    recon = jnp.pad(recon_error, ((0, Bp - B), (0, 0))).astype(jnp.float32)

    grid = (Bp // TB, ng)

    def bufone(shape):                    # constant-index weight, single-buffered
        return pl.BlockSpec(shape, lambda i, j: (0,) * len(shape),
                            pipeline_mode=pl.Buffered(1))

    in_specs = [
        pl.BlockSpec((TB, GROUP * SP), lambda i, j: (i, j)),            # head_x
        pl.BlockSpec((None, GROUP * SP, TN), lambda i, j: (j, 0, 0)),   # w1g
        pl.BlockSpec((None, 1, TN), lambda i, j: (j, 0, 0)),            # b1g
        pl.BlockSpec((GROUP, H, H), lambda i, j: (j, 0, 0)),            # hw2
        pl.BlockSpec((GROUP, 1, H), lambda i, j: (j, 0, 0)),            # hb2
        pl.BlockSpec((TB, L2), lambda i, j: (i, 0)),                    # vae_x
        pl.BlockSpec((TB, 1), lambda i, j: (i, 0)),                     # recon
        bufone((L2, T)), bufone((1, T)),                                # vw1, vb1
        pl.BlockSpec((T, TN), lambda i, j: (0, j)),                     # vw2 (streamed)
        pl.BlockSpec((1, TN), lambda i, j: (0, j)),                     # vb2
        pl.BlockSpec((1, TN), lambda i, j: (0, j)),                     # rw
        pl.BlockSpec((1, TN), lambda i, j: (0, j)),                     # rb
        pl.BlockSpec((TN, FUSE_DIM), lambda i, j: (j, 0)),              # fw1 (streamed)
        bufone((1, FUSE_DIM)),                                          # fb1
        bufone((1, FUSE_DIM)),                                          # fw2 (row)
        bufone((1, 1)),                                                 # fb2
    ]
    out_spec = pl.BlockSpec((TB, 1), lambda i, j: (i, 0))

    flops = 2 * Bp * (ng * (GROUP * SP) * TN      # grouped head layer 1
                      + nh * H * H                # head layer 2
                      + L2 * T + T * T + T        # VAE branch
                      + T * FUSE_DIM + FUSE_DIM)  # fusion MLP
    bytes_accessed = (sum(int(v.size) * v.dtype.itemsize for v in kparams.values())
                      + Bp * ((nh * SP + L2) * 2 + 4 + 4))

    out = pl.pallas_call(
        functools.partial(_rejector_kernel, GROUP),
        out_shape=jax.ShapeDtypeStruct((Bp, 1), jnp.float32),
        grid_spec=pltpu.PrefetchScalarGridSpec(
            num_scalar_prefetch=0,
            grid=grid,
            in_specs=in_specs,
            out_specs=out_spec,
            scratch_shapes=[
                pltpu.VMEM((TB, T), jnp.bfloat16),        # VAE hidden, reused per column step
                pltpu.VMEM((TB, FUSE_DIM), jnp.float32),  # fusion layer-1 accumulator
                pltpu.VMEM((TB, TN), jnp.bfloat16),       # fused-activation column block
            ],
        ),
        compiler_params=pltpu.CompilerParams(
            dimension_semantics=("parallel", "arbitrary"),
            vmem_limit_bytes=_vmem_limit_bytes(TB, T, L2, vmem_cap),
        ),
        cost_estimate=pl.CostEstimate(
            flops=int(flops), transcendentals=int(Bp),
            bytes_accessed=int(bytes_accessed)),
    )(head_x,
      kparams["w1g"], kparams["b1g"], kparams["hw2"], kparams["hb2"],
      vae_x, recon,
      kparams["vw1"], kparams["vb1"], kparams["vw2"], kparams["vb2"],
      kparams["rw"], kparams["rb"],
      kparams["fw1"], kparams["fb1"], kparams["fw2"], kparams["fb2"])
    return out[:B, 0]       # torch .squeeze() on (B, 1) -> (B,)


# --------------------------------------------------------------------------- #
# Pure-JAX reference (mirrors torch forward; bf16 matmul inputs, f32 accumulate)
# --------------------------------------------------------------------------- #
def rejector_reference(params, approx_coeffs, detail_coeffs, recon_error, mu, log_var):
    bf, f32 = jnp.bfloat16, jnp.float32

    def mm(x, w):
        return jnp.dot(x.astype(bf), w.astype(bf), preferred_element_type=f32)

    B, S, F = approx_coeffs.shape
    feats = []
    for i in range(F):
        for coeffs, h in ((approx_coeffs, 2 * i), (detail_coeffs, 2 * i + 1)):
            x = coeffs[:, :, i]
            h1 = jnp.maximum(mm(x, params["hw1"][h]) + params["hb1"][h], 0.0)
            feats.append(mm(h1, params["hw2"][h]) + params["hb2"][h])
    fusion_in = jnp.concatenate(feats, axis=1)

    vx = jnp.concatenate([mu, log_var], axis=1)
    v1 = jnp.maximum(mm(vx, params["vw1"]) + params["vb1"], 0.0)
    v2 = mm(v1, params["vw2"]) + params["vb2"]
    recon_lin = recon_error @ params["rw"] + params["rb"]
    vae_out = (v2 + recon_lin) * VAE_WEIGHT

    z = fusion_in + vae_out
    f1 = jnp.maximum(mm(z, params["fw1"]) + params["fb1"], 0.0)
    f2 = f1 @ params["fw2"] + params["fb2"]
    return jax.nn.sigmoid(f2)[:, 0]


# --------------------------------------------------------------------------- #
if __name__ == "__main__":
    B, F, L = 2, 2, 8           # batch, feature_dim, latent_dim (small test sizes)
    key = jax.random.PRNGKey(0)
    kp, ka, kd, kr, km, kv = jax.random.split(key, 6)

    params = init_params(kp, num_features=F, latent_dim=L)
    kparams = pack_params(params)

    approx_coeffs = jax.random.normal(ka, (B, SEQ_LENGTH, F), jnp.float32)
    detail_coeffs = jax.random.normal(kd, (B, SEQ_LENGTH, F), jnp.float32)
    recon_error = jax.random.normal(kr, (B, 1), jnp.float32)
    mu = jax.random.normal(km, (B, L), jnp.float32)
    log_var = jax.random.normal(kv, (B, L), jnp.float32)

    out = rejector_forward(kparams, approx_coeffs, detail_coeffs, recon_error, mu, log_var)
    out = jax.block_until_ready(out)

    ref = rejector_reference(params, approx_coeffs, detail_coeffs, recon_error, mu, log_var)
    assert out.shape == (B,), out.shape
    assert jnp.allclose(out, ref, atol=1e-2, rtol=1e-2), (out, ref)
    print("KERNEL_OK")
</pallas_src>

<mosaic_0001>
module attributes {stable_mosaic.version = 11 : i64} {
  func.func @_rejector_kernel(%arg0: i32, %arg1: i32, %arg2: memref<8x128xbf16, #tpu.memory_space<vmem>>, %arg3: memref<1x128x512xbf16, #tpu.memory_space<vmem>>, %arg4: memref<1x1x512xf32, #tpu.memory_space<vmem>>, %arg5: memref<2x256x256xbf16, #tpu.memory_space<vmem>>, %arg6: memref<2x1x256xf32, #tpu.memory_space<vmem>>, %arg7: memref<8x16xbf16, #tpu.memory_space<vmem>>, %arg8: memref<8x1xf32, #tpu.memory_space<vmem>>, %arg9: memref<16x1024xbf16, #tpu.memory_space<vmem>>, %arg10: memref<1x1024xf32, #tpu.memory_space<vmem>>, %arg11: memref<1024x512xbf16, #tpu.memory_space<vmem>>, %arg12: memref<1x512xf32, #tpu.memory_space<vmem>>, %arg13: memref<1x512xf32, #tpu.memory_space<vmem>>, %arg14: memref<1x512xf32, #tpu.memory_space<vmem>>, %arg15: memref<512x1024xbf16, #tpu.memory_space<vmem>>, %arg16: memref<1x1024xf32, #tpu.memory_space<vmem>>, %arg17: memref<1x1024xf32, #tpu.memory_space<vmem>>, %arg18: memref<1x1xf32, #tpu.memory_space<vmem>>, %arg19: memref<8x1xf32, #tpu.memory_space<vmem>>, %arg20: memref<8x1024xbf16, #tpu.memory_space<vmem>>, %arg21: memref<8x1024xf32, #tpu.memory_space<vmem>>, %arg22: memref<8x512xbf16, #tpu.memory_space<vmem>>) attributes {dimension_semantics = [#tpu.dimension_semantics<parallel>, #tpu.dimension_semantics<arbitrary>], iteration_bounds = array<i64: 1, 2>, scalar_prefetch = 0 : i64, scratch_operands = 3 : i64, tpu.core_type = #tpu.core_type<tc>, window_params = [{transform_indices = @transform_0, window_bounds = array<i64: 8, 128>}, {transform_indices = @transform_1, window_bounds = array<i64: 1, 128, 512>}, {transform_indices = @transform_2, window_bounds = array<i64: 1, 1, 512>}, {transform_indices = @transform_3, window_bounds = array<i64: 2, 256, 256>}, {transform_indices = @transform_4, window_bounds = array<i64: 2, 1, 256>}, {transform_indices = @transform_5, window_bounds = array<i64: 8, 16>}, {transform_indices = @transform_6, window_bounds = array<i64: 8, 1>}, {pipeline_mode = #tpu.pipeline_mode<synchronous>, transform_indices = @transform_7, window_bounds = array<i64: 16, 1024>}, {pipeline_mode = #tpu.pipeline_mode<synchronous>, transform_indices = @transform_8, window_bounds = array<i64: 1, 1024>}, {transform_indices = @transform_9, window_bounds = array<i64: 1024, 512>}, {transform_indices = @transform_10, window_bounds = array<i64: 1, 512>}, {transform_indices = @transform_11, window_bounds = array<i64: 1, 512>}, {transform_indices = @transform_12, window_bounds = array<i64: 1, 512>}, {transform_indices = @transform_13, window_bounds = array<i64: 512, 1024>}, {pipeline_mode = #tpu.pipeline_mode<synchronous>, transform_indices = @transform_14, window_bounds = array<i64: 1, 1024>}, {pipeline_mode = #tpu.pipeline_mode<synchronous>, transform_indices = @transform_15, window_bounds = array<i64: 1, 1024>}, {pipeline_mode = #tpu.pipeline_mode<synchronous>, transform_indices = @transform_16, window_bounds = array<i64: 1, 1>}, {transform_indices = @transform_17, window_bounds = array<i64: 8, 1>}]} {
    %c0_i32 = arith.constant 0 : i32
    %0 = arith.cmpi eq, %arg1, %c0_i32 : i32
    %1 = arith.extui %0 : i1 to i32
    %c0_i32_0 = arith.constant 0 : i32
    %2 = arith.cmpi ne, %1, %c0_i32_0 : i32
    scf.if %2 {
      %c0_49 = arith.constant 0 : index
      %c0_50 = arith.constant 0 : index
      %64 = vector.load %arg7[%c0_49, %c0_50] : memref<8x16xbf16, #tpu.memory_space<vmem>>, vector<8x16xbf16>
      %c0_51 = arith.constant 0 : index
      %c0_52 = arith.constant 0 : index
      %65 = vector.load %arg9[%c0_51, %c0_52] : memref<16x1024xbf16, #tpu.memory_space<vmem>>, vector<16x1024xbf16>
      %cst_53 = arith.constant dense<0.000000e+00> : vector<8x1024xf32>
      %66 = tpu.matmul %64, %65, %cst_53 {dimension_numbers = #tpu.dot_dimension_numbers<[1], [0], [0], [1], [0, 0, 1, 1], [], []>} : vector<8x16xbf16>, vector<16x1024xbf16>, vector<8x1024xf32> -> vector<8x1024xf32>
      %c0_54 = arith.constant 0 : index
      %c0_55 = arith.constant 0 : index
      %67 = vector.load %arg10[%c0_54, %c0_55] : memref<1x1024xf32, #tpu.memory_space<vmem>>, vector<1x1024xf32>
      %68 = vector.broadcast %67 : vector<1x1024xf32> to vector<8x1024xf32>
      %69 = arith.addf %66, %68 : vector<8x1024xf32>
      %cst_56 = arith.constant 0.000000e+00 : f32
      %70 = vector.broadcast %cst_56 : f32 to vector<8x1024xf32>
      %71 = arith.maximumf %69, %70 : vector<8x1024xf32>
      %72 = arith.truncf %71 : vector<8x1024xf32> to vector<8x1024xbf16>
      %c0_57 = arith.constant 0 : index
      %c0_58 = arith.constant 0 : index
      %73 = vector.load %arg20[%c0_57, %c0_58] : memref<8x1024xbf16, #tpu.memory_space<vmem>>, vector<8x1024xbf16>
      tpu.vector_store %arg20[%c0_57, %c0_58], %72 {strides = array<i32>} : memref<8x1024xbf16, #tpu.memory_space<vmem>>, vector<8x1024xbf16>,
      %cst_59 = arith.constant 0.000000e+00 : f32
      %74 = vector.broadcast %cst_59 : f32 to vector<8x1024xf32>
      %c0_60 = arith.constant 0 : index
      %c0_61 = arith.constant 0 : index
      %75 = vector.load %arg21[%c0_60, %c0_61] : memref<8x1024xf32, #tpu.memory_space<vmem>>, vector<8x1024xf32>
      tpu.vector_store %arg21[%c0_60, %c0_61], %74 {strides = array<i32>} : memref<8x1024xf32, #tpu.memory_space<vmem>>, vector<8x1024xf32>,
    } else {
    }
    %c0 = arith.constant 0 : index
    %c0_1 = arith.constant 0 : index
    %3 = vector.load %arg20[%c0, %c0_1] : memref<8x1024xbf16, #tpu.memory_space<vmem>>, vector<8x1024xbf16>
    %c0_2 = arith.constant 0 : index
    %c0_3 = arith.constant 0 : index
    %4 = vector.load %arg11[%c0_2, %c0_3] : memref<1024x512xbf16, #tpu.memory_space<vmem>>, vector<1024x512xbf16>
    %cst = arith.constant dense<0.000000e+00> : vector<8x512xf32>
    %5 = tpu.matmul %3, %4, %cst {dimension_numbers = #tpu.dot_dimension_numbers<[1], [0], [0], [1], [0, 0, 1, 1], [], []>} : vector<8x1024xbf16>, vector<1024x512xbf16>, vector<8x512xf32> -> vector<8x512xf32>
    %c0_4 = arith.constant 0 : index
    %c0_5 = arith.constant 0 : index
    %6 = vector.load %arg12[%c0_4, %c0_5] : memref<1x512xf32, #tpu.memory_space<vmem>>, vector<1x512xf32>
    %7 = vector.broadcast %6 : vector<1x512xf32> to vector<8x512xf32>
    %8 = arith.addf %5, %7 : vector<8x512xf32>
    %c0_6 = arith.constant 0 : index
    %c0_7 = arith.constant 0 : index
    %9 = vector.load %arg8[%c0_6, %c0_7] : memref<8x1xf32, #tpu.memory_space<vmem>>, vector<8x1xf32>
    %c0_8 = arith.constant 0 : index
    %c0_9 = arith.constant 0 : index
    %10 = vector.load %arg13[%c0_8, %c0_9] : memref<1x512xf32, #tpu.memory_space<vmem>>, vector<1x512xf32>
    %11 = vector.broadcast %9 : vector<8x1xf32> to vector<8x512xf32>
    %12 = vector.broadcast %10 : vector<1x512xf32> to vector<8x512xf32>
    %13 = arith.mulf %11, %12 : vector<8x512xf32>
    %c0_10 = arith.constant 0 : index
    %c0_11 = arith.constant 0 : index
    %14 = vector.load %arg14[%c0_10, %c0_11] : memref<1x512xf32, #tpu.memory_space<vmem>>, vector<1x512xf32>
    %15 = vector.broadcast %14 : vector<1x512xf32> to vector<8x512xf32>
    %16 = arith.addf %13, %15 : vector<8x512xf32>
    %17 = arith.addf %8, %16 : vector<8x512xf32>
    %cst_12 = arith.constant 2.000000e+00 : f32
    %18 = vector.broadcast %cst_12 : f32 to vector<8x512xf32>
    %19 = arith.mulf %17, %18 : vector<8x512xf32>
    %c0_13 = arith.constant 0 : index
    %c0_14 = arith.constant 0 : index
    %20 = vector.load %arg2[%c0_13, %c0_14] : memref<8x128xbf16, #tpu.memory_space<vmem>>, vector<8x128xbf16>
    %c0_15 = arith.constant 0 : index
    %c0_16 = arith.constant 0 : index
    %c0_17 = arith.constant 0 : index
    %21 = vector.load %arg3[%c0_15, %c0_16, %c0_17] : memref<1x128x512xbf16, #tpu.memory_space<vmem>>, vector<1x128x512xbf16>
    %22 = vector.shape_cast %21 : vector<1x128x512xbf16> to vector<128x512xbf16>
    %cst_18 = arith.constant dense<0.000000e+00> : vector<8x512xf32>
    %23 = tpu.matmul %20, %22, %cst_18 {dimension_numbers = #tpu.dot_dimension_numbers<[1], [0], [0], [1], [0, 0, 1, 1], [], []>} : vector<8x128xbf16>, vector<128x512xbf16>, vector<8x512xf32> -> vector<8x512xf32>
    %c0_19 = arith.constant 0 : index
    %c0_20 = arith.constant 0 : index
    %c0_21 = arith.constant 0 : index
    %24 = vector.load %arg4[%c0_19, %c0_20, %c0_21] : memref<1x1x512xf32, #tpu.memory_space<vmem>>, vector<1x1x512xf32>
    %25 = vector.shape_cast %24 : vector<1x1x512xf32> to vector<1x512xf32>
    %26 = vector.broadcast %25 : vector<1x512xf32> to vector<8x512xf32>
    %27 = arith.addf %23, %26 : vector<8x512xf32>
    %cst_22 = arith.constant 0.000000e+00 : f32
    %28 = vector.broadcast %cst_22 : f32 to vector<8x512xf32>
    %29 = arith.maximumf %27, %28 : vector<8x512xf32>
    %30 = arith.truncf %29 : vector<8x512xf32> to vector<8x512xbf16>
    %31 = vector.extract_strided_slice %30 {offsets = [0, 0], sizes = [8, 256], strides = [1, 1]} : vector<8x512xbf16> to vector<8x256xbf16>
    %c0_23 = arith.constant 0 : index
    %c0_24 = arith.constant 0 : index
    %c0_25 = arith.constant 0 : index
    %32 = vector.load %arg5[%c0_23, %c0_24, %c0_25] : memref<2x256x256xbf16, #tpu.memory_space<vmem>>, vector<1x256x256xbf16>
    %33 = vector.shape_cast %32 : vector<1x256x256xbf16> to vector<256x256xbf16>
    %cst_26 = arith.constant dense<0.000000e+00> : vector<8x256xf32>
    %34 = tpu.matmul %31, %33, %cst_26 {dimension_numbers = #tpu.dot_dimension_numbers<[1], [0], [0], [1], [0, 0, 1, 1], [], []>} : vector<8x256xbf16>, vector<256x256xbf16>, vector<8x256xf32> -> vector<8x256xf32>
    %c0_27 = arith.constant 0 : index
    %c0_28 = arith.constant 0 : index
    %c0_29 = arith.constant 0 : index
    %35 = vector.load %arg6[%c0_27, %c0_28, %c0_29] : memref<2x1x256xf32, #tpu.memory_space<vmem>>, vector<1x1x256xf32>
    %36 = vector.shape_cast %35 : vector<1x1x256xf32> to vector<1x256xf32>
    %37 = vector.broadcast %36 : vector<1x256xf32> to vector<8x256xf32>
    %38 = arith.addf %34, %37 : vector<8x256xf32>
    %39 = vector.extract_strided_slice %19 {offsets = [0, 0], sizes = [8, 256], strides = [1, 1]} : vector<8x512xf32> to vector<8x256xf32>
    %40 = arith.addf %38, %39 : vector<8x256xf32>
    %41 = arith.truncf %40 : vector<8x256xf32> to vector<8x256xbf16>
    %c0_30 = arith.constant 0 : index
    %c0_31 = arith.constant 0 : index
    %42 = vector.load %arg22[%c0_30, %c0_31] : memref<8x512xbf16, #tpu.memory_space<vmem>>, vector<8x256xbf16>
    tpu.vector_store %arg22[%c0_30, %c0_31], %41 {strides = array<i32>} : memref<8x512xbf16, #tpu.memory_space<vmem>>, vector<8x256xbf16>,
    %43 = vector.extract_strided_slice %30 {offsets = [0, 256], sizes = [8, 256], strides = [1, 1]} : vector<8x512xbf16> to vector<8x256xbf16>
    %c1 = arith.constant 1 : index
    %c0_32 = arith.constant 0 : index
    %c0_33 = arith.constant 0 : index
    %44 = vector.load %arg5[%c1, %c0_32, %c0_33] : memref<2x256x256xbf16, #tpu.memory_space<vmem>>, vector<1x256x256xbf16>
    %45 = vector.shape_cast %44 : vector<1x256x256xbf16> to vector<256x256xbf16>
    %cst_34 = arith.constant dense<0.000000e+00> : vector<8x256xf32>
    %46 = tpu.matmul %43, %45, %cst_34 {dimension_numbers = #tpu.dot_dimension_numbers<[1], [0], [0], [1], [0, 0, 1, 1], [], []>} : vector<8x256xbf16>, vector<256x256xbf16>, vector<8x256xf32> -> vector<8x256xf32>
    %c1_35 = arith.constant 1 : index
    %c0_36 = arith.constant 0 : index
    %c0_37 = arith.constant 0 : index
    %47 = vector.load %arg6[%c1_35, %c0_36, %c0_37] : memref<2x1x256xf32, #tpu.memory_space<vmem>>, vector<1x1x256xf32>
    %48 = vector.shape_cast %47 : vector<1x1x256xf32> to vector<1x256xf32>
    %49 = vector.broadcast %48 : vector<1x256xf32> to vector<8x256xf32>
    %50 = arith.addf %46, %49 : vector<8x256xf32>
    %51 = vector.extract_strided_slice %19 {offsets = [0, 256], sizes = [8, 256], strides = [1, 1]} : vector<8x512xf32> to vector<8x256xf32>
    %52 = arith.addf %50, %51 : vector<8x256xf32>
    %53 = arith.truncf %52 : vector<8x256xf32> to vector<8x256xbf16>
    %c0_38 = arith.constant 0 : index
    %c256 = arith.constant 256 : index
    %54 = vector.load %arg22[%c0_38, %c256] : memref<8x512xbf16, #tpu.memory_space<vmem>>, vector<8x256xbf16>
    tpu.vector_store %arg22[%c0_38, %c256], %53 {strides = array<i32>} : memref<8x512xbf16, #tpu.memory_space<vmem>>, vector<8x256xbf16>,
    %c0_39 = arith.constant 0 : index
    %c0_40 = arith.constant 0 : index
    %55 = vector.load %arg21[%c0_39, %c0_40] : memref<8x1024xf32, #tpu.memory_space<vmem>>, vector<8x1024xf32>
    %c0_41 = arith.constant 0 : index
    %c0_42 = arith.constant 0 : index
    %56 = vector.load %arg22[%c0_41, %c0_42] : memref<8x512xbf16, #tpu.memory_space<vmem>>, vector<8x512xbf16>
    %c0_43 = arith.constant 0 : index
    %c0_44 = arith.constant 0 : index
    %57 = vector.load %arg15[%c0_43, %c0_44] : memref<512x1024xbf16, #tpu.memory_space<vmem>>, vector<512x1024xbf16>
    %cst_45 = arith.constant dense<0.000000e+00> : vector<8x1024xf32>
    %58 = tpu.matmul %56, %57, %cst_45 {dimension_numbers = #tpu.dot_dimension_numbers<[1], [0], [0], [1], [0, 0, 1, 1], [], []>} : vector<8x512xbf16>, vector<512x1024xbf16>, vector<8x1024xf32> -> vector<8x1024xf32>
    %59 = arith.addf %55, %58 : vector<8x1024xf32>
    %c0_46 = arith.constant 0 : index
    %c0_47 = arith.constant 0 : index
    %60 = vector.load %arg21[%c0_46, %c0_47] : memref<8x1024xf32, #tpu.memory_space<vmem>>, vector<8x1024xf32>
    tpu.vector_store %arg21[%c0_46, %c0_47], %59 {strides = array<i32>} : memref<8x1024xf32, #tpu.memory_space<vmem>>, vector<8x1024xf32>,
    %c1_i32 = arith.constant 1 : i32
    %61 = arith.cmpi eq, %arg1, %c1_i32 : i32
    %62 = arith.extui %61 : i1 to i32
    %c0_i32_48 = arith.constant 0 : i32
    %63 = arith.cmpi ne, %62, %c0_i32_48 : i32
    scf.if %63 {
      %c0_49 = arith.constant 0 : index
      %c0_50 = arith.constant 0 : index
      %64 = vector.load %arg21[%c0_49, %c0_50] : memref<8x1024xf32, #tpu.memory_space<vmem>>, vector<8x1024xf32>
      %c0_51 = arith.constant 0 : index
      %c0_52 = arith.constant 0 : index
      %65 = vector.load %arg16[%c0_51, %c0_52] : memref<1x1024xf32, #tpu.memory_space<vmem>>, vector<1x1024xf32>
      %66 = vector.broadcast %65 : vector<1x1024xf32> to vector<8x1024xf32>
      %67 = arith.addf %64, %66 : vector<8x1024xf32>
      %cst_53 = arith.constant 0.000000e+00 : f32
      %68 = vector.broadcast %cst_53 : f32 to vector<8x1024xf32>
      %69 = arith.maximumf %67, %68 : vector<8x1024xf32>
      %c0_54 = arith.constant 0 : index
      %c0_55 = arith.constant 0 : index
      %70 = vector.load %arg17[%c0_54, %c0_55] : memref<1x1024xf32, #tpu.memory_space<vmem>>, vector<1x1024xf32>
      %71 = vector.broadcast %70 : vector<1x1024xf32> to vector<8x1024xf32>
      %72 = arith.mulf %69, %71 : vector<8x1024xf32>
      %cst_56 = arith.constant dense<0.000000e+00> : vector<8xf32>
      %73 = vector.multi_reduction <add>, %72, %cst_56 [1] : vector<8x1024xf32> to vector<8xf32>
      %74 = vector.shape_cast %73 : vector<8xf32> to vector<8x1xf32>
      %c0_57 = arith.constant 0 : index
      %c0_58 = arith.constant 0 : index
      %75 = vector.load %arg18[%c0_57, %c0_58] : memref<1x1xf32, #tpu.memory_space<vmem>>, vector<1x1xf32>
      %76 = vector.broadcast %75 : vector<1x1xf32> to vector<8x1xf32>
      %77 = arith.addf %74, %76 : vector<8x1xf32>
      %78 = arith.negf %77 : vector<8x1xf32>
      %79 = math.exp %78 : vector<8x1xf32>
      %cst_59 = arith.constant 1.000000e+00 : f32
      %80 = vector.broadcast %cst_59 : f32 to vector<8x1xf32>
      %81 = arith.addf %80, %79 : vector<8x1xf32>
      %82 = arith.divf %80, %81 : vector<8x1xf32>
      %c0_60 = arith.constant 0 : index
      %c0_61 = arith.constant 0 : index
      %83 = vector.load %arg19[%c0_60, %c0_61] : memref<8x1xf32, #tpu.memory_space<vmem>>, vector<8x1xf32>
      tpu.vector_store %arg19[%c0_60, %c0_61], %82 {strides = array<i32>} : memref<8x1xf32, #tpu.memory_space<vmem>>, vector<8x1xf32>,
    } else {
    }
    return
  }
  func.func @transform_0(%arg0: i32, %arg1: i32) -> (i32, i32) {
    %c0_i32 = arith.constant 0 : i32
    return %arg0, %arg1 : i32, i32
  }
  func.func @transform_1(%arg0: i32, %arg1: i32) -> (i32, i32, i32) {
    %c0_i32 = arith.constant 0 : i32
    %c0_i32_0 = arith.constant 0 : i32
    %c0_i32_1 = arith.constant 0 : i32
    return %arg1, %c0_i32, %c0_i32_0 : i32, i32, i32
  }
  func.func @transform_2(%arg0: i32, %arg1: i32) -> (i32, i32, i32) {
    %c0_i32 = arith.constant 0 : i32
    %c0_i32_0 = arith.constant 0 : i32
    %c0_i32_1 = arith.constant 0 : i32
    return %arg1, %c0_i32, %c0_i32_0 : i32, i32, i32
  }
  func.func @transform_3(%arg0: i32, %arg1: i32) -> (i32, i32, i32) {
    %c0_i32 = arith.constant 0 : i32
    %c0_i32_0 = arith.constant 0 : i32
    %c0_i32_1 = arith.constant 0 : i32
    return %arg1, %c0_i32, %c0_i32_0 : i32, i32, i32
  }
  func.func @transform_4(%arg0: i32, %arg1: i32) -> (i32, i32, i32) {
    %c0_i32 = arith.constant 0 : i32
    %c0_i32_0 = arith.constant 0 : i32
    %c0_i32_1 = arith.constant 0 : i32
    return %arg1, %c0_i32, %c0_i32_0 : i32, i32, i32
  }
  func.func @transform_5(%arg0: i32, %arg1: i32) -> (i32, i32) {
    %c0_i32 = arith.constant 0 : i32
    %c0_i32_0 = arith.constant 0 : i32
    return %arg0, %c0_i32 : i32, i32
  }
  func.func @transform_6(%arg0: i32, %arg1: i32) -> (i32, i32) {
    %c0_i32 = arith.constant 0 : i32
    %c0_i32_0 = arith.constant 0 : i32
    return %arg0, %c0_i32 : i32, i32
  }
  func.func @transform_7(%arg0: i32, %arg1: i32) -> (i32, i32) {
    %c0_i32 = arith.constant 0 : i32
    %c0_i32_0 = arith.constant 0 : i32
    %c0_i32_1 = arith.constant 0 : i32
    return %c0_i32, %c0_i32_0 : i32, i32
  }
  func.func @transform_8(%arg0: i32, %arg1: i32) -> (i32, i32) {
    %c0_i32 = arith.constant 0 : i32
    %c0_i32_0 = arith.constant 0 : i32
    %c0_i32_1 = arith.constant 0 : i32
    return %c0_i32, %c0_i32_0 : i32, i32
  }
  func.func @transform_9(%arg0: i32, %arg1: i32) -> (i32, i32) {
    %c0_i32 = arith.constant 0 : i32
    %c0_i32_0 = arith.constant 0 : i32
    return %c0_i32, %arg1 : i32, i32
  }
  func.func @transform_10(%arg0: i32, %arg1: i32) -> (i32, i32) {
    %c0_i32 = arith.constant 0 : i32
    %c0_i32_0 = arith.constant 0 : i32
    return %c0_i32, %arg1 : i32, i32
  }
  func.func @transform_11(%arg0: i32, %arg1: i32) -> (i32, i32) {
    %c0_i32 = arith.constant 0 : i32
    %c0_i32_0 = arith.constant 0 : i32
    return %c0_i32, %arg1 : i32, i32
  }
  func.func @transform_12(%arg0: i32, %arg1: i32) -> (i32, i32) {
    %c0_i32 = arith.constant 0 : i32
    %c0_i32_0 = arith.constant 0 : i32
    return %c0_i32, %arg1 : i32, i32
  }
  func.func @transform_13(%arg0: i32, %arg1: i32) -> (i32, i32) {
    %c0_i32 = arith.constant 0 : i32
    %c0_i32_0 = arith.constant 0 : i32
    return %arg1, %c0_i32 : i32, i32
  }
  func.func @transform_14(%arg0: i32, %arg1: i32) -> (i32, i32) {
    %c0_i32 = arith.constant 0 : i32
    %c0_i32_0 = arith.constant 0 : i32
    %c0_i32_1 = arith.constant 0 : i32
    return %c0_i32, %c0_i32_0 : i32, i32
  }
  func.func @transform_15(%arg0: i32, %arg1: i32) -> (i32, i32) {
    %c0_i32 = arith.constant 0 : i32
    %c0_i32_0 = arith.constant 0 : i32
    %c0_i32_1 = arith.constant 0 : i32
    return %c0_i32, %c0_i32_0 : i32, i32
  }
  func.func @transform_16(%arg0: i32, %arg1: i32) -> (i32, i32) {
    %c0_i32 = arith.constant 0 : i32
    %c0_i32_0 = arith.constant 0 : i32
    %c0_i32_1 = arith.constant 0 : i32
    return %c0_i32, %c0_i32_0 : i32, i32
  }
  func.func @transform_17(%arg0: i32, %arg1: i32) -> (i32, i32) {
    %c0_i32 = arith.constant 0 : i32
    %c0_i32_0 = arith.constant 0 : i32
    return %arg0, %c0_i32 : i32, i32
  }
}

</mosaic_0001>

<bundles_post_ra>
// kernel: tpu_custom_call.1
= control target key start
LH: loop header
LB: loop body
LE: loop exit
PB: predicated region body
PF: predicated region fallthrough
CT: control target
= control target key end

     0   :  { %s10045_s0 = inlined_call_operand.hbm [shape: bf16[8,256], index: 0, kind: input, shape index: {}]   ;;  %s10046_s1 = inlined_call_operand.hbm [shape: bf16[2,128,512], index: 1, kind: input, shape index: {}]   ;;  %s10047_s2 = inlined_call_operand.hbm [shape: f32[2,1,512], index: 2, kind: input, shape index: {}]   ;;  %s10048_s3 = inlined_call_operand.hbm [shape: bf16[4,256,256], index: 3, kind: input, shape index: {}]   ;;  %s10049_s4 = inlined_call_operand.hbm [shape: f32[4,1,256], index: 4, kind: input, shape index: {}]   ;;  %s10050_s5 = inlined_call_operand.hbm [shape: bf16[8,16], index: 5, kind: input, shape index: {}]   ;;  %s10051_s6 = inlined_call_operand.vmem [shape: f32[8,1], index: 6, kind: input, shape index: {}]   ;;  %s10052_s7 = inlined_call_operand.hbm [shape: bf16[16,1024], index: 7, kind: input, shape index: {}]   ;;  %s10053_s8 = inlined_call_operand.hbm [shape: f32[1,1024], index: 8, kind: input, shape index: {}]   ;;  %s10054_s9 = inlined_call_operand.hbm [shape: bf16[1024,1024], index: 9, kind: input, shape index: {}]   ;;  %s10055_s10 = inlined_call_operand.hbm [shape: f32[1,1024], index: 10, kind: input, shape index: {}]   ;;  %s10056_s11 = inlined_call_operand.hbm [shape: f32[1,1024], index: 11, kind: input, shape index: {}]   ;;  %s10057_s12 = inlined_call_operand.hbm [shape: f32[1,1024], index: 12, kind: input, shape index: {}]   ;;  %s10058_s13 = inlined_call_operand.hbm [shape: bf16[1024,1024], index: 13, kind: input, shape index: {}]   ;;  %s10059_s14 = inlined_call_operand.hbm [shape: f32[1,1024], index: 14, kind: input, shape index: {}]   ;;  %s10060_s15 = inlined_call_operand.hbm [shape: f32[1,1024], index: 15, kind: input, shape index: {}]   ;;  %s10061_s16 = inlined_call_operand.<no memory space> [shape: f32[1,1], index: 16, kind: input, shape index: {}]   ;;  %s10062_s17 = inlined_call_operand.vmem [shape: f32[8,1], index: 17, kind: output, shape index: {}]  }
   0x1   :  { %10101 = sst [smem:[#allocation47_spill]] %s10045_s0  ;;  %v22_v0 = vstv %s10061_s16 }
   0x2   :  { %10102 = sst [smem:[#allocation48_spill]] %s10046_s1  ;;  %23 = vst [vmem:[#allocation5] sm:$0x1] %v22_v0 }
   0x3   :  { %10103 = sst [smem:[#allocation49_spill]] %s10047_s2 }
   0x4   :  { %10104 = sst [smem:[#allocation50_spill]] %s10048_s3 }
   0x5   :  { %10105 = sst [smem:[#allocation51_spill]] %s10049_s4 }
   0x6   :  { %10106 = sst [smem:[#allocation52_spill]] %s10050_s5 }
   0x7   :  { %10107 = sst [smem:[#allocation53_spill]] %s10051_s6 }
   0x8   :  { %10108 = sst [smem:[#allocation54_spill]] %s10052_s7 }
   0x9   :  { %10109 = sst [smem:[#allocation55_spill]] %s10054_s9 }
   0xa   :  { %10110 = sst [smem:[#allocation56_spill]] %s10057_s12 }
   0xb   :  { %10111 = sst [smem:[#allocation57_spill]] %s10058_s13 }
   0xc   :  { %10112 = sst [smem:[#allocation58_spill]] %s10059_s14 }
   0xd   :  { %10113 = sst [smem:[#allocation59_spill]] %s10060_s15 }
   0xe   :  { %10114 = sst [smem:[#allocation60_spill]] %s10062_s17 }
   0xf   :  { %24 = vsyncpa [#allocation7], 0 }
  0x10   :  { %26 = vsyncpa [#allocation7 + $0x1], 0 }
  0x11   :  { %27 = vsyncpa [#allocation9], 0 }
  0x12   :  { %29 = vsyncpa [#allocation9 + $0x1], 0 }
  0x13   :  { %30 = vsyncpa [#allocation12], 0 }
  0x14   :  { %32 = vsyncpa [#allocation12 + $0x1], 0 }
  0x15   :  { %33 = vsyncpa [#allocation15], 0 }
  0x16   :  { %34 = vsyncpa [#allocation18], 0  ;;  %s8614_s26 = smov 0   ;;  %s8616_s27 = smov 0  }
  0x17   :  { %s8618_s28 = smov 0   ;;  %s8620_s29 = smov 0  }
  0x18   :  { %s8622_s0 = smov 0   ;;  %s8624_s16 = smov 0  }
  0x19 LB: > { %10115 = sst [smem:[#allocation38_spill]] %s8478_s27  ;;  %s10065_s30 = sadd.s32 4294967295, %s8494_s16   ;;  %s8494_s16 = sphi %s8624_s16, %s40_s16   ;;  %s8490_s0 = sphi %s8622_s0, %s10182_s0   ;;  %s8486_s29 = sphi %s8620_s29, %s10181_s29   ;;  %s8482_s28 = sphi %s8618_s28, %s10179_s28   ;;  %s8478_s27 = sphi %s8616_s27, %s10178_s27   ;;  %s8474_s26 = sphi %s8614_s26, %s10177_s26  }
  0x1a   : > { %10116 = sst [smem:[#allocation39_spill]] %s8482_s28  ;;  %p74_p0 = scmp.ne.s32.totalorder %s8478_s27, %s8474_s26 }
  0x1b   : > { %10117 = sst [smem:[#allocation40_spill]] %s8486_s29  ;;  %p8646_p1 = scmp.eq.s32.totalorder %s10065_s30, 0 }
  0x1c   : > { %10118 = sst [smem:[#allocation41_spill]] %s8494_s16  ;;  %p6502_p2 = scmp.ge.s32.totalorder %s8494_s16, 1 }
  0x1d   : > { %s10119_s18 = scalar_select %p8646_p1, 1, 0 }
  0x1e   : > { %p502_p3 = scmp.lt.s32.totalorder %s8494_s16, 3  ;;  %p8654_p4 = por %p8646_p1, %p74_p0 }
  0x1f   : > { %10120 = sst [smem:[#allocation42_spill]] %s10119_s18  ;;  %s8496_s20 = smov [#allocation24]  }
  0x20   : > { %s10121_s19 = scalar_select %p8654_p4, 1, 0 }
  0x21   : > { %p8658_p5 = pnand %p6502_p2, %p502_p3  ;;  %s559_s21 = sshll.u32 %s8496_s20, 4  ;;  %s560_s21 = int_to_ptr.vmem [resolvable:$true] %s559_s21 }
  0x22   : > { %10122 = sst [smem:[#allocation43_spill]] %s10121_s19  ;;  %s49_s23 = sadd.s32 1, %s8490_s0 }
  0x23   : > { %s10123_s1 = scalar_select %p8658_p5, 1, 0 }
  0x24   : > { %p7298_p6 = pneg %p8658_p5  ;;  %p8672_p8 = scmp.ge.s32.totalorder %s49_s23, 2 }
  0x25   : > { %10124 = sst [smem:[#allocation44_spill]] %s10123_s1  ;;  %s10127_s14 = sld [smem:[#allocation58_spill]] }
  0x26   : > { %p8666_p7 = pnand %p7298_p6, %p8646_p1 }
  0x27   : > { %s10126_s25 = scalar_select %p8672_p8, 1, 0 }
  0x28   : > { %s10125_s22 = scalar_select %p8666_p7, 1, 0 }
  0x29   : > { %p8684_p10 = pneg %p8666_p7 }
  0x2b   : > { %s7960_s17 = scalar_lea.hbm %s10127_s14, 128 }
  0x2c   : > { %p7961_p9 = scmp.ne.s32.totalorder %s10127_s14, %s7960_s17  ;;  %p7967_p13 = scmp.lt.u32.totalorder %s7960_s17, %s10127_s14 }
  0x2d   : > { %s10128_s29 = scalar_select %p8684_p10, 1, 0 }
  0x2e   : > { %p7963_p11 = pnand %p8684_p10, %p7961_p9 }
  0x30   : > { %p7964_p12 = pneg %p7963_p11 }
  0x32   : > { %p7969_p0 = pnand %p7967_p13, %p7964_p12 }
  0x34   : > { %7972 = shalt.err (!%p7969_p0)
}
  0x35   : > { %s7973_s30 = scalar_lea.vmem %s560_s21, 128  ;;  %p7981_p1 = scmp.lt.s32.totalorder %s560_s21, %s560_s21 }
  0x36   : > { %p7974_p2 = scmp.ne.s32.totalorder %s560_s21, %s7973_s30  ;;  %p7982_p4 = scmp.lt.s32.totalorder %s7973_s30, %s7973_s30 }
  0x38   : > { %p7976_p3 = pnand %p7974_p2, %p8684_p10  ;;  %p7983_p5 = por %p7982_p4, %p7981_p1 }
  0x3a   : > { %p7977_p6 = pneg %p7976_p3 }
  0x3c   : > { %p7984_p8 = pnand %p7983_p5, %p7977_p6 }
  0x3e   : > { %7987 = shalt.err (!%p7984_p8)
}
  0x3f   : > { %7310 = dma.hbm_to_vmem [thread:$0]  (!%p8666_p7), %s10127_s14, 128, %s560_s21, [#allocation12]  }
  0x40   : > { %p10129_p1 = scmp.ne.s32.totalorder %s10126_s25, 0  ;;  %p68_p4 = scmp.ne.s32.totalorder %s8482_s28, %s8478_s27 }
  0x41   : > { %p69_p5 = scmp.eq.s32.totalorder %s8494_s16, 0  ;;  %p7350_p8 = scmp.lt.s32.totalorder %s8494_s16, 2 }
  0x42   : > { %s10184_s23 = smov (%p10129_p1, %s49_s23), 0  ;;  %s8711_s18 = sand.u32 1, %s8494_s16  }
  0x43   : > { %10130 = sst [smem:[#allocation45_spill]] %s10184_s23  ;;  %s57_s17 = ssub.s32 %s8490_s0, %s10184_s23 }
  0x44   : > { %p59_p9 = scmp.eq.s32.totalorder %s57_s17, 0  ;;  %p70_p11 = por %p69_p5, %p68_p4 }
  0x45   : > { %s8714_s24 = sand.u32 1, %s8482_s28   ;;  %s10131_s20 = sadd.s32 1, %s8482_s28 }
  0x46   : > { %s8719_s30 = scalar_select %p59_p9, %s8482_s28, %s10131_s20  }
  0x47   : > { %p8721_p12 = pnand %p7350_p8, %p70_p11  ;;  %s6512_s25 = sshll.u32 %s8714_s24, 8 }
  0x48   : > { %10132 = sst [smem:[#allocation46_spill]] %s8719_s30  ;;  %s7236_s6 = sshll.u32 %s8490_s0, 12 }
  0x49   : > { %s10133_s21 = scalar_select %p8721_p12, 1, 0 }
  0x4a   : > { %s10134_s17 = sld [smem:[#allocation48_spill]]  ;;  %s608_s19 = scalar_lea.vmem [#allocation8], %s6512_s25 }
  0x4b   : > { %s615_s27 = sshll.u32 %s608_s19, 4  ;;  %s8735_s20 = scalar_lea.sflag [#allocation9], %s8711_s18  ;;  %s8732_s27 = int_to_ptr.vmem [resolvable:$true] %s615_s27 }
  0x4c   : > { %p8741_p0 = pneg %p8721_p12 }
  0x4e   : > { %s10135_s28 = scalar_select %p8741_p0, 1, 0 }
  0x50   : > { %s8730_s23 = scalar_lea.hbm %s10134_s17, %s7236_s6  ;;  %s7993_s25 = scalar_lea.hbm %s10134_s17, 8192 }
  0x51   : > { %s7988_s30 = scalar_lea.hbm %s8730_s23, 4096  ;;  %p7994_p6 = scmp.lt.u32.totalorder %s8730_s23, %s10134_s17 }
  0x52   : > { %p7989_p13 = scmp.ne.s32.totalorder %s8730_s23, %s7988_s30  ;;  %p7995_p1 = scmp.lt.u32.totalorder %s7993_s25, %s7988_s30 }
  0x53   : > { %p7997_p5 = scmp.lt.u32.totalorder %s7988_s30, %s8730_s23 }
  0x54   : > { %p7991_p2 = pnand %p8741_p0, %p7989_p13  ;;  %p7996_p4 = por %p7995_p1, %p7994_p6 }
  0x56   : > { %p7992_p3 = pneg %p7991_p2  ;;  %p7998_p8 = por %p7997_p5, %p7996_p4 }
  0x58   : > { %p7999_p9 = pnand %p7998_p8, %p7992_p3 }
  0x5a   : > { %8002 = shalt.err (!%p7999_p9)
}
  0x5b   : > { %s8003_s16 = scalar_lea.vmem %s8732_s27, 4096  ;;  %s8497_s14 = smov [#allocation8]  }
  0x5c   : > { %p8004_p11 = scmp.ne.s32.totalorder %s8732_s27, %s8003_s16  ;;  %s8008_s6 = sshll.u32 %s8497_s14, 4  ;;  %s8009_s6 = int_to_ptr.vmem [resolvable:$false] %s8008_s6 }
  0x5d   : > { %s8010_s19 = scalar_lea.vmem %s8009_s6, 8192  ;;  %p8011_p7 = scmp.lt.s32.totalorder %s8732_s27, %s8009_s6 }
  0x5e   : > { %p8006_p13 = pnand %p8004_p11, %p8741_p0  ;;  %p8012_p10 = scmp.lt.s32.totalorder %s8010_s19, %s8003_s16 }
  0x60   : > { %p8007_p2 = pneg %p8006_p13  ;;  %p8013_p6 = por %p8012_p10, %p8011_p7 }
  0x62   : > { %p8014_p1 = pnand %p8013_p6, %p8007_p2 }
  0x64   : > { %8017 = shalt.err (!%p8014_p1)
}
  0x65   : > { %s10089_s30 = smov 256   ;;  %s10090_s25 = smov 16  }
  0x66   : > { %7320 = dma.hbm_to_vmem [thread:$0]  (!%p8721_p12), %s8730_s23, 4096, %s8732_s27, %s8735_s20, %s10089_s30, %s10089_s30, %s10090_s25  }
  0x67   : > { %s8500_s26 = smov [#allocation14]   ;;  %s8769_s16 = sshll.u32 %s8714_s24, 2 }
  0x68   : > { %s517_s14 = sshll.u32 %s8500_s26, 4  ;;  %s10136_s5 = sld [smem:[#allocation52_spill]]  ;;  %s518_s14 = int_to_ptr.vmem [resolvable:$true] %s517_s14 }
  0x69   : > { %p10137_p10 = scmp.ne.s32.totalorder %s10128_s29, 0 }
  0x6e   : > { %s8018_s17 = scalar_lea.hbm %s10136_s5, 64 }
  0x6f   : > { %p8019_p7 = scmp.ne.s32.totalorder %s10136_s5, %s8018_s17  ;;  %p8025_p5 = scmp.lt.u32.totalorder %s8018_s17, %s10136_s5 }
  0x71   : > { %p8021_p3 = pnand %p8019_p7, %p10137_p10 }
  0x73   : > { %p8022_p4 = pneg %p8021_p3 }
  0x75   : > { %p8027_p8 = pnand %p8025_p5, %p8022_p4 }
  0x77   : > { %8030 = shalt.err (!%p8027_p8)
}
  0x78   : > { %s8031_s27 = scalar_lea.vmem %s518_s14, 64  ;;  %p8039_p2 = scmp.lt.s32.totalorder %s518_s14, %s518_s14 }
  0x79   : > { %p8032_p9 = scmp.ne.s32.totalorder %s518_s14, %s8031_s27  ;;  %p8040_p6 = scmp.lt.s32.totalorder %s8031_s27, %s8031_s27 }
  0x7b   : > { %p8034_p11 = pnand %p8032_p9, %p10137_p10  ;;  %p8041_p1 = por %p8040_p6, %p8039_p2 }
  0x7d   : > { %p8035_p13 = pneg %p8034_p11 }
  0x7f   : > { %p8042_p12 = pnand %p8041_p1, %p8035_p13 }
  0x81   : > { %8045 = shalt.err (!%p8042_p12)
}
  0x82   : > { %p10138_p7 = scmp.ne.s32.totalorder %s10125_s22, 0  ;;  %s8790_s12 = sshll.u32 %s8490_s0, 6 }
  0x83   : > { %s10139_s17 = sld [smem:[#allocation47_spill]]  ;;  %s588_s6 = scalar_lea.vmem [#allocation6], %s8769_s16 }
  0x84   : > { %7301 = dma.hbm_to_vmem [thread:$0]  (!%p10138_p7), %s10136_s5, 64, %s518_s14, [#allocation15]  }
  0x85   : > { %s597_s19 = sshll.u32 %s588_s6, 4  ;;  %s8800_s27 = scalar_lea.sflag [#allocation7], %s8711_s18  ;;  %s598_s19 = int_to_ptr.vmem [resolvable:$true] %s597_s19 }
  0x89   : > { %s8796_s26 = scalar_lea.hbm %s10139_s17, %s8790_s12  ;;  %s8051_s15 = scalar_lea.hbm %s10139_s17, 128 }
  0x8a   : > { %s8046_s13 = scalar_lea.hbm %s8796_s26, 64  ;;  %p8052_p5 = scmp.lt.u32.totalorder %s8796_s26, %s10139_s17 }
  0x8b   : > { %p8047_p12 = scmp.ne.s32.totalorder %s8796_s26, %s8046_s13  ;;  %p8053_p8 = scmp.lt.u32.totalorder %s8051_s15, %s8046_s13 }
  0x8c   : > { %p8055_p11 = scmp.lt.u32.totalorder %s8046_s13, %s8796_s26 }
  0x8d   : > { %p8049_p3 = pnand %p8047_p12, %p8741_p0  ;;  %p8054_p9 = por %p8053_p8, %p8052_p5 }
  0x8f   : > { %p8050_p4 = pneg %p8049_p3  ;;  %p8056_p13 = por %p8055_p11, %p8054_p9 }
  0x91   : > { %p8057_p2 = pnand %p8056_p13, %p8050_p4 }
  0x93   : > { %8060 = shalt.err (!%p8057_p2)
}
  0x94   : > { %s8061_s6 = scalar_lea.vmem %s598_s19, 64  ;;  %s8501_s25 = smov [#allocation6]  }
  0x95   : > { %p8062_p6 = scmp.ne.s32.totalorder %s598_s19, %s8061_s6  ;;  %s8066_s5 = sshll.u32 %s8501_s25, 4  ;;  %s8067_s5 = int_to_ptr.vmem [resolvable:$false] %s8066_s5 }
  0x96   : > { %s8068_s14 = scalar_lea.vmem %s8067_s5, 128  ;;  %p8069_p3 = scmp.lt.s32.totalorder %s598_s19, %s8067_s5 }
  0x97   : > { %p8064_p1 = pnand %p8062_p6, %p8741_p0  ;;  %p8070_p7 = scmp.lt.s32.totalorder %s8068_s14, %s8061_s6 }
  0x99   : > { %p8065_p12 = pneg %p8064_p1  ;;  %p8071_p10 = por %p8070_p7, %p8069_p3 }
  0x9b   : > { %p8072_p5 = pnand %p8071_p10, %p8065_p12 }
  0x9d   : > { %8075 = shalt.err (!%p8072_p5)
}
  0x9e   : > { %p10140_p8 = scmp.ne.s32.totalorder %s10133_s21, 0  ;;  %s10141_s2 = sld [smem:[#allocation49_spill]] }
  0x9f   : > { %s629_s5 = scalar_lea.vmem [#allocation10], %s8769_s16 }
  0xa0   : > { %7317 = dma.hbm_to_vmem [thread:$0]  (!%p10140_p8), %s8796_s26, 64, %s598_s19, %s8800_s27  }
  0xa1   : > { %s637_s25 = sshll.u32 %s629_s5, 4  ;;  %s638_s25 = int_to_ptr.vmem [resolvable:$true] %s637_s25 }
  0xa4   : > { %s8824_s1 = scalar_lea.hbm %s10141_s2, %s8790_s12  ;;  %s8081_s26 = scalar_lea.hbm %s10141_s2, 128 }
  0xa5   : > { %s8076_s15 = scalar_lea.hbm %s8824_s1, 64  ;;  %p8082_p9 = scmp.lt.u32.totalorder %s8824_s1, %s10141_s2 }
  0xa6   : > { %p8077_p10 = scmp.ne.s32.totalorder %s8824_s1, %s8076_s15  ;;  %p8083_p11 = scmp.lt.u32.totalorder %s8081_s26, %s8076_s15 }
  0xa7   : > { %p8085_p2 = scmp.lt.u32.totalorder %s8076_s15, %s8824_s1 }
  0xa8   : > { %p8079_p7 = pnand %p8077_p10, %p8741_p0  ;;  %p8084_p13 = por %p8083_p11, %p8082_p9 }
  0xaa   : > { %p8080_p4 = pneg %p8079_p7  ;;  %p8086_p6 = por %p8085_p2, %p8084_p13 }
  0xac   : > { %p8087_p1 = pnand %p8086_p6, %p8080_p4 }
  0xae   : > { %8090 = shalt.err (!%p8087_p1)
}
  0xaf   : > { %s8091_s30 = scalar_lea.vmem %s638_s25, 64  ;;  %s8502_s13 = smov [#allocation10]  }
  0xb0   : > { %p8092_p12 = scmp.ne.s32.totalorder %s638_s25, %s8091_s30  ;;  %s8096_s5 = sshll.u32 %s8502_s13, 4  ;;  %s8097_s5 = int_to_ptr.vmem [resolvable:$false] %s8096_s5 }
  0xb1   : > { %s8098_s23 = scalar_lea.vmem %s8097_s5, 128  ;;  %p8099_p10 = scmp.lt.s32.totalorder %s638_s25, %s8097_s5 }
  0xb2   : > { %p8094_p3 = pnand %p8092_p12, %p8741_p0  ;;  %p8100_p7 = scmp.lt.s32.totalorder %s8098_s23, %s8091_s30 }
  0xb4   : > { %p8095_p5 = pneg %p8094_p3  ;;  %p8101_p8 = por %p8100_p7, %p8099_p10 }
  0xb6   : > { %p8102_p9 = pnand %p8101_p8, %p8095_p5 }
  0xb8   : > { %8105 = shalt.err (!%p8102_p9)
}
  0xb9   : > { %p10142_p11 = scmp.ne.s32.totalorder %s10133_s21, 0  ;;  %s6518_s15 = sshll.u32 %s8714_s24, 9 }
  0xba   : > { %s7239_s6 = sshll.u32 %s8490_s0, 13  ;;  %s10143_s3 = sld [smem:[#allocation50_spill]] }
  0xbb   : > { %7323 = dma.hbm_to_vmem [thread:$0]  (!%p10142_p11), %s8824_s1, 64, %s638_s25, %s8735_s20  }
  0xbc   : > { %s648_s30 = scalar_lea.vmem [#allocation11], %s6518_s15  ;;  %s8855_s5 = scalar_lea.sflag [#allocation12], %s8711_s18 }
  0xbd   : > { %s656_s13 = sshll.u32 %s648_s30, 4  ;;  %s8852_s13 = int_to_ptr.vmem [resolvable:$true] %s656_s13 }
  0xc0   : > { %s8850_s14 = scalar_lea.hbm %s10143_s3, %s7239_s6  ;;  %s8111_s6 = scalar_lea.hbm %s10143_s3, 16384 }
  0xc1   : > { %s8106_s23 = scalar_lea.hbm %s8850_s14, 8192  ;;  %p8112_p2 = scmp.lt.u32.totalorder %s8850_s14, %s10143_s3 }
  0xc2   : > { %p8107_p8 = scmp.ne.s32.totalorder %s8850_s14, %s8106_s23  ;;  %p8113_p6 = scmp.lt.u32.totalorder %s8111_s6, %s8106_s23 }
  0xc3   : > { %p8115_p12 = scmp.lt.u32.totalorder %s8106_s23, %s8850_s14 }
  0xc4   : > { %p8109_p4 = pnand %p8107_p8, %p8741_p0  ;;  %p8114_p1 = por %p8113_p6, %p8112_p2 }
  0xc6   : > { %p8110_p13 = pneg %p8109_p4  ;;  %p8116_p3 = por %p8115_p12, %p8114_p1 }
  0xc8   : > { %p8117_p5 = pnand %p8116_p3, %p8110_p13 }
  0xca   : > { %8120 = shalt.err (!%p8117_p5)
}
  0xcb   : > { %s8121_s18 = scalar_lea.vmem %s8852_s13, 8192  ;;  %s8503_s15 = smov [#allocation11]  }
  0xcc   : > { %p8122_p10 = scmp.ne.s32.totalorder %s8852_s13, %s8121_s18  ;;  %s8126_s30 = sshll.u32 %s8503_s15, 4  ;;  %s8127_s30 = int_to_ptr.vmem [resolvable:$false] %s8126_s30 }
  0xcd   : > { %s8128_s1 = scalar_lea.vmem %s8127_s30, 16384  ;;  %p8129_p8 = scmp.lt.s32.totalorder %s8852_s13, %s8127_s30 }
  0xce   : > { %p8124_p7 = pnand %p8122_p10, %p8741_p0  ;;  %p8130_p4 = scmp.lt.s32.totalorder %s8128_s1, %s8121_s18 }
  0xd0   : > { %p8125_p9 = pneg %p8124_p7  ;;  %p8131_p2 = por %p8130_p4, %p8129_p8 }
  0xd2   : > { %p8132_p6 = pnand %p8131_p2, %p8125_p9 }
  0xd4   : > { %8135 = shalt.err (!%p8132_p6)
}
  0xd5   : > { %s8504_s23 = smov 128   ;;  %s8505_s25 = smov 8  }
  0xd6   : > { %7326 = dma.hbm_to_vmem [thread:$0]  (!%p10142_p11), %s8850_s14, 8192, %s8852_s13, %s8855_s5, %s8504_s23, %s8504_s23, %s8505_s25  }
  0xd7   : > { %s8506_s6 = smov [#allocation16]   ;;  %s10144_s7 = sld [smem:[#allocation54_spill]] }
  0xd8   : > { %s534_s26 = sshll.u32 %s8506_s6, 4  ;;  %p10145_p1 = scmp.ne.s32.totalorder %s10128_s29, 0  ;;  %s535_s26 = int_to_ptr.vmem [resolvable:$true] %s534_s26 }
  0xdd   : > { %s8136_s30 = scalar_lea.hbm %s10144_s7, 1024 }
  0xde   : > { %p8137_p13 = scmp.ne.s32.totalorder %s10144_s7, %s8136_s30  ;;  %p8143_p5 = scmp.lt.u32.totalorder %s8136_s30, %s10144_s7 }
  0xe0   : > { %p8139_p12 = pnand %p8137_p13, %p10145_p1 }
  0xe2   : > { %p8140_p3 = pneg %p8139_p12 }
  0xe4   : > { %p8145_p10 = pnand %p8143_p5, %p8140_p3 }
  0xe6   : > { %8148 = shalt.err (!%p8145_p10)
}
  0xe7   : > { %s8149_s14 = scalar_lea.vmem %s535_s26, 1024  ;;  %p8157_p4 = scmp.lt.s32.totalorder %s535_s26, %s535_s26 }
  0xe8   : > { %p8150_p7 = scmp.ne.s32.totalorder %s535_s26, %s8149_s14  ;;  %p8158_p2 = scmp.lt.s32.totalorder %s8149_s14, %s8149_s14 }
  0xea   : > { %p8152_p9 = pnand %p8150_p7, %p10145_p1  ;;  %p8159_p6 = por %p8158_p2, %p8157_p4 }
  0xec   : > { %p8153_p8 = pneg %p8152_p9 }
  0xee   : > { %p8160_p11 = pnand %p8159_p6, %p8153_p8 }
  0xf0   : > { %8163 = shalt.err (!%p8160_p11)
}
  0xf1   : > { %s10093_s13 = smov 512   ;;  %s10095_s2 = smov 32  }
  0xf2   : > { %p10146_p13 = scmp.ne.s32.totalorder %s10125_s22, 0  ;;  %s10147_s4 = sld [smem:[#allocation51_spill]] }
  0xf3   : > { %s670_s15 = scalar_lea.vmem [#allocation13], %s8769_s16 }
  0xf4   : > { %7304 = dma.hbm_to_vmem [thread:$0]  (!%p10146_p13), %s10144_s7, 1024, %s535_s26, [#allocation15], %s10093_s13, %s10093_s13, %s10095_s2  }
  0xf5   : > { %s678_s30 = sshll.u32 %s670_s15, 4  ;;  %s8907_s30 = int_to_ptr.vmem [resolvable:$true] %s678_s30 }
  0xf8   : > { %s8904_s19 = scalar_lea.hbm %s10147_s4, %s8790_s12  ;;  %s8169_s14 = scalar_lea.hbm %s10147_s4, 128 }
  0xf9   : > { %s8164_s18 = scalar_lea.hbm %s8904_s19, 64  ;;  %p8170_p5 = scmp.lt.u32.totalorder %s8904_s19, %s10147_s4 }
  0xfa   : > { %p8165_p11 = scmp.ne.s32.totalorder %s8904_s19, %s8164_s18  ;;  %p8171_p10 = scmp.lt.u32.totalorder %s8169_s14, %s8164_s18 }
  0xfb   : > { %p8173_p9 = scmp.lt.u32.totalorder %s8164_s18, %s8904_s19 }
  0xfc   : > { %p8167_p12 = pnand %p8165_p11, %p8741_p0  ;;  %p8172_p7 = por %p8171_p10, %p8170_p5 }
  0xfe   : > { %p8168_p3 = pneg %p8167_p12  ;;  %p8174_p8 = por %p8173_p9, %p8172_p7 }
 0x100   : > { %p8175_p4 = pnand %p8174_p8, %p8168_p3 }
 0x102   : > { %8178 = shalt.err (!%p8175_p4)
}
 0x103   : > { %s8179_s25 = scalar_lea.vmem %s8907_s30, 64  ;;  %s8509_s6 = smov [#allocation13]  }
 0x104   : > { %p8180_p2 = scmp.ne.s32.totalorder %s8907_s30, %s8179_s25  ;;  %s8184_s15 = sshll.u32 %s8509_s6, 4  ;;  %s8185_s15 = int_to_ptr.vmem [resolvable:$false] %s8184_s15 }
 0x105   : > { %s8186_s1 = scalar_lea.vmem %s8185_s15, 128  ;;  %p8187_p12 = scmp.lt.s32.totalorder %s8907_s30, %s8185_s15 }
 0x106   : > { %p8182_p6 = pnand %p8180_p2, %p8741_p0  ;;  %p8188_p13 = scmp.lt.s32.totalorder %s8186_s1, %s8179_s25 }
 0x108   : > { %p8183_p11 = pneg %p8182_p6  ;;  %p8189_p5 = por %p8188_p13, %p8187_p12 }
 0x10a   : > { %p8190_p10 = pnand %p8189_p5, %p8183_p11 }
 0x10c   : > { %8193 = shalt.err (!%p8190_p10)
}
 0x10d   : > { %s8510_s18 = smov 2   ;;  %p10148_p3 = scmp.ne.s32.totalorder %s10133_s21, 0 }
 0x10e   : > { %s10097_s26 = sshll.u32 %s8714_s24, 11  ;;  %s7242_s14 = sshll.u32 %s8490_s0, 8 }
 0x10f   : > { %7329 = dma.hbm_to_vmem [thread:$0]  (!%p10148_p3), %s8904_s19, 64, %s8907_s30, %s8855_s5, %s10095_s2, %s10095_s2, %s8510_s18  }
 0x110   : > { %s10149_s9 = sld [smem:[#allocation55_spill]]  ;;  %s692_s6 = scalar_lea.vmem [#allocation19], %s10097_s26 }
 0x111   : > { %s699_s15 = sshll.u32 %s692_s6, 4  ;;  %s8948_s19 = scalar_lea.hbm %s10055_s10, %s8790_s12  ;;  %s8942_s15 = int_to_ptr.vmem [resolvable:$true] %s699_s15 }
 0x116   : > { %s8938_s25 = scalar_lea.hbm %s10149_s9, %s7242_s14  ;;  %s8199_s3 = scalar_lea.hbm %s10149_s9, 65536 }
 0x117   : > { %s8194_s30 = scalar_lea.hbm %s8938_s25, 32768  ;;  %p8200_p8 = scmp.lt.u32.totalorder %s8938_s25, %s10149_s9 }
 0x118   : > { %p8195_p13 = scmp.ne.s32.totalorder %s8938_s25, %s8194_s30  ;;  %p8201_p4 = scmp.lt.u32.totalorder %s8199_s3, %s8194_s30 }
 0x119   : > { %p8203_p6 = scmp.lt.u32.totalorder %s8194_s30, %s8938_s25 }
 0x11a   : > { %p8197_p7 = pnand %p8195_p13, %p8741_p0  ;;  %p8202_p2 = por %p8201_p4, %p8200_p8 }
 0x11c   : > { %p8198_p9 = pneg %p8197_p7  ;;  %p8204_p11 = por %p8203_p6, %p8202_p2 }
 0x11e   : > { %p8205_p12 = pnand %p8204_p11, %p8198_p9 }
 0x120   : > { %8208 = shalt.err (!%p8205_p12)
}
 0x121   : > { %s8209_s13 = scalar_lea.vmem %s8942_s15, 32768  ;;  %s8511_s6 = smov [#allocation19]  }
 0x122   : > { %p8210_p5 = scmp.ne.s32.totalorder %s8942_s15, %s8209_s13  ;;  %s8214_s1 = sshll.u32 %s8511_s6, 4  ;;  %s8215_s1 = int_to_ptr.vmem [resolvable:$false] %s8214_s1 }
 0x123   : > { %s8216_s2 = scalar_lea.vmem %s8215_s1, 65536  ;;  %p8217_p7 = scmp.lt.s32.totalorder %s8942_s15, %s8215_s1 }
 0x124   : > { %p8212_p10 = pnand %p8210_p5, %p8741_p0  ;;  %p8218_p1 = scmp.lt.s32.totalorder %s8216_s2, %s8209_s13 }
 0x126   : > { %p8213_p13 = pneg %p8212_p10  ;;  %p8219_p8 = por %p8218_p1, %p8217_p7 }
 0x128   : > { %p8220_p4 = pnand %p8219_p8, %p8213_p13 }
 0x12a   : > { %8223 = shalt.err (!%p8220_p4)
}
 0x12b   : > { %s10150_s30 = smov 16   ;;  %s10151_s18 = smov 256  }
 0x12c   : > { %s10152_s14 = smov 512   ;;  %s713_s3 = scalar_lea.vmem [#allocation20], %s8769_s16 }
 0x12d   : > { %7332 = dma.hbm_to_vmem [thread:$0]  (!%p10148_p3), %s8938_s25, 32768, %s8942_s15, %s8800_s27, %s10152_s14, %s10151_s18, %s10150_s30  }
 0x12e   : > { %s721_s23 = sshll.u32 %s713_s3, 4  ;;  %s8512_s13 = smov [#allocation17]   ;;  %s8976_s23 = int_to_ptr.vmem [resolvable:$true] %s721_s23 }
 0x12f   : > { %s548_s6 = sshll.u32 %s8512_s13, 4  ;;  %s8224_s1 = scalar_lea.hbm %s8948_s19, 64  ;;  %s549_s6 = int_to_ptr.vmem [resolvable:$true] %s548_s6 }
 0x130   : > { %p8225_p1 = scmp.ne.s32.totalorder %s8948_s19, %s8224_s1  ;;  %s8229_s4 = scalar_lea.hbm %s10055_s10, 128 }
 0x131   : > { %p8230_p6 = scmp.lt.u32.totalorder %s8948_s19, %s10055_s10  ;;  %p8231_p11 = scmp.lt.u32.totalorder %s8229_s4, %s8224_s1 }
 0x132   : > { %p8227_p9 = pnand %p8225_p1, %p8741_p0  ;;  %p8233_p5 = scmp.lt.u32.totalorder %s8224_s1, %s8948_s19 }
 0x133   : > { %p8232_p12 = por %p8231_p11, %p8230_p6 }
 0x134   : > { %p8228_p2 = pneg %p8227_p9 }
 0x135   : > { %p8234_p10 = por %p8233_p5, %p8232_p12 }
 0x137   : > { %p8235_p13 = pnand %p8234_p10, %p8228_p2 }
 0x139   : > { %8238 = shalt.err (!%p8235_p13)
}
 0x13a   : > { %s8239_s25 = scalar_lea.vmem %s8976_s23, 64  ;;  %s8513_s26 = smov [#allocation20]  }
 0x13b   : > { %p8240_p7 = scmp.ne.s32.totalorder %s8976_s23, %s8239_s25  ;;  %s8244_s15 = sshll.u32 %s8513_s26, 4  ;;  %s8245_s15 = int_to_ptr.vmem [resolvable:$false] %s8244_s15 }
 0x13c   : > { %s8246_s7 = scalar_lea.vmem %s8245_s15, 128  ;;  %p8247_p1 = scmp.lt.s32.totalorder %s8976_s23, %s8245_s15 }
 0x13d   : > { %p8242_p8 = pnand %p8240_p7, %p8741_p0  ;;  %p8248_p9 = scmp.lt.s32.totalorder %s8246_s7, %s8239_s25 }
 0x13f   : > { %p8243_p4 = pneg %p8242_p8  ;;  %p8249_p6 = por %p8248_p9, %p8247_p1 }
 0x141   : > { %p8250_p11 = pnand %p8249_p6, %p8243_p4 }
 0x143   : > { %8253 = shalt.err (!%p8250_p11)
}
 0x144   : > { %7335 = dma.hbm_to_vmem [thread:$0]  (!%p10148_p3), %s8948_s19, 64, %s8976_s23, %s8735_s20  }
 0x145   : > { %s8254_s30 = scalar_lea.hbm %s10053_s8, 128  ;;  %p10153_p12 = scmp.ne.s32.totalorder %s10128_s29, 0 }
 0x146   : > { %p8255_p2 = scmp.ne.s32.totalorder %s10053_s8, %s8254_s30  ;;  %p8261_p13 = scmp.lt.u32.totalorder %s8254_s30, %s10053_s8 }
 0x148   : > { %p8257_p5 = pnand %p8255_p2, %p10153_p12 }
 0x14a   : > { %p8258_p10 = pneg %p8257_p5 }
 0x14c   : > { %p8263_p7 = pnand %p8261_p13, %p8258_p10 }
 0x14e   : > { %8266 = shalt.err (!%p8263_p7)
}
 0x14f   : > { %s8267_s2 = scalar_lea.vmem %s549_s6, 128  ;;  %p8275_p9 = scmp.lt.s32.totalorder %s549_s6, %s549_s6 }
 0x150   : > { %p8268_p8 = scmp.ne.s32.totalorder %s549_s6, %s8267_s2  ;;  %p8276_p6 = scmp.lt.s32.totalorder %s8267_s2, %s8267_s2 }
 0x152   : > { %p8270_p4 = pnand %p8268_p8, %p10153_p12  ;;  %p8277_p11 = por %p8276_p6, %p8275_p9 }
 0x154   : > { %p8271_p1 = pneg %p8270_p4 }
 0x156   : > { %p8278_p3 = pnand %p8277_p11, %p8271_p1 }
 0x158   : > { %8281 = shalt.err (!%p8278_p3)
}
 0x159   : > { %p10154_p2 = scmp.ne.s32.totalorder %s10125_s22, 0  ;;  %s8514_s25 = smov [#allocation25]  }
 0x15a   : > { %s570_s26 = sshll.u32 %s8514_s25, 4  ;;  %s9022_s4 = scalar_lea.hbm %s10056_s11, %s8790_s12  ;;  %s571_s26 = int_to_ptr.vmem [resolvable:$true] %s570_s26 }
 0x15b   : > { %7307 = dma.hbm_to_vmem [thread:$0]  (!%p10154_p2), %s10053_s8, 128, %s549_s6, [#allocation18]  }
 0x15c   : > { %s10155_s18 = sld [smem:[#allocation59_spill]] }
 0x162   : > { %s8282_s3 = scalar_lea.hbm %s10155_s18, 128 }
 0x163   : > { %p8283_p3 = scmp.ne.s32.totalorder %s10155_s18, %s8282_s3  ;;  %p8289_p13 = scmp.lt.u32.totalorder %s8282_s3, %s10155_s18 }
 0x165   : > { %p8285_p5 = pnand %p8283_p3, %p10153_p12 }
 0x167   : > { %p8286_p10 = pneg %p8285_p5 }
 0x169   : > { %p8291_p7 = pnand %p8289_p13, %p8286_p10 }
 0x16b   : > { %8294 = shalt.err (!%p8291_p7)
}
 0x16c   : > { %s8295_s19 = scalar_lea.vmem %s571_s26, 128  ;;  %p8303_p9 = scmp.lt.s32.totalorder %s571_s26, %s571_s26 }
 0x16d   : > { %p8296_p8 = scmp.ne.s32.totalorder %s571_s26, %s8295_s19  ;;  %p8304_p6 = scmp.lt.s32.totalorder %s8295_s19, %s8295_s19 }
 0x16f   : > { %p8298_p4 = pnand %p8296_p8, %p10153_p12  ;;  %p8305_p11 = por %p8304_p6, %p8303_p9 }
 0x171   : > { %p8299_p1 = pneg %p8298_p4 }
 0x173   : > { %p8306_p0 = pnand %p8305_p11, %p8299_p1 }
 0x175   : > { %8309 = shalt.err (!%p8306_p0)
}
 0x176   : > { %7313 = dma.hbm_to_vmem [thread:$0]  (!%p10154_p2), %s10155_s18, 128, %s571_s26, [#allocation15]  }
 0x177   : > { %s732_s29 = scalar_lea.vmem [#allocation21], %s8769_s16  ;;  %s10156_s30 = sld [smem:[#allocation56_spill]] }
 0x178   : > { %s740_s15 = sshll.u32 %s732_s29, 4  ;;  %s8310_s22 = scalar_lea.hbm %s9022_s4, 64  ;;  %s741_s15 = int_to_ptr.vmem [resolvable:$true] %s740_s15 }
 0x179   : > { %p8311_p0 = scmp.ne.s32.totalorder %s9022_s4, %s8310_s22  ;;  %p10157_p12 = scmp.ne.s32.totalorder %s10135_s28, 0 }
 0x17a   : > { %s8315_s6 = scalar_lea.hbm %s10056_s11, 128  ;;  %p8316_p2 = scmp.lt.u32.totalorder %s9022_s4, %s10056_s11 }
 0x17b   : > { %p8313_p3 = pnand %p8311_p0, %p10157_p12  ;;  %p8317_p10 = scmp.lt.u32.totalorder %s8315_s6, %s8310_s22 }
 0x17c   : > { %p8319_p7 = scmp.lt.u32.totalorder %s8310_s22, %s9022_s4 }
 0x17d   : > { %s9047_s3 = scalar_lea.hbm %s10156_s30, %s8790_s12  ;;  %p8314_p5 = pneg %p8313_p3 }
 0x17e   : > { %p8318_p13 = por %p8317_p10, %p8316_p2 }
 0x180   : > { %p8320_p8 = por %p8319_p7, %p8318_p13 }
 0x182   : > { %p8321_p4 = pnand %p8320_p8, %p8314_p5 }
 0x184   : > { %8324 = shalt.err (!%p8321_p4)
}
 0x185   : > { %s8325_s12 = scalar_lea.vmem %s741_s15, 64  ;;  %s8515_s26 = smov [#allocation21]  }
 0x186   : > { %p8326_p1 = scmp.ne.s32.totalorder %s741_s15, %s8325_s12  ;;  %s8330_s23 = sshll.u32 %s8515_s26, 4  ;;  %s8331_s23 = int_to_ptr.vmem [resolvable:$false] %s8330_s23 }
 0x187   : > { %s8332_s25 = scalar_lea.vmem %s8331_s23, 128  ;;  %p8333_p11 = scmp.lt.s32.totalorder %s741_s15, %s8331_s23 }
 0x188   : > { %p8328_p9 = pnand %p8326_p1, %p10157_p12  ;;  %p8334_p0 = scmp.lt.s32.totalorder %s8332_s25, %s8325_s12 }
 0x18a   : > { %p8329_p6 = pneg %p8328_p9  ;;  %p8335_p3 = por %p8334_p0, %p8333_p11 }
 0x18c   : > { %p8336_p2 = pnand %p8335_p3, %p8329_p6 }
 0x18e   : > { %8339 = shalt.err (!%p8336_p2)
}
 0x18f   : > { %p10158_p10 = scmp.ne.s32.totalorder %s10133_s21, 0  ;;  %s751_s29 = scalar_lea.vmem [#allocation22], %s8769_s16 }
 0x190   : > { %s759_s7 = sshll.u32 %s751_s29, 4  ;;  %s7247_s9 = sshll.u32 %s8490_s0, 15  ;;  %s760_s7 = int_to_ptr.vmem [resolvable:$true] %s759_s7 }
 0x191   : > { %7338 = dma.hbm_to_vmem [thread:$0]  (!%p10158_p10), %s9022_s4, 64, %s741_s15, %s8855_s5  }
 0x192   : > { %s8340_s22 = scalar_lea.hbm %s9047_s3, 64  ;;  %s8345_s6 = scalar_lea.hbm %s10156_s30, 128 }
 0x193   : > { %p8341_p5 = scmp.ne.s32.totalorder %s9047_s3, %s8340_s22  ;;  %p8346_p8 = scmp.lt.u32.totalorder %s9047_s3, %s10156_s30 }
 0x194   : > { %p8347_p4 = scmp.lt.u32.totalorder %s8345_s6, %s8340_s22  ;;  %p8349_p9 = scmp.lt.u32.totalorder %s8340_s22, %s9047_s3 }
 0x195   : > { %p8343_p13 = pnand %p8341_p5, %p10157_p12 }
 0x196   : > { %p8348_p1 = por %p8347_p4, %p8346_p8 }
 0x197   : > { %p8344_p7 = pneg %p8343_p13 }
 0x198   : > { %p8350_p6 = por %p8349_p9, %p8348_p1 }
 0x19a   : > { %p8351_p11 = pnand %p8350_p6, %p8344_p7 }
 0x19c   : > { %8354 = shalt.err (!%p8351_p11)
}
 0x19d   : > { %s8355_s16 = scalar_lea.vmem %s760_s7, 64  ;;  %s8516_s5 = smov [#allocation22]  }
 0x19e   : > { %p8356_p0 = scmp.ne.s32.totalorder %s760_s7, %s8355_s16  ;;  %s8360_s4 = sshll.u32 %s8516_s5, 4  ;;  %s8361_s4 = int_to_ptr.vmem [resolvable:$false] %s8360_s4 }
 0x19f   : > { %s8362_s15 = scalar_lea.vmem %s8361_s4, 128  ;;  %p8363_p5 = scmp.lt.s32.totalorder %s760_s7, %s8361_s4 }
 0x1a0   : > { %p8358_p3 = pnand %p8356_p0, %p10157_p12  ;;  %p8364_p13 = scmp.lt.s32.totalorder %s8362_s15, %s8355_s16 }
 0x1a2   : > { %p8359_p2 = pneg %p8358_p3  ;;  %p8365_p10 = por %p8364_p13, %p8363_p5 }
 0x1a4   : > { %p8366_p4 = pnand %p8365_p10, %p8359_p2 }
 0x1a6   : > { %8369 = shalt.err (!%p8366_p4)
}
 0x1a7   : > { %p10159_p8 = scmp.ne.s32.totalorder %s10133_s21, 0  ;;  %s10160_s23 = sld [smem:[#allocation57_spill]] }
 0x1a8   : > { %s10161_s29 = sshll.u32 %s8714_s24, 11 }
 0x1a9   : > { %7341 = dma.hbm_to_vmem [thread:$0]  (!%p10159_p8), %s9047_s3, 64, %s760_s7, %s8800_s27  }
 0x1aa   : > { %s770_s22 = scalar_lea.vmem [#allocation23], %s10161_s29 }
 0x1ab   : > { %s778_s13 = sshll.u32 %s770_s22, 4  ;;  %s9094_s13 = int_to_ptr.vmem [resolvable:$true] %s778_s13 }
 0x1ad   : > { %s9090_s25 = scalar_lea.hbm %s10160_s23, %s7247_s9  ;;  %s8375_s7 = scalar_lea.hbm %s10160_s23, 65536 }
 0x1ae   : > { %s8370_s1 = scalar_lea.hbm %s9090_s25, 32768  ;;  %p8376_p9 = scmp.lt.u32.totalorder %s9090_s25, %s10160_s23 }
 0x1af   : > { %p8371_p10 = scmp.ne.s32.totalorder %s9090_s25, %s8370_s1  ;;  %p8377_p6 = scmp.lt.u32.totalorder %s8375_s7, %s8370_s1 }
 0x1b0   : > { %p8379_p0 = scmp.lt.u32.totalorder %s8370_s1, %s9090_s25 }
 0x1b1   : > { %p8373_p7 = pnand %p8371_p10, %p10157_p12  ;;  %p8378_p11 = por %p8377_p6, %p8376_p9 }
 0x1b3   : > { %p8374_p1 = pneg %p8373_p7  ;;  %p8380_p3 = por %p8379_p0, %p8378_p11 }
 0x1b5   : > { %p8381_p2 = pnand %p8380_p3, %p8374_p1 }
 0x1b7   : > { %8384 = shalt.err (!%p8381_p2)
}
 0x1b8   : > { %s8385_s24 = scalar_lea.vmem %s9094_s13, 32768  ;;  %s8517_s2 = smov [#allocation23]  }
 0x1b9   : > { %p8386_p5 = scmp.ne.s32.totalorder %s9094_s13, %s8385_s24  ;;  %s8390_s19 = sshll.u32 %s8517_s2, 4  ;;  %s8391_s19 = int_to_ptr.vmem [resolvable:$false] %s8390_s19 }
 0x1ba   : > { %s8392_s16 = scalar_lea.vmem %s8391_s19, 65536  ;;  %p8393_p10 = scmp.lt.s32.totalorder %s9094_s13, %s8391_s19 }
 0x1bb   : > { %p8388_p13 = pnand %p8386_p5, %p10157_p12  ;;  %p8394_p7 = scmp.lt.s32.totalorder %s8392_s16, %s8385_s24 }
 0x1bd   : > { %p8389_p4 = pneg %p8388_p13  ;;  %p8395_p9 = por %p8394_p7, %p8393_p10 }
 0x1bf   : > { %p8396_p6 = pnand %p8395_p9, %p8389_p4 }
 0x1c1   : > { %8399 = shalt.err (!%p8396_p6)
}
 0x1c2   : > { %s10162_s5 = smov 32   ;;  %s10163_s28 = sld [smem:[#allocation44_spill]] }
 0x1c3   : > { %7344 = dma.hbm_to_vmem [thread:$0]  (!%p10159_p8), %s9090_s25, 32768, %s9094_s13, %s8735_s20, %s10152_s14, %s10152_s14, %s10162_s5  }
 0x1c8   : > { %p10164_p12 = scmp.ne.s32.totalorder %s10163_s28, 0 }
 0x1c9   : > { %s10165_s4 = sld [smem:[#allocation41_spill]] (!%p10164_p12)  ;;  %s10167_s12 = sld [smem:[#allocation38_spill]] (!%p10164_p12) }
 0x1ca   : > { %790 = sbr.rel (%p10164_p12) target bundleno = 2071 (0x817), region = 88  ;;  %s10168_s26 = sld [smem:[#allocation43_spill]] (!%p10164_p12) }
 0x1cf   : > { %s10166_s15 = sadd.s32 (!%p10164_p12), 4294967295, %s10165_s4   ;;  %s9126_s22 = sand.u32 (!%p10164_p12), 1, %s10167_s12  }
 0x1d0   : > { %s792_s29 = sand.u32 (!%p10164_p12), 1, %s10166_s15   ;;  %s9129_s1 = sshll.u32 (!%p10164_p12), %s9126_s22, 2 }
 0x1d1   : > { %s9131_s21 = scalar_lea.sflag [#allocation7], %s792_s29  ;;  %s796_s27 = scalar_lea.vmem [#allocation6], %s9129_s1 }
 0x1d2   : > { %p10169_p1 = scmp.ne.s32.totalorder %s10168_s26, 0 }
 0x1d4   : > { %8425 = dma.done.wait (%p10169_p1), %s9131_s21, 64  }
 0x1d5   : > { %8427 = vsyncadd (%p10169_p1), %s9131_s21, 4294967232  ;;  %s6544_s20 = sshll.u32 %s9126_s22, 8  ;;  %s9141_s14 = scalar_lea.sflag [#allocation9], %s792_s29 }
 0x1d6   : > { %s9143_s25 = scalar_lea.vmem [#allocation8], %s6544_s20 }
 0x1d7   : > { %8429 = dma.done.wait (%p10169_p1), %s9141_s14, 4160  }
 0x1d8   : > { %8431 = vsyncadd (%p10169_p1), %s9141_s14, 4294963136  ;;  %s6546_s13 = sshll.u32 %s9126_s22, 9  ;;  %s814_s3 = scalar_lea.vmem [#allocation10], %s9129_s1 }
 0x1d9   : > { %s820_s7 = scalar_lea.sflag [#allocation12], %s792_s29  ;;  %s9153_s9 = scalar_lea.vmem [#allocation11], %s6546_s13 }
 0x1da   : > { %8433 = dma.done.wait (%p10169_p1), %s820_s7, 8256  }
 0x1db   : > { %8435 = vsyncadd (%p10169_p1), %s820_s7, 4294959040  ;;  %s10170_s6 = sld [smem:[#allocation42_spill]]  ;;  %s832_s24 = scalar_lea.vmem [#allocation13], %s9129_s1 }
 0x1e1   : > { %p10171_p8 = scmp.ne.s32.totalorder %s10170_s6, 0 }
 0x1e3   : > { %8437 = dma.done.wait (%p10171_p8), [#allocation15], 1088  }
 0x1e4   : > { %8439 = vsyncadd (%p10171_p8), [#allocation15], 4294966208 }
 0x1e5   : > { %8441 = dma.done.wait (%p10171_p8), [#allocation18], 128  }
 0x1e6   : > { %8443 = vsyncadd (%p10171_p8), [#allocation18], 4294967168  ;;  %s6551_s2 = sshll.u32 %s9126_s22, 11 }
 0x1e7   : > { %s9169_s19 = scalar_lea.vmem [#allocation19], %s6551_s2 }
 0x1e8   : > { %8445 = dma.done.wait (%p10169_p1), %s9131_s21, 32768  }
 0x1e9   : > { %8447 = vsyncadd (%p10169_p1), %s9131_s21, 4294934528  ;;  %s862_s16 = scalar_lea.vmem [#allocation20], %s9129_s1 }
 0x1ea   : > { %8449 = dma.done.wait (%p10169_p1), %s9141_s14, 64  }
 0x1eb   : > { %8451 = vsyncadd (%p10169_p1), %s9141_s14, 4294967232  ;;  %s871_s5 = scalar_lea.vmem [#allocation21], %s9129_s1 }
 0x1ec   : > { %8453 = dma.done.wait (%p10169_p1), %s820_s7, 64  }
 0x1ed   : > { %8455 = vsyncadd (%p10169_p1), %s820_s7, 4294967232  ;;  %s880_s28 = scalar_lea.vmem [#allocation22], %s9129_s1 }
 0x1ee   : > { %8457 = dma.done.wait (%p10169_p1), %s9131_s21, 64  }
 0x1ef   : > { %8459 = vsyncadd (%p10169_p1), %s9131_s21, 4294967232  ;;  %s9196_s4 = scalar_lea.vmem [#allocation23], %s6551_s2 }
 0x1f0   : > { %8461 = dma.done.wait (%p10169_p1), %s9141_s14, 32768  }
 0x1f1   : > { %8463 = vsyncadd (%p10169_p1), %s9141_s14, 4294934528 }
 0x1f2   : > { %8465 = dma.done.wait (%p10171_p8), [#allocation12], 128  }
 0x1f3   : > { %8467 = vsyncadd (%p10171_p8), [#allocation12], 4294967168 }
 0x1f4   : > { %8469 = dma.done.wait (%p10171_p8), [#allocation15], 128  }
 0x1f5   : > { %8471 = vsyncadd (%p10171_p8), [#allocation15], 4294967168  ;;  %s10172_s15 = sld [smem:[#allocation40_spill]] }
 0x1fb   : > { %p6558_p11 = scmp.ne.s32.totalorder %s10172_s15, 0 }
 0x1fc   : > { %v1017_v1 = vld [vmem:[#allocation16] sm:$0xff] (!%p6558_p11)  ;;  %v1018_v3 = vld [vmem:[#allocation16 + $0x8] sm:$0xff] (!%p6558_p11)  ;;  %v8518_v7 = vmov (!%p6558_p11), 0   ;;  %v1019_v8 = vld [vmem:[#allocation16 + $0x10] sm:$0xff] (!%p6558_p11)  ;;  %vm1107_vm0 = vcmask (!%p6558_p11), 130048   ;;  %v8519_v19 = vmov (!%p6558_p11), 0.0   ;;  %v1027_v20 = vlaneseq (!%p6558_p11) }
 0x1fd   : > { %1015 = sbr.rel (%p6558_p11) target bundleno = 744 (0x2e8), region = 152  ;;  %v1021_v2 = vld [vmem:[#allocation16 + $0x20] sm:$0xff] (!%p6558_p11)  ;;  %v1022_v5 = vld [vmem:[#allocation16 + $0x28] sm:$0xff] (!%p6558_p11)  ;;  %1143 = vmatprep.mubr.bf16.mxu0 (!%p6558_p11), %v8518_v7  ;;  %1184 = vmatprep.mubr.bf16.mxu1 (!%p6558_p11), %v8518_v7  ;;  %v1023_v11 = vld [vmem:[#allocation16 + $0x30] sm:$0xff] (!%p6558_p11)  ;;  %1319 = vst [vmem:[#allocation3] sm:$0xff] (!%p6558_p11), %v8519_v19 }
 0x1fe   : > { %v6560_v4 = vcombine.high (!%p6558_p11), %v1017_v1, %v1021_v2  ;;  %v6559_v6 = vcombine.low (!%p6558_p11), %v1017_v1, %v1021_v2  ;;  %v6562_v9 = vcombine.high (!%p6558_p11), %v1018_v3, %v1022_v5  ;;  %v6561_v10 = vcombine.low (!%p6558_p11), %v1018_v3, %v1022_v5  ;;  %v1020_v12 = vld [vmem:[#allocation16 + $0x18] sm:$0xff] (!%p6558_p11)  ;;  %1320 = vst [vmem:[#allocation3 + $0x8] sm:$0xff] (!%p6558_p11), %v8519_v19  ;;  %v1025_v23 = vld [vmem:[#allocation17] sm:$0xff] (!%p6558_p11) }
 0x1ff   : > { %v1024_v13 = vld [vmem:[#allocation16 + $0x38] sm:$0xff] (!%p6558_p11)  ;;  %v6564_v14 = vcombine.high (!%p6558_p11), %v1019_v8, %v1023_v11  ;;  %v6563_v17 = vcombine.low (!%p6558_p11), %v1019_v8, %v1023_v11  ;;  %1321 = vst [vmem:[#allocation3 + $0x10] sm:$0xff] (!%p6558_p11), %v8519_v19  ;;  %1322 = vst [vmem:[#allocation3 + $0x18] sm:$0xff] (!%p6558_p11), %v8519_v19  ;;  %v1028_v21 = vshrl.u32 (!%p6558_p11), %v1027_v20, 7 }
 0x200   : > { %1111 = vmatprep.subr.bf16.mxu0 (!%p6558_p11), %v6560_v4  ;;  %v6566_v15 = vcombine.high (!%p6558_p11), %v1020_v12, %v1024_v13  ;;  %1152 = vmatprep.subr.bf16.mxu1 (!%p6558_p11), %v6562_v9  ;;  %v1016_v16 = vld [vmem:[#allocation14] sm:$0xf] (!%p6558_p11)  ;;  %v6565_v18 = vcombine.low (!%p6558_p11), %v1020_v12, %v1024_v13  ;;  %1323 = vst [vmem:[#allocation3 + $0x20] sm:$0xff] (!%p6558_p11), %v8519_v19  ;;  %1324 = vst [vmem:[#allocation3 + $0x28] sm:$0xff] (!%p6558_p11), %v8519_v19 }
 0x201   : > { %1112 = vmatpush1.bf16.msra.mxu0 (!%p6558_p11), %v6559_v6  ;;  %1153 = vmatpush1.bf16.msra.mxu1 (!%p6558_p11), %v6561_v10  ;;  %1325 = vst [vmem:[#allocation3 + $0x30] sm:$0xff] (!%p6558_p11), %v8519_v19  ;;  %1326 = vst [vmem:[#allocation3 + $0x38] sm:$0xff] (!%p6558_p11), %v8519_v19  ;;  %v1029_v22 = vsub.s32 (!%p6558_p11), 0, %v1028_v21  ;;  %v1037_v24 = vsub.s32 (!%p6558_p11), 2, %v1028_v21  ;;  %v1033_v25 = vsub.s32 (!%p6558_p11), 1, %v1028_v21  ;;  %v1041_v26 = vsub.s32 (!%p6558_p11), 3, %v1028_v21 }
 0x202   : > { %1193 = vmatprep.subr.bf16.mxu0 (!%p6558_p11), %v6564_v14  ;;  %1234 = vmatprep.subr.bf16.mxu1 (!%p6558_p11), %v6566_v15  ;;  %v1045_v35 = vsub.s32 (!%p6558_p11), 4, %v1028_v21  ;;  %v1053_v40 = vsub.s32 (!%p6558_p11), 6, %v1028_v21  ;;  %v1049_v41 = vsub.s32 (!%p6558_p11), 5, %v1028_v21  ;;  %v1057_v46 = vsub.s32 (!%p6558_p11), 7, %v1028_v21 }
 0x203   : > { %v1030_v27 = vrot.slane (!%p6558_p11), %v1025_v23, %v1029_v22  ;;  %v1038_v28 = vrot.slane (!%p6558_p11), %v1025_v23, %v1037_v24  ;;  %v1034_v29 = vrot.slane (!%p6558_p11), %v1025_v23, %v1033_v25  ;;  %v1042_v30 = vrot.slane (!%p6558_p11), %v1025_v23, %v1041_v26 }
 0x204   : > { %6567 = vmatmul.mubr.msk.bf16.vlgmr.msra.gmra.mrb[0].mxu0 %vm1107_vm0, %v1016_v16  ;;  %6568 = vmatmul.mubr.msk.bf16.vlgmr.msra.gmra.mrb[0].mxu1 %vm1107_vm0, %v1016_v16  ;;  %v1046_v51 = vrot.slane %v1025_v23, %v1045_v35  ;;  %v1054_v53 = vrot.slane %v1025_v23, %v1053_v40  ;;  %v1050_v54 = vrot.slane %v1025_v23, %v1049_v41 }
 0x205   : > { %1194 = vmatpush1.bf16.msra.mxu0 %v6563_v17  ;;  %1235 = vmatpush1.bf16.msra.mxu1 %v6565_v18  ;;  %v1058_v56 = vrot.slane %v1025_v23, %v1057_v46 }
 0x206   : > { %1225 = vmatprep.mubr.bf16.mxu0 %v8518_v7  ;;  %1266 = vmatprep.mubr.bf16.mxu1 %v8518_v7 }
 0x20c   : > { %6569 = vmatmul.mubr.msk.bf16.vlgmr.msra.gmra.mrb[4].mxu0 %vm1107_vm0, %v1016_v16  ;;  %6570 = vmatmul.mubr.msk.bf16.vlgmr.msra.gmra.mrb[4].mxu1 %vm1107_vm0, %v1016_v16 }
 0x2d7   : > { %v1145_v31 = vpop.f32.mrb[0].mxu0  ;;  %v1186_v33 = vpop.f32.mrb[0].mxu1 }
 0x2d8   : > { %v1146_v32 = vadd.f32 %v1145_v31, %v1030_v27  ;;  %v1147_v34 = vpop.f32.mrb[1].mxu0  ;;  %v1187_v36 = vadd.f32 %v1186_v33, %v1038_v28  ;;  %v1188_v38 = vpop.f32.mrb[1].mxu1 }
 0x2d9   : > { %v1148_v37 = vadd.f32 %v1147_v34, %v1034_v29  ;;  %v1149_v39 = vpop.f32.mrb[2].mxu0  ;;  %v1189_v43 = vadd.f32 %v1188_v38, %v1042_v30  ;;  %v1190_v44 = vpop.f32.mrb[2].mxu1 }
 0x2da   : > { %v1275_v42 = vmax.f32 %v1146_v32, 0.0  ;;  %v1150_v45 = vpop.f32.mrb[3].mxu0  ;;  %v1277_v47 = vmax.f32 %v1187_v36, 0.0  ;;  %v1191_v49 = vpop.f32.mrb[3].mxu1 }
 0x2db   : > { %v1276_v48 = vmax.f32 %v1148_v37, 0.0  ;;  %v1278_v50 = vmax.f32 %v1189_v43, 0.0 }
 0x2dd   : > { %v7248_v52 = vpack.c.bf16 %v1276_v48, %v1275_v42  ;;  %v7249_v55 = vpack.c.bf16 %v1278_v50, %v1277_v47 }
 0x2df   : > { %1315 = vst [vmem:[#allocation2] sm:$0xff] %v7248_v52  ;;  %v1227_v57 = vpop.f32.mrb[4].mxu0  ;;  %1316 = vst [vmem:[#allocation2 + $0x8] sm:$0xff] %v7249_v55  ;;  %v1268_v59 = vpop.f32.mrb[4].mxu1 }
 0x2e0   : > { %v1228_v58 = vadd.f32 %v1227_v57, %v1046_v51  ;;  %v1229_v60 = vpop.f32.mrb[5].mxu0  ;;  %v1269_v61 = vadd.f32 %v1268_v59, %v1054_v53  ;;  %v1270_v63 = vpop.f32.mrb[5].mxu1 }
 0x2e1   : > { %v1230_v62 = vadd.f32 %v1229_v60, %v1050_v54  ;;  %v1231_v0 = vpop.f32.mrb[6].mxu0  ;;  %v1271_v2 = vadd.f32 %v1270_v63, %v1058_v56  ;;  %v1272_v3 = vpop.f32.mrb[6].mxu1 }
 0x2e2   : > { %v1279_v1 = vmax.f32 %v1228_v58, 0.0  ;;  %v1232_v4 = vpop.f32.mrb[7].mxu0  ;;  %v1281_v5 = vmax.f32 %v1269_v61, 0.0  ;;  %v1273_v7 = vpop.f32.mrb[7].mxu1 }
 0x2e3   : > { %v1280_v6 = vmax.f32 %v1230_v62, 0.0  ;;  %v1282_v8 = vmax.f32 %v1271_v2, 0.0 }
 0x2e5   : > { %v7250_v9 = vpack.c.bf16 %v1280_v6, %v1279_v1  ;;  %v7251_v10 = vpack.c.bf16 %v1282_v8, %v1281_v5 }
 0x2e7   : > { %1317 = vst [vmem:[#allocation2 + $0x10] sm:$0xff] %v7250_v9  ;;  %1318 = vst [vmem:[#allocation2 + $0x18] sm:$0xff] %v7251_v10 }
 0x2e8 PF: > { %v7420_v11 = vld [vmem:[%s9169_s19 + $0x4] ss:$16 sps:$4 sm:$0xff]   ;;  %v7424_v13 = vld [vmem:[%s9169_s19] ss:$16 sps:$4 sm:$0xff]   ;;  %s10173_s29 = sld [smem:[#allocation53_spill]]  ;;  %s10174_s22 = sld [smem:[#allocation40_spill]] }
 0x2e9   : > { %v7422_v12 = vld [vmem:[%s9169_s19 + $0x204] ss:$16 sps:$4 sm:$0xff]   ;;  %2917 = vmatprep.subr.bf16.mxu0 %v7420_v11  ;;  %v7425_v14 = vld [vmem:[%s9169_s19 + $0x200] ss:$16 sps:$4 sm:$0xff]  }
 0x2ea   : > { %2958 = vmatprep.subr.bf16.mxu1 %v7422_v12  ;;  %v7426_v15 = vld [vmem:[%s9169_s19 + $0x24] ss:$16 sps:$4 sm:$0xff]   ;;  %2918 = vmatpush1.bf16.msra.mxu0 %v7424_v13  ;;  %v7430_v17 = vld [vmem:[%s9169_s19 + $0x20] ss:$16 sps:$4 sm:$0xff]  }
 0x2eb   : > { %2959 = vmatpush1.bf16.msra.mxu1 %v7425_v14  ;;  %v7428_v16 = vld [vmem:[%s9169_s19 + $0x224] ss:$16 sps:$4 sm:$0xff]   ;;  %2919 = vmatprep.subr.bf16.mxu0 %v7426_v15  ;;  %v7431_v18 = vld [vmem:[%s9169_s19 + $0x220] ss:$16 sps:$4 sm:$0xff]  }
 0x2ec   : > { %2960 = vmatprep.subr.bf16.mxu1 %v7428_v16  ;;  %v7432_v19 = vld [vmem:[%s9169_s19 + $0x44] ss:$16 sps:$4 sm:$0xff]   ;;  %v7436_v21 = vld [vmem:[%s9169_s19 + $0x40] ss:$16 sps:$4 sm:$0xff]  }
 0x2ed   : > { %v7434_v20 = vld [vmem:[%s9169_s19 + $0x244] ss:$16 sps:$4 sm:$0xff]   ;;  %v7437_v22 = vld [vmem:[%s9169_s19 + $0x240] ss:$16 sps:$4 sm:$0xff]  }
 0x2ee   : > { %2920 = vmatpush1.bf16.msra.mxu0 %v7430_v17  ;;  %v7438_v23 = vld [vmem:[%s9169_s19 + $0x64] ss:$16 sps:$4 sm:$0xff]   ;;  %v7442_v25 = vld [vmem:[%s9169_s19 + $0x60] ss:$16 sps:$4 sm:$0xff]   ;;  %p7230_p0 = scmp.ne.s32.totalorder %s10174_s22, 1 }
 0x2ef   : > { %2961 = vmatpush1.bf16.msra.mxu1 %v7431_v18  ;;  %2921 = vmatprep.subr.bf16.mxu0 %v7432_v19  ;;  %v7440_v24 = vld [vmem:[%s9169_s19 + $0x264] ss:$16 sps:$4 sm:$0xff]   ;;  %v7443_v26 = vld [vmem:[%s9169_s19 + $0x260] ss:$16 sps:$4 sm:$0xff]   ;;  %vm6177_vm1 = vcmask (!%p7230_p0), 7168  }
 0x2f0   : > { %2962 = vmatprep.subr.bf16.mxu1 %v7434_v20  ;;  %v7444_v27 = vld [vmem:[%s9169_s19 + $0x84] ss:$16 sps:$4 sm:$0xff]   ;;  %v7448_v29 = vld [vmem:[%s9169_s19 + $0x80] ss:$16 sps:$4 sm:$0xff]  }
 0x2f1   : > { %v7446_v28 = vld [vmem:[%s9169_s19 + $0x284] ss:$16 sps:$4 sm:$0xff]   ;;  %v7449_v30 = vld [vmem:[%s9169_s19 + $0x280] ss:$16 sps:$4 sm:$0xff]  }
 0x2f2   : > { %2922 = vmatpush1.bf16.msra.mxu0 %v7436_v21  ;;  %v7450_v31 = vld [vmem:[%s9169_s19 + $0xa4] ss:$16 sps:$4 sm:$0xff]   ;;  %v7454_v33 = vld [vmem:[%s9169_s19 + $0xa0] ss:$16 sps:$4 sm:$0xff]  }
 0x2f3   : > { %2963 = vmatpush1.bf16.msra.mxu1 %v7437_v22  ;;  %2923 = vmatprep.subr.bf16.mxu0 %v7438_v23  ;;  %v7452_v32 = vld [vmem:[%s9169_s19 + $0x2a4] ss:$16 sps:$4 sm:$0xff]   ;;  %v7455_v34 = vld [vmem:[%s9169_s19 + $0x2a0] ss:$16 sps:$4 sm:$0xff]  }
 0x2f4   : > { %2964 = vmatprep.subr.bf16.mxu1 %v7440_v24  ;;  %v7456_v35 = vld [vmem:[%s9169_s19 + $0xc4] ss:$16 sps:$4 sm:$0xff]   ;;  %v7460_v37 = vld [vmem:[%s9169_s19 + $0xc0] ss:$16 sps:$4 sm:$0xff]  }
 0x2f5   : > { %v7458_v36 = vld [vmem:[%s9169_s19 + $0x2c4] ss:$16 sps:$4 sm:$0xff]   ;;  %v7461_v38 = vld [vmem:[%s9169_s19 + $0x2c0] ss:$16 sps:$4 sm:$0xff]  }
 0x2f6   : > { %2924 = vmatpush1.bf16.msra.mxu0 %v7442_v25  ;;  %v7462_v39 = vld [vmem:[%s9169_s19 + $0xe4] ss:$16 sps:$4 sm:$0xff]   ;;  %v7466_v41 = vld [vmem:[%s9169_s19 + $0xe0] ss:$16 sps:$4 sm:$0xff]  }
 0x2f7   : > { %2965 = vmatpush1.bf16.msra.mxu1 %v7443_v26  ;;  %2925 = vmatprep.subr.bf16.mxu0 %v7444_v27  ;;  %v7464_v40 = vld [vmem:[%s9169_s19 + $0x2e4] ss:$16 sps:$4 sm:$0xff]   ;;  %v7467_v42 = vld [vmem:[%s9169_s19 + $0x2e0] ss:$16 sps:$4 sm:$0xff]  }
 0x2f8   : > { %2966 = vmatprep.subr.bf16.mxu1 %v7446_v28  ;;  %v7468_v43 = vld [vmem:[%s9169_s19 + $0x104] ss:$16 sps:$4 sm:$0xff]   ;;  %v7472_v45 = vld [vmem:[%s9169_s19 + $0x100] ss:$16 sps:$4 sm:$0xff]  }
 0x2f9   : > { %v7470_v44 = vld [vmem:[%s9169_s19 + $0x304] ss:$16 sps:$4 sm:$0xff]   ;;  %v7473_v46 = vld [vmem:[%s9169_s19 + $0x300] ss:$16 sps:$4 sm:$0xff]  }
 0x2fa   : > { %2926 = vmatpush1.bf16.msra.mxu0 %v7448_v29  ;;  %v7474_v47 = vld [vmem:[%s9169_s19 + $0x124] ss:$16 sps:$4 sm:$0xff]   ;;  %v7478_v49 = vld [vmem:[%s9169_s19 + $0x120] ss:$16 sps:$4 sm:$0xff]  }
 0x2fb   : > { %2967 = vmatpush1.bf16.msra.mxu1 %v7449_v30  ;;  %2927 = vmatprep.subr.bf16.mxu0 %v7450_v31  ;;  %v7476_v48 = vld [vmem:[%s9169_s19 + $0x324] ss:$16 sps:$4 sm:$0xff]   ;;  %v7479_v50 = vld [vmem:[%s9169_s19 + $0x320] ss:$16 sps:$4 sm:$0xff]  }
 0x2fc   : > { %2968 = vmatprep.subr.bf16.mxu1 %v7452_v32  ;;  %v7480_v51 = vld [vmem:[%s9169_s19 + $0x144] ss:$16 sps:$4 sm:$0xff]   ;;  %v7484_v53 = vld [vmem:[%s9169_s19 + $0x140] ss:$16 sps:$4 sm:$0xff]  }
 0x2fd   : > { %v7482_v52 = vld [vmem:[%s9169_s19 + $0x344] ss:$16 sps:$4 sm:$0xff]   ;;  %v7485_v54 = vld [vmem:[%s9169_s19 + $0x340] ss:$16 sps:$4 sm:$0xff]  }
 0x2fe   : > { %2928 = vmatpush1.bf16.msra.mxu0 %v7454_v33  ;;  %v7486_v55 = vld [vmem:[%s9169_s19 + $0x164] ss:$16 sps:$4 sm:$0xff]   ;;  %v1327_v57 = vld [vmem:[#allocation2] sm:$0xff] }
 0x2ff   : > { %2969 = vmatpush1.bf16.msra.mxu1 %v7455_v34  ;;  %2929 = vmatprep.subr.bf16.mxu0 %v7456_v35  ;;  %v7488_v56 = vld [vmem:[%s9169_s19 + $0x364] ss:$16 sps:$4 sm:$0xff]   ;;  %v9259_v58 = vcombine.high %v1327_v57, %v1327_v57  ;;  %v7490_v60 = vld [vmem:[%s9169_s19 + $0x160] ss:$16 sps:$4 sm:$0xff]   ;;  %v9285_v17 = vcombine.low %v1327_v57, %v1327_v57 }
 0x300   : > { %2970 = vmatprep.subr.bf16.mxu1 %v7458_v36  ;;  %v1328_v59 = vld [vmem:[#allocation2 + $0x8] sm:$0xff] }
 0x301   : > { %v7491_v61 = vld [vmem:[%s9169_s19 + $0x360] ss:$16 sps:$4 sm:$0xff]   ;;  %v9263_v62 = vcombine.high %v1328_v59, %v1328_v59  ;;  %v7492_v63 = vld [vmem:[%s9169_s19 + $0x184] ss:$16 sps:$4 sm:$0xff]   ;;  %2949 = vmatprep.mubr.bf16.mxu0 %v9259_v58  ;;  %v9287_v18 = vcombine.low %v1328_v59, %v1328_v59 }
 0x302   : > { %2930 = vmatpush1.bf16.msra.mxu0 %v7460_v37  ;;  %v7494_v0 = vld [vmem:[%s9169_s19 + $0x384] ss:$16 sps:$4 sm:$0xff]   ;;  %v7496_v1 = vld [vmem:[%s9169_s19 + $0x180] ss:$16 sps:$4 sm:$0xff]  }
 0x303   : > { %2971 = vmatpush1.bf16.msra.mxu1 %v7461_v38  ;;  %2931 = vmatprep.subr.bf16.mxu0 %v7462_v39  ;;  %v7497_v2 = vld [vmem:[%s9169_s19 + $0x380] ss:$16 sps:$4 sm:$0xff]   ;;  %v7498_v3 = vld [vmem:[%s9169_s19 + $0x1a4] ss:$16 sps:$4 sm:$0xff]  }
 0x304   : > { %2972 = vmatprep.subr.bf16.mxu1 %v7464_v40  ;;  %2990 = vmatprep.mubr.bf16.mxu1 %v9263_v62  ;;  %v7500_v4 = vld [vmem:[%s9169_s19 + $0x3a4] ss:$16 sps:$4 sm:$0xff]   ;;  %v7502_v5 = vld [vmem:[%s9169_s19 + $0x1a0] ss:$16 sps:$4 sm:$0xff]  }
 0x305   : > { %v7503_v6 = vld [vmem:[%s9169_s19 + $0x3a0] ss:$16 sps:$4 sm:$0xff]   ;;  %v7504_v7 = vld [vmem:[%s9169_s19 + $0x1c4] ss:$16 sps:$4 sm:$0xff]  }
 0x306   : > { %2932 = vmatpush1.bf16.msra.mxu0 %v7466_v41  ;;  %v7506_v8 = vld [vmem:[%s9169_s19 + $0x3c4] ss:$16 sps:$4 sm:$0xff]   ;;  %v7508_v9 = vld [vmem:[%s9169_s19 + $0x1c0] ss:$16 sps:$4 sm:$0xff]  }
 0x307   : > { %2973 = vmatpush1.bf16.msra.mxu1 %v7467_v42  ;;  %2933 = vmatprep.subr.bf16.mxu0 %v7468_v43  ;;  %v7509_v10 = vld [vmem:[%s9169_s19 + $0x3c0] ss:$16 sps:$4 sm:$0xff]   ;;  %v7510_v11 = vld [vmem:[%s9169_s19 + $0x1e4] ss:$16 sps:$4 sm:$0xff]  }
 0x308   : > { %2974 = vmatprep.subr.bf16.mxu1 %v7470_v44  ;;  %v7512_v12 = vld [vmem:[%s9169_s19 + $0x3e4] ss:$16 sps:$4 sm:$0xff]   ;;  %v7514_v13 = vld [vmem:[%s9169_s19 + $0x1e0] ss:$16 sps:$4 sm:$0xff]  }
 0x309   : > { %v7515_v14 = vld [vmem:[%s9169_s19 + $0x3e0] ss:$16 sps:$4 sm:$0xff]   ;;  %v7522_v15 = vld [vmem:[%s9169_s19 + $0x404] ss:$16 sps:$4 sm:$0xff]  }
 0x30a   : > { %2934 = vmatpush1.bf16.msra.mxu0 %v7472_v45  ;;  %v7525_v16 = vld [vmem:[%s9169_s19 + $0x604] ss:$16 sps:$4 sm:$0xff]   ;;  %v7520_v19 = vld [vmem:[%s9169_s19 + $0x400] ss:$16 sps:$4 sm:$0xff]   ;;  %v8520_v45 = vmov 0  }
 0x30b   : > { %2975 = vmatpush1.bf16.msra.mxu1 %v7473_v46  ;;  %2935 = vmatprep.subr.bf16.mxu0 %v7474_v47  ;;  %v7523_v20 = vld [vmem:[%s9169_s19 + $0x600] ss:$16 sps:$4 sm:$0xff]   ;;  %v7528_v21 = vld [vmem:[%s9169_s19 + $0x424] ss:$16 sps:$4 sm:$0xff]  }
 0x30c   : > { %2976 = vmatprep.subr.bf16.mxu1 %v7476_v48  ;;  %v7531_v22 = vld [vmem:[%s9169_s19 + $0x624] ss:$16 sps:$4 sm:$0xff]   ;;  %v7526_v23 = vld [vmem:[%s9169_s19 + $0x420] ss:$16 sps:$4 sm:$0xff]   ;;  %7419 = vset.pattern.permute.xlu0 %v8520_v45 }
 0x30d   : > { %v7529_v24 = vld [vmem:[%s9169_s19 + $0x620] ss:$16 sps:$4 sm:$0xff]   ;;  %v7534_v25 = vld [vmem:[%s9169_s19 + $0x444] ss:$16 sps:$4 sm:$0xff]  }
 0x30e   : > { %2936 = vmatpush1.bf16.msra.mxu0 %v7478_v49  ;;  %v7537_v26 = vld [vmem:[%s9169_s19 + $0x644] ss:$16 sps:$4 sm:$0xff]   ;;  %v7532_v27 = vld [vmem:[%s9169_s19 + $0x440] ss:$16 sps:$4 sm:$0xff]  }
 0x30f   : > { %2977 = vmatpush1.bf16.msra.mxu1 %v7479_v50  ;;  %2937 = vmatprep.subr.bf16.mxu0 %v7480_v51  ;;  %v7535_v28 = vld [vmem:[%s9169_s19 + $0x640] ss:$16 sps:$4 sm:$0xff]   ;;  %v7540_v29 = vld [vmem:[%s9169_s19 + $0x464] ss:$16 sps:$4 sm:$0xff]  }
 0x310   : > { %2978 = vmatprep.subr.bf16.mxu1 %v7482_v52  ;;  %v7543_v30 = vld [vmem:[%s9169_s19 + $0x664] ss:$16 sps:$4 sm:$0xff]   ;;  %v7538_v31 = vld [vmem:[%s9169_s19 + $0x460] ss:$16 sps:$4 sm:$0xff]  }
 0x311   : > { %v7541_v32 = vld [vmem:[%s9169_s19 + $0x660] ss:$16 sps:$4 sm:$0xff]   ;;  %v7546_v33 = vld [vmem:[%s9169_s19 + $0x484] ss:$16 sps:$4 sm:$0xff]  }
 0x312   : > { %2938 = vmatpush1.bf16.msra.mxu0 %v7484_v53  ;;  %v7549_v34 = vld [vmem:[%s9169_s19 + $0x684] ss:$16 sps:$4 sm:$0xff]   ;;  %v7544_v35 = vld [vmem:[%s9169_s19 + $0x480] ss:$16 sps:$4 sm:$0xff]  }
 0x313   : > { %2979 = vmatpush1.bf16.msra.mxu1 %v7485_v54  ;;  %2939 = vmatprep.subr.bf16.mxu0 %v7486_v55  ;;  %v7547_v36 = vld [vmem:[%s9169_s19 + $0x680] ss:$16 sps:$4 sm:$0xff]   ;;  %v7552_v37 = vld [vmem:[%s9169_s19 + $0x4a4] ss:$16 sps:$4 sm:$0xff]  }
 0x314   : > { %2980 = vmatprep.subr.bf16.mxu1 %v7488_v56  ;;  %v7555_v38 = vld [vmem:[%s9169_s19 + $0x6a4] ss:$16 sps:$4 sm:$0xff]   ;;  %v7550_v39 = vld [vmem:[%s9169_s19 + $0x4a0] ss:$16 sps:$4 sm:$0xff]  }
 0x315   : > { %v7553_v40 = vld [vmem:[%s9169_s19 + $0x6a0] ss:$16 sps:$4 sm:$0xff]   ;;  %v7558_v41 = vld [vmem:[%s9169_s19 + $0x4c4] ss:$16 sps:$4 sm:$0xff]  }
 0x316   : > { %2940 = vmatpush1.bf16.msra.mxu0 %v7490_v60  ;;  %v7561_v42 = vld [vmem:[%s9169_s19 + $0x6c4] ss:$16 sps:$4 sm:$0xff]   ;;  %v9315_v43 = vld [vmem:[#allocation2 + $0x10] sm:$0xff] }
 0x317   : > { %2981 = vmatpush1.bf16.msra.mxu1 %v7491_v61  ;;  %2941 = vmatprep.subr.bf16.mxu0 %v7492_v63  ;;  %v9317_v44 = vld [vmem:[#allocation2 + $0x18] sm:$0xff]  ;;  %v9324_v48 = vcombine.high %v9315_v43, %v9315_v43 }
 0x318   : > { %2982 = vmatprep.subr.bf16.mxu1 %v7494_v0  ;;  %v7556_v46 = vld [vmem:[%s9169_s19 + $0x4c0] ss:$16 sps:$4 sm:$0xff]   ;;  %v9328_v49 = vcombine.high %v9317_v44, %v9317_v44  ;;  %v7564_v50 = vld [vmem:[%s9169_s19 + $0x4e4] ss:$16 sps:$4 sm:$0xff]  }
 0x319   : > { %v7559_v47 = vld [vmem:[%s9169_s19 + $0x6c0] ss:$16 sps:$4 sm:$0xff]   ;;  %v7567_v51 = vld [vmem:[%s9169_s19 + $0x6e4] ss:$16 sps:$4 sm:$0xff]  }
 0x31a   : > { %2942 = vmatpush1.bf16.msra.mxu0 %v7496_v1  ;;  %v7562_v52 = vld [vmem:[%s9169_s19 + $0x4e0] ss:$16 sps:$4 sm:$0xff]   ;;  %v7570_v54 = vld [vmem:[%s9169_s19 + $0x504] ss:$16 sps:$4 sm:$0xff]  }
 0x31b   : > { %2983 = vmatpush1.bf16.msra.mxu1 %v7497_v2  ;;  %2943 = vmatprep.subr.bf16.mxu0 %v7498_v3  ;;  %v7565_v53 = vld [vmem:[%s9169_s19 + $0x6e0] ss:$16 sps:$4 sm:$0xff]   ;;  %v7573_v55 = vld [vmem:[%s9169_s19 + $0x704] ss:$16 sps:$4 sm:$0xff]  }
 0x31c   : > { %2984 = vmatprep.subr.bf16.mxu1 %v7500_v4  ;;  %v7568_v56 = vld [vmem:[%s9169_s19 + $0x500] ss:$16 sps:$4 sm:$0xff]   ;;  %v7576_v59 = vld [vmem:[%s9169_s19 + $0x524] ss:$16 sps:$4 sm:$0xff]  }
 0x31d   : > { %v7571_v57 = vld [vmem:[%s9169_s19 + $0x700] ss:$16 sps:$4 sm:$0xff]   ;;  %v7579_v60 = vld [vmem:[%s9169_s19 + $0x724] ss:$16 sps:$4 sm:$0xff]  }
 0x31e   : > { %2944 = vmatpush1.bf16.msra.mxu0 %v7502_v5  ;;  %v7574_v61 = vld [vmem:[%s9169_s19 + $0x520] ss:$16 sps:$4 sm:$0xff]   ;;  %v7582_v0 = vld [vmem:[%s9169_s19 + $0x544] ss:$16 sps:$4 sm:$0xff]  }
 0x31f   : > { %2985 = vmatpush1.bf16.msra.mxu1 %v7503_v6  ;;  %2945 = vmatprep.subr.bf16.mxu0 %v7504_v7  ;;  %v7577_v63 = vld [vmem:[%s9169_s19 + $0x720] ss:$16 sps:$4 sm:$0xff]   ;;  %v7585_v1 = vld [vmem:[%s9169_s19 + $0x744] ss:$16 sps:$4 sm:$0xff]  }
 0x320   : > { %2986 = vmatprep.subr.bf16.mxu1 %v7506_v8  ;;  %v7580_v2 = vld [vmem:[%s9169_s19 + $0x540] ss:$16 sps:$4 sm:$0xff]   ;;  %v7588_v4 = vld [vmem:[%s9169_s19 + $0x564] ss:$16 sps:$4 sm:$0xff]  }
 0x321   : > { %v7583_v3 = vld [vmem:[%s9169_s19 + $0x740] ss:$16 sps:$4 sm:$0xff]   ;;  %v7591_v5 = vld [vmem:[%s9169_s19 + $0x764] ss:$16 sps:$4 sm:$0xff]  }
 0x322   : > { %2946 = vmatpush1.bf16.msra.mxu0 %v7508_v9  ;;  %v7586_v6 = vld [vmem:[%s9169_s19 + $0x560] ss:$16 sps:$4 sm:$0xff]   ;;  %v7594_v8 = vld [vmem:[%s9169_s19 + $0x584] ss:$16 sps:$4 sm:$0xff]  }
 0x323   : > { %2987 = vmatpush1.bf16.msra.mxu1 %v7509_v10  ;;  %2947 = vmatprep.subr.bf16.mxu0 %v7510_v11  ;;  %v7589_v7 = vld [vmem:[%s9169_s19 + $0x760] ss:$16 sps:$4 sm:$0xff]   ;;  %v7597_v9 = vld [vmem:[%s9169_s19 + $0x784] ss:$16 sps:$4 sm:$0xff]  }
 0x324   : > { %2988 = vmatprep.subr.bf16.mxu1 %v7512_v12  ;;  %v7592_v10 = vld [vmem:[%s9169_s19 + $0x580] ss:$16 sps:$4 sm:$0xff]   ;;  %v7600_v12 = vld [vmem:[%s9169_s19 + $0x5a4] ss:$16 sps:$4 sm:$0xff]  }
 0x325   : > { %v7595_v11 = vld [vmem:[%s9169_s19 + $0x780] ss:$16 sps:$4 sm:$0xff]  }
 0x326   : > { %2948 = vmatpush1.bf16.msra.mxu0 %v7514_v13  ;;  %v7603_v13 = vld [vmem:[%s9169_s19 + $0x7a4] ss:$16 sps:$4 sm:$0xff]  }
 0x327   : > { %2989 = vmatpush1.bf16.msra.mxu1 %v7515_v14  ;;  %2999 = vmatprep.subr.bf16.mxu0 %v7522_v15  ;;  %v7598_v14 = vld [vmem:[%s9169_s19 + $0x5a0] ss:$16 sps:$4 sm:$0xff]  }
 0x328   : > { %3040 = vmatprep.subr.bf16.mxu1 %v7525_v16  ;;  %v7601_v15 = vld [vmem:[%s9169_s19 + $0x7a0] ss:$16 sps:$4 sm:$0xff]   ;;  %v7606_v16 = vld [vmem:[%s9169_s19 + $0x5c4] ss:$16 sps:$4 sm:$0xff]  }
 0x329   : > { %2950 = vmatmul.mubr.bf16.vlgmr.msra.gmra.mrb[0].mxu0 %v9285_v17 }
 0x32a   : > { %2991 = vmatmul.mubr.bf16.vlgmr.msra.gmra.mrb[0].mxu1 %v9287_v18  ;;  %3000 = vmatpush1.bf16.msra.mxu0 %v7520_v19  ;;  %v7609_v19 = vld [vmem:[%s9169_s19 + $0x7c4] ss:$16 sps:$4 sm:$0xff]  }
 0x32b   : > { %3041 = vmatpush1.bf16.msra.mxu1 %v7523_v20  ;;  %3001 = vmatprep.subr.bf16.mxu0 %v7528_v21  ;;  %v7604_v20 = vld [vmem:[%s9169_s19 + $0x5c0] ss:$16 sps:$4 sm:$0xff]  }
 0x32c   : > { %3042 = vmatprep.subr.bf16.mxu1 %v7531_v22  ;;  %3031 = vmatprep.mubr.bf16.mxu0 %v9324_v48  ;;  %v7607_v21 = vld [vmem:[%s9169_s19 + $0x7c0] ss:$16 sps:$4 sm:$0xff]   ;;  %v7612_v22 = vld [vmem:[%s9169_s19 + $0x5e4] ss:$16 sps:$4 sm:$0xff]  }
 0x32d   : > { %3072 = vmatprep.mubr.bf16.mxu1 %v9328_v49 }
 0x32e   : > { %3002 = vmatpush1.bf16.msra.mxu0 %v7526_v23  ;;  %v7615_v23 = vld [vmem:[%s9169_s19 + $0x7e4] ss:$16 sps:$4 sm:$0xff]  }
 0x32f   : > { %3043 = vmatpush1.bf16.msra.mxu1 %v7529_v24  ;;  %3003 = vmatprep.subr.bf16.mxu0 %v7534_v25  ;;  %v7610_v24 = vld [vmem:[%s9169_s19 + $0x5e0] ss:$16 sps:$4 sm:$0xff]  }
 0x330   : > { %3044 = vmatprep.subr.bf16.mxu1 %v7537_v26  ;;  %v7613_v25 = vld [vmem:[%s9169_s19 + $0x7e0] ss:$16 sps:$4 sm:$0xff]   ;;  %v7622_v26 = vld [vmem:[%s9169_s19 + $0xc] ss:$16 sps:$4 sm:$0xff]  }
 0x332   : > { %3004 = vmatpush1.bf16.msra.mxu0 %v7532_v27  ;;  %v7625_v27 = vld [vmem:[%s9169_s19 + $0x20c] ss:$16 sps:$4 sm:$0xff]  }
 0x333   : > { %3045 = vmatpush1.bf16.msra.mxu1 %v7535_v28  ;;  %3005 = vmatprep.subr.bf16.mxu0 %v7540_v29  ;;  %v9372_v28 = vcombine.low %v9315_v43, %v9315_v43  ;;  %v9376_v29 = vcombine.low %v9317_v44, %v9317_v44  ;;  %v7641_v43 = vld [vmem:[%s9169_s19 + $0x268] ss:$16 sps:$4 sm:$0xff]  }
 0x334   : > { %3046 = vmatprep.subr.bf16.mxu1 %v7543_v30  ;;  %v7620_v30 = vld [vmem:[%s9169_s19 + $0x8] ss:$16 sps:$4 sm:$0xff]  }
 0x335   : > { %v3245_v44 = vld [vmem:[%s10173_s29] sm:$0xff] }
 0x336   : > { %3006 = vmatpush1.bf16.msra.mxu0 %v7538_v31  ;;  %v7623_v31 = vld [vmem:[%s9169_s19 + $0x208] ss:$16 sps:$4 sm:$0xff]   ;;  %3249 = vperm.xlu0 %7419, %v3245_v44  }
 0x337   : > { %3047 = vmatpush1.bf16.msra.mxu1 %v7541_v32  ;;  %3007 = vmatprep.subr.bf16.mxu0 %v7546_v33  ;;  %v7628_v32 = vld [vmem:[%s9169_s19 + $0x2c] ss:$16 sps:$4 sm:$0xff]   ;;  %v7728_v44 = vld [vmem:[%s9169_s19 + $0x448] ss:$16 sps:$4 sm:$0xff]  }
 0x338   : > { %3048 = vmatprep.subr.bf16.mxu1 %v7549_v34  ;;  %v7631_v33 = vld [vmem:[%s9169_s19 + $0x22c] ss:$16 sps:$4 sm:$0xff]   ;;  %v7626_v34 = vld [vmem:[%s9169_s19 + $0x28] ss:$16 sps:$4 sm:$0xff]  }
 0x33a   : > { %3008 = vmatpush1.bf16.msra.mxu0 %v7544_v35  ;;  %v7629_v35 = vld [vmem:[%s9169_s19 + $0x228] ss:$16 sps:$4 sm:$0xff]  }
 0x33b   : > { %3049 = vmatpush1.bf16.msra.mxu1 %v7547_v36  ;;  %3009 = vmatprep.subr.bf16.mxu0 %v7552_v37  ;;  %v7634_v36 = vld [vmem:[%s9169_s19 + $0x4c] ss:$16 sps:$4 sm:$0xff]  }
 0x33c   : > { %3050 = vmatprep.subr.bf16.mxu1 %v7555_v38  ;;  %v7637_v37 = vld [vmem:[%s9169_s19 + $0x24c] ss:$16 sps:$4 sm:$0xff]   ;;  %v7632_v38 = vld [vmem:[%s9169_s19 + $0x48] ss:$16 sps:$4 sm:$0xff]  }
 0x33e   : > { %3010 = vmatpush1.bf16.msra.mxu0 %v7550_v39  ;;  %v7635_v39 = vld [vmem:[%s9169_s19 + $0x248] ss:$16 sps:$4 sm:$0xff]  }
 0x33f   : > { %3051 = vmatpush1.bf16.msra.mxu1 %v7553_v40  ;;  %3011 = vmatprep.subr.bf16.mxu0 %v7558_v41  ;;  %v7640_v40 = vld [vmem:[%s9169_s19 + $0x6c] ss:$16 sps:$4 sm:$0xff]  }
 0x340   : > { %3052 = vmatprep.subr.bf16.mxu1 %v7561_v42  ;;  %v7643_v41 = vld [vmem:[%s9169_s19 + $0x26c] ss:$16 sps:$4 sm:$0xff]   ;;  %v7638_v42 = vld [vmem:[%s9169_s19 + $0x68] ss:$16 sps:$4 sm:$0xff]  }
 0x342   : > { %3012 = vmatpush1.bf16.msra.mxu0 %v7556_v46  ;;  %v7644_v46 = vld [vmem:[%s9169_s19 + $0x88] ss:$16 sps:$4 sm:$0xff]  }
 0x343   : > { %3053 = vmatpush1.bf16.msra.mxu1 %v7559_v47  ;;  %3013 = vmatprep.subr.bf16.mxu0 %v7564_v50  ;;  %v7647_v47 = vld [vmem:[%s9169_s19 + $0x288] ss:$16 sps:$4 sm:$0xff]   ;;  %v7652_v50 = vld [vmem:[%s9169_s19 + $0xac] ss:$16 sps:$4 sm:$0xff]  }
 0x344   : > { %3054 = vmatprep.subr.bf16.mxu1 %v7567_v51  ;;  %v7655_v51 = vld [vmem:[%s9169_s19 + $0x2ac] ss:$16 sps:$4 sm:$0xff]  }
 0x346   : > { %3014 = vmatpush1.bf16.msra.mxu0 %v7562_v52  ;;  %v7650_v52 = vld [vmem:[%s9169_s19 + $0xa8] ss:$16 sps:$4 sm:$0xff]  }
 0x347   : > { %3055 = vmatpush1.bf16.msra.mxu1 %v7565_v53  ;;  %3015 = vmatprep.subr.bf16.mxu0 %v7570_v54  ;;  %v7653_v53 = vld [vmem:[%s9169_s19 + $0x2a8] ss:$16 sps:$4 sm:$0xff]   ;;  %v7658_v54 = vld [vmem:[%s9169_s19 + $0xcc] ss:$16 sps:$4 sm:$0xff]  }
 0x348   : > { %3056 = vmatprep.subr.bf16.mxu1 %v7573_v55  ;;  %v7661_v55 = vld [vmem:[%s9169_s19 + $0x2cc] ss:$16 sps:$4 sm:$0xff]  }
 0x34a   : > { %3016 = vmatpush1.bf16.msra.mxu0 %v7568_v56  ;;  %v7656_v56 = vld [vmem:[%s9169_s19 + $0xc8] ss:$16 sps:$4 sm:$0xff]  }
 0x34b   : > { %3057 = vmatpush1.bf16.msra.mxu1 %v7571_v57  ;;  %3017 = vmatprep.subr.bf16.mxu0 %v7576_v59  ;;  %v7659_v57 = vld [vmem:[%s9169_s19 + $0x2c8] ss:$16 sps:$4 sm:$0xff]   ;;  %v7664_v59 = vld [vmem:[%s9169_s19 + $0xec] ss:$16 sps:$4 sm:$0xff]  }
 0x34c   : > { %3058 = vmatprep.subr.bf16.mxu1 %v7579_v60  ;;  %v7667_v60 = vld [vmem:[%s9169_s19 + $0x2ec] ss:$16 sps:$4 sm:$0xff]  }
 0x34e   : > { %3018 = vmatpush1.bf16.msra.mxu0 %v7574_v61  ;;  %v7662_v61 = vld [vmem:[%s9169_s19 + $0xe8] ss:$16 sps:$4 sm:$0xff]  }
 0x34f   : > { %3059 = vmatpush1.bf16.msra.mxu1 %v7577_v63  ;;  %3019 = vmatprep.subr.bf16.mxu0 %v7582_v0  ;;  %v7665_v63 = vld [vmem:[%s9169_s19 + $0x2e8] ss:$16 sps:$4 sm:$0xff]   ;;  %v7670_v0 = vld [vmem:[%s9169_s19 + $0x10c] ss:$16 sps:$4 sm:$0xff]  }
 0x350   : > { %3060 = vmatprep.subr.bf16.mxu1 %v7585_v1  ;;  %v7673_v1 = vld [vmem:[%s9169_s19 + $0x30c] ss:$16 sps:$4 sm:$0xff]  }
 0x352   : > { %3020 = vmatpush1.bf16.msra.mxu0 %v7580_v2  ;;  %v7668_v2 = vld [vmem:[%s9169_s19 + $0x108] ss:$16 sps:$4 sm:$0xff]  }
 0x353   : > { %3061 = vmatpush1.bf16.msra.mxu1 %v7583_v3  ;;  %3021 = vmatprep.subr.bf16.mxu0 %v7588_v4  ;;  %v7671_v3 = vld [vmem:[%s9169_s19 + $0x308] ss:$16 sps:$4 sm:$0xff]   ;;  %v7676_v4 = vld [vmem:[%s9169_s19 + $0x12c] ss:$16 sps:$4 sm:$0xff]  }
 0x354   : > { %3062 = vmatprep.subr.bf16.mxu1 %v7591_v5  ;;  %v7679_v5 = vld [vmem:[%s9169_s19 + $0x32c] ss:$16 sps:$4 sm:$0xff]  }
 0x356   : > { %3022 = vmatpush1.bf16.msra.mxu0 %v7586_v6  ;;  %v7674_v6 = vld [vmem:[%s9169_s19 + $0x128] ss:$16 sps:$4 sm:$0xff]  }
 0x357   : > { %3063 = vmatpush1.bf16.msra.mxu1 %v7589_v7  ;;  %3023 = vmatprep.subr.bf16.mxu0 %v7594_v8  ;;  %v7677_v7 = vld [vmem:[%s9169_s19 + $0x328] ss:$16 sps:$4 sm:$0xff]   ;;  %v7682_v8 = vld [vmem:[%s9169_s19 + $0x14c] ss:$16 sps:$4 sm:$0xff]  }
 0x358   : > { %3064 = vmatprep.subr.bf16.mxu1 %v7597_v9  ;;  %v7685_v9 = vld [vmem:[%s9169_s19 + $0x34c] ss:$16 sps:$4 sm:$0xff]  }
 0x35a   : > { %3024 = vmatpush1.bf16.msra.mxu0 %v7592_v10  ;;  %v7680_v10 = vld [vmem:[%s9169_s19 + $0x148] ss:$16 sps:$4 sm:$0xff]  }
 0x35b   : > { %3065 = vmatpush1.bf16.msra.mxu1 %v7595_v11  ;;  %3025 = vmatprep.subr.bf16.mxu0 %v7600_v12  ;;  %v7683_v11 = vld [vmem:[%s9169_s19 + $0x348] ss:$16 sps:$4 sm:$0xff]   ;;  %v7688_v12 = vld [vmem:[%s9169_s19 + $0x16c] ss:$16 sps:$4 sm:$0xff]  }
 0x35c   : > { %3066 = vmatprep.subr.bf16.mxu1 %v7603_v13  ;;  %v7691_v13 = vld [vmem:[%s9169_s19 + $0x36c] ss:$16 sps:$4 sm:$0xff]  }
 0x35e   : > { %3026 = vmatpush1.bf16.msra.mxu0 %v7598_v14  ;;  %v7686_v14 = vld [vmem:[%s9169_s19 + $0x168] ss:$16 sps:$4 sm:$0xff]  }
 0x35f   : > { %3067 = vmatpush1.bf16.msra.mxu1 %v7601_v15  ;;  %3027 = vmatprep.subr.bf16.mxu0 %v7606_v16  ;;  %v7689_v15 = vld [vmem:[%s9169_s19 + $0x368] ss:$16 sps:$4 sm:$0xff]   ;;  %v7694_v16 = vld [vmem:[%s9169_s19 + $0x18c] ss:$16 sps:$4 sm:$0xff]  }
 0x360   : > { %3068 = vmatprep.subr.bf16.mxu1 %v7609_v19  ;;  %v7697_v19 = vld [vmem:[%s9169_s19 + $0x38c] ss:$16 sps:$4 sm:$0xff]  }
 0x362   : > { %3028 = vmatpush1.bf16.msra.mxu0 %v7604_v20  ;;  %v7692_v20 = vld [vmem:[%s9169_s19 + $0x188] ss:$16 sps:$4 sm:$0xff]  }
 0x363   : > { %3069 = vmatpush1.bf16.msra.mxu1 %v7607_v21  ;;  %3029 = vmatprep.subr.bf16.mxu0 %v7612_v22  ;;  %v7695_v21 = vld [vmem:[%s9169_s19 + $0x388] ss:$16 sps:$4 sm:$0xff]   ;;  %v7700_v22 = vld [vmem:[%s9169_s19 + $0x1ac] ss:$16 sps:$4 sm:$0xff]  }
 0x364   : > { %3070 = vmatprep.subr.bf16.mxu1 %v7615_v23  ;;  %v7703_v23 = vld [vmem:[%s9169_s19 + $0x3ac] ss:$16 sps:$4 sm:$0xff]  }
 0x366   : > { %3030 = vmatpush1.bf16.msra.mxu0 %v7610_v24  ;;  %v7698_v24 = vld [vmem:[%s9169_s19 + $0x1a8] ss:$16 sps:$4 sm:$0xff]  }
 0x367   : > { %3071 = vmatpush1.bf16.msra.mxu1 %v7613_v25  ;;  %3081 = vmatprep.subr.bf16.mxu0 %v7622_v26  ;;  %v7701_v25 = vld [vmem:[%s9169_s19 + $0x3a8] ss:$16 sps:$4 sm:$0xff]   ;;  %v7706_v26 = vld [vmem:[%s9169_s19 + $0x1cc] ss:$16 sps:$4 sm:$0xff]  }
 0x368   : > { %3122 = vmatprep.subr.bf16.mxu1 %v7625_v27  ;;  %v7709_v27 = vld [vmem:[%s9169_s19 + $0x3cc] ss:$16 sps:$4 sm:$0xff]  }
 0x369   : > { %3032 = vmatmul.mubr.bf16.vlgmr.msra.gmra.mrb[4].mxu0 %v9372_v28 }
 0x36a   : > { %3073 = vmatmul.mubr.bf16.vlgmr.msra.gmra.mrb[4].mxu1 %v9376_v29  ;;  %3082 = vmatpush1.bf16.msra.mxu0 %v7620_v30  ;;  %v7704_v30 = vld [vmem:[%s9169_s19 + $0x1c8] ss:$16 sps:$4 sm:$0xff]  }
 0x36b   : > { %3123 = vmatpush1.bf16.msra.mxu1 %v7623_v31  ;;  %3083 = vmatprep.subr.bf16.mxu0 %v7628_v32  ;;  %v7707_v31 = vld [vmem:[%s9169_s19 + $0x3c8] ss:$16 sps:$4 sm:$0xff]   ;;  %v7712_v32 = vld [vmem:[%s9169_s19 + $0x1ec] ss:$16 sps:$4 sm:$0xff]  }
 0x36c   : > { %3124 = vmatprep.subr.bf16.mxu1 %v7631_v33  ;;  %3113 = vmatprep.mubr.bf16.mxu0 %v9259_v58  ;;  %v7646_v58 = vld [vmem:[%s9169_s19 + $0x8c] ss:$16 sps:$4 sm:$0xff]  }
 0x36d   : > { %3154 = vmatprep.mubr.bf16.mxu1 %v9263_v62  ;;  %v7649_v62 = vld [vmem:[%s9169_s19 + $0x28c] ss:$16 sps:$4 sm:$0xff]  }
 0x36e   : > { %3084 = vmatpush1.bf16.msra.mxu0 %v7626_v34  ;;  %v7715_v33 = vld [vmem:[%s9169_s19 + $0x3ec] ss:$16 sps:$4 sm:$0xff]   ;;  %v7710_v34 = vld [vmem:[%s9169_s19 + $0x1e8] ss:$16 sps:$4 sm:$0xff]  }
 0x36f   : > { %3125 = vmatpush1.bf16.msra.mxu1 %v7629_v35  ;;  %3085 = vmatprep.subr.bf16.mxu0 %v7634_v36  ;;  %v7713_v35 = vld [vmem:[%s9169_s19 + $0x3e8] ss:$16 sps:$4 sm:$0xff]   ;;  %v7718_v36 = vld [vmem:[%s9169_s19 + $0x40c] ss:$16 sps:$4 sm:$0xff]  }
 0x370   : > { %3126 = vmatprep.subr.bf16.mxu1 %v7637_v37  ;;  %v7721_v37 = vld [vmem:[%s9169_s19 + $0x60c] ss:$16 sps:$4 sm:$0xff]  }
 0x372   : > { %3086 = vmatpush1.bf16.msra.mxu0 %v7632_v38  ;;  %v7716_v38 = vld [vmem:[%s9169_s19 + $0x408] ss:$16 sps:$4 sm:$0xff]  }
 0x373   : > { %3127 = vmatpush1.bf16.msra.mxu1 %v7635_v39  ;;  %3087 = vmatprep.subr.bf16.mxu0 %v7640_v40  ;;  %v7719_v39 = vld [vmem:[%s9169_s19 + $0x608] ss:$16 sps:$4 sm:$0xff]   ;;  %v7724_v40 = vld [vmem:[%s9169_s19 + $0x42c] ss:$16 sps:$4 sm:$0xff]  }
 0x374   : > { %3128 = vmatprep.subr.bf16.mxu1 %v7643_v41  ;;  %v7727_v41 = vld [vmem:[%s9169_s19 + $0x62c] ss:$16 sps:$4 sm:$0xff]  }
 0x376   : > { %3088 = vmatpush1.bf16.msra.mxu0 %v7638_v42  ;;  %v7722_v42 = vld [vmem:[%s9169_s19 + $0x428] ss:$16 sps:$4 sm:$0xff]  }
 0x377   : > { %3129 = vmatpush1.bf16.msra.mxu1 %v7641_v43  ;;  %3089 = vmatprep.subr.bf16.mxu0 %v7646_v58  ;;  %v7725_v43 = vld [vmem:[%s9169_s19 + $0x628] ss:$16 sps:$4 sm:$0xff]   ;;  %v7730_v58 = vld [vmem:[%s9169_s19 + $0x44c] ss:$16 sps:$4 sm:$0xff]  }
 0x378   : > { %3130 = vmatprep.subr.bf16.mxu1 %v7649_v62  ;;  %v7733_v62 = vld [vmem:[%s9169_s19 + $0x64c] ss:$16 sps:$4 sm:$0xff]  }
 0x37a   : > { %3090 = vmatpush1.bf16.msra.mxu0 %v7644_v46  ;;  %v7731_v46 = vld [vmem:[%s9169_s19 + $0x648] ss:$16 sps:$4 sm:$0xff]  }
 0x37b   : > { %3131 = vmatpush1.bf16.msra.mxu1 %v7647_v47  ;;  %3091 = vmatprep.subr.bf16.mxu0 %v7652_v50  ;;  %v7734_v47 = vld [vmem:[%s9169_s19 + $0x468] ss:$16 sps:$4 sm:$0xff]  }
 0x37c   : > { %3132 = vmatprep.subr.bf16.mxu1 %v7655_v51  ;;  %v7737_v50 = vld [vmem:[%s9169_s19 + $0x668] ss:$16 sps:$4 sm:$0xff]   ;;  %v7742_v51 = vld [vmem:[%s9169_s19 + $0x48c] ss:$16 sps:$4 sm:$0xff]  }
 0x37e   : > { %3092 = vmatpush1.bf16.msra.mxu0 %v7650_v52  ;;  %v7745_v52 = vld [vmem:[%s9169_s19 + $0x68c] ss:$16 sps:$4 sm:$0xff]  }
 0x37f   : > { %3133 = vmatpush1.bf16.msra.mxu1 %v7653_v53  ;;  %3093 = vmatprep.subr.bf16.mxu0 %v7658_v54  ;;  %v7748_v53 = vld [vmem:[%s9169_s19 + $0x4ac] ss:$16 sps:$4 sm:$0xff]  }
 0x380   : > { %3134 = vmatprep.subr.bf16.mxu1 %v7661_v55  ;;  %v7751_v54 = vld [vmem:[%s9169_s19 + $0x6ac] ss:$16 sps:$4 sm:$0xff]   ;;  %v7746_v55 = vld [vmem:[%s9169_s19 + $0x4a8] ss:$16 sps:$4 sm:$0xff]  }
 0x382   : > { %3094 = vmatpush1.bf16.msra.mxu0 %v7656_v56  ;;  %v7749_v56 = vld [vmem:[%s9169_s19 + $0x6a8] ss:$16 sps:$4 sm:$0xff]  }
 0x383   : > { %3135 = vmatpush1.bf16.msra.mxu1 %v7659_v57  ;;  %3095 = vmatprep.subr.bf16.mxu0 %v7664_v59  ;;  %v7754_v57 = vld [vmem:[%s9169_s19 + $0x4cc] ss:$16 sps:$4 sm:$0xff]  }
 0x384   : > { %3136 = vmatprep.subr.bf16.mxu1 %v7667_v60  ;;  %v7757_v59 = vld [vmem:[%s9169_s19 + $0x6cc] ss:$16 sps:$4 sm:$0xff]   ;;  %v7752_v60 = vld [vmem:[%s9169_s19 + $0x4c8] ss:$16 sps:$4 sm:$0xff]  }
 0x386   : > { %3096 = vmatpush1.bf16.msra.mxu0 %v7662_v61  ;;  %v7755_v61 = vld [vmem:[%s9169_s19 + $0x6c8] ss:$16 sps:$4 sm:$0xff]  }
 0x387   : > { %3137 = vmatpush1.bf16.msra.mxu1 %v7665_v63  ;;  %3097 = vmatprep.subr.bf16.mxu0 %v7670_v0  ;;  %v7760_v63 = vld [vmem:[%s9169_s19 + $0x4ec] ss:$16 sps:$4 sm:$0xff]  }
 0x388   : > { %3138 = vmatprep.subr.bf16.mxu1 %v7673_v1  ;;  %v7763_v0 = vld [vmem:[%s9169_s19 + $0x6ec] ss:$16 sps:$4 sm:$0xff]   ;;  %v7758_v1 = vld [vmem:[%s9169_s19 + $0x4e8] ss:$16 sps:$4 sm:$0xff]  }
 0x38a   : > { %3098 = vmatpush1.bf16.msra.mxu0 %v7668_v2  ;;  %v7761_v2 = vld [vmem:[%s9169_s19 + $0x6e8] ss:$16 sps:$4 sm:$0xff]  }
 0x38b   : > { %3139 = vmatpush1.bf16.msra.mxu1 %v7671_v3  ;;  %3099 = vmatprep.subr.bf16.mxu0 %v7676_v4  ;;  %v7766_v3 = vld [vmem:[%s9169_s19 + $0x50c] ss:$16 sps:$4 sm:$0xff]  }
 0x38c   : > { %3140 = vmatprep.subr.bf16.mxu1 %v7679_v5  ;;  %v7769_v4 = vld [vmem:[%s9169_s19 + $0x70c] ss:$16 sps:$4 sm:$0xff]   ;;  %v7764_v5 = vld [vmem:[%s9169_s19 + $0x508] ss:$16 sps:$4 sm:$0xff]  }
 0x38e   : > { %3100 = vmatpush1.bf16.msra.mxu0 %v7674_v6  ;;  %v7767_v6 = vld [vmem:[%s9169_s19 + $0x708] ss:$16 sps:$4 sm:$0xff]  }
 0x38f   : > { %3141 = vmatpush1.bf16.msra.mxu1 %v7677_v7  ;;  %3101 = vmatprep.subr.bf16.mxu0 %v7682_v8  ;;  %v7772_v7 = vld [vmem:[%s9169_s19 + $0x52c] ss:$16 sps:$4 sm:$0xff]  }
 0x390   : > { %3142 = vmatprep.subr.bf16.mxu1 %v7685_v9  ;;  %v7775_v8 = vld [vmem:[%s9169_s19 + $0x72c] ss:$16 sps:$4 sm:$0xff]   ;;  %v7770_v9 = vld [vmem:[%s9169_s19 + $0x528] ss:$16 sps:$4 sm:$0xff]  }
 0x392   : > { %3102 = vmatpush1.bf16.msra.mxu0 %v7680_v10  ;;  %v7773_v10 = vld [vmem:[%s9169_s19 + $0x728] ss:$16 sps:$4 sm:$0xff]  }
 0x393   : > { %3143 = vmatpush1.bf16.msra.mxu1 %v7683_v11  ;;  %3103 = vmatprep.subr.bf16.mxu0 %v7688_v12  ;;  %v7778_v11 = vld [vmem:[%s9169_s19 + $0x54c] ss:$16 sps:$4 sm:$0xff]  }
 0x394   : > { %3144 = vmatprep.subr.bf16.mxu1 %v7691_v13  ;;  %v7781_v12 = vld [vmem:[%s9169_s19 + $0x74c] ss:$16 sps:$4 sm:$0xff]   ;;  %v7776_v13 = vld [vmem:[%s9169_s19 + $0x548] ss:$16 sps:$4 sm:$0xff]  }
 0x396   : > { %3104 = vmatpush1.bf16.msra.mxu0 %v7686_v14  ;;  %v7779_v14 = vld [vmem:[%s9169_s19 + $0x748] ss:$16 sps:$4 sm:$0xff]  }
 0x397   : > { %3145 = vmatpush1.bf16.msra.mxu1 %v7689_v15  ;;  %3105 = vmatprep.subr.bf16.mxu0 %v7694_v16  ;;  %v7784_v15 = vld [vmem:[%s9169_s19 + $0x56c] ss:$16 sps:$4 sm:$0xff]  }
 0x398   : > { %3146 = vmatprep.subr.bf16.mxu1 %v7697_v19  ;;  %v7787_v16 = vld [vmem:[%s9169_s19 + $0x76c] ss:$16 sps:$4 sm:$0xff]   ;;  %v7782_v19 = vld [vmem:[%s9169_s19 + $0x568] ss:$16 sps:$4 sm:$0xff]  }
 0x39a   : > { %3106 = vmatpush1.bf16.msra.mxu0 %v7692_v20  ;;  %v7785_v20 = vld [vmem:[%s9169_s19 + $0x768] ss:$16 sps:$4 sm:$0xff]  }
 0x39b   : > { %3147 = vmatpush1.bf16.msra.mxu1 %v7695_v21  ;;  %3107 = vmatprep.subr.bf16.mxu0 %v7700_v22  ;;  %v7790_v21 = vld [vmem:[%s9169_s19 + $0x58c] ss:$16 sps:$4 sm:$0xff]  }
 0x39c   : > { %3148 = vmatprep.subr.bf16.mxu1 %v7703_v23  ;;  %v7793_v22 = vld [vmem:[%s9169_s19 + $0x78c] ss:$16 sps:$4 sm:$0xff]   ;;  %v7788_v23 = vld [vmem:[%s9169_s19 + $0x588] ss:$16 sps:$4 sm:$0xff]  }
 0x39e   : > { %3108 = vmatpush1.bf16.msra.mxu0 %v7698_v24  ;;  %v7791_v24 = vld [vmem:[%s9169_s19 + $0x788] ss:$16 sps:$4 sm:$0xff]  }
 0x39f   : > { %3149 = vmatpush1.bf16.msra.mxu1 %v7701_v25  ;;  %3109 = vmatprep.subr.bf16.mxu0 %v7706_v26  ;;  %v7796_v25 = vld [vmem:[%s9169_s19 + $0x5ac] ss:$16 sps:$4 sm:$0xff]  }
 0x3a0   : > { %3150 = vmatprep.subr.bf16.mxu1 %v7709_v27  ;;  %v7799_v26 = vld [vmem:[%s9169_s19 + $0x7ac] ss:$16 sps:$4 sm:$0xff]   ;;  %v7794_v27 = vld [vmem:[%s9169_s19 + $0x5a8] ss:$16 sps:$4 sm:$0xff]  }
 0x3a2   : > { %3110 = vmatpush1.bf16.msra.mxu0 %v7704_v30  ;;  %v7797_v30 = vld [vmem:[%s9169_s19 + $0x7a8] ss:$16 sps:$4 sm:$0xff]  }
 0x3a3   : > { %3151 = vmatpush1.bf16.msra.mxu1 %v7707_v31  ;;  %3111 = vmatprep.subr.bf16.mxu0 %v7712_v32  ;;  %v7802_v31 = vld [vmem:[%s9169_s19 + $0x5cc] ss:$16 sps:$4 sm:$0xff]  }
 0x3a4   : > { %3152 = vmatprep.subr.bf16.mxu1 %v7715_v33  ;;  %v7805_v32 = vld [vmem:[%s9169_s19 + $0x7cc] ss:$16 sps:$4 sm:$0xff]   ;;  %v7800_v33 = vld [vmem:[%s9169_s19 + $0x5c8] ss:$16 sps:$4 sm:$0xff]  }
 0x3a6   : > { %3112 = vmatpush1.bf16.msra.mxu0 %v7710_v34  ;;  %v7803_v34 = vld [vmem:[%s9169_s19 + $0x7c8] ss:$16 sps:$4 sm:$0xff]  }
 0x3a7   : > { %3153 = vmatpush1.bf16.msra.mxu1 %v7713_v35  ;;  %3163 = vmatprep.subr.bf16.mxu0 %v7718_v36  ;;  %v7808_v35 = vld [vmem:[%s9169_s19 + $0x5ec] ss:$16 sps:$4 sm:$0xff]  }
 0x3a8   : > { %3204 = vmatprep.subr.bf16.mxu1 %v7721_v37  ;;  %v7811_v36 = vld [vmem:[%s9169_s19 + $0x7ec] ss:$16 sps:$4 sm:$0xff]   ;;  %v7806_v37 = vld [vmem:[%s9169_s19 + $0x5e8] ss:$16 sps:$4 sm:$0xff]  }
 0x3a9   : > { %3114 = vmatmul.mubr.bf16.vlgmr.msra.gmra.mrb[8].mxu0 %v9285_v17  ;;  %v7736_v17 = vld [vmem:[%s9169_s19 + $0x46c] ss:$16 sps:$4 sm:$0xff]  }
 0x3aa   : > { %3155 = vmatmul.mubr.bf16.vlgmr.msra.gmra.mrb[8].mxu1 %v9287_v18  ;;  %3164 = vmatpush1.bf16.msra.mxu0 %v7716_v38  ;;  %v7739_v18 = vld [vmem:[%s9169_s19 + $0x66c] ss:$16 sps:$4 sm:$0xff]   ;;  %v7809_v38 = vld [vmem:[%s9169_s19 + $0x7e8] ss:$16 sps:$4 sm:$0xff]  }
 0x3ab   : > { %3205 = vmatpush1.bf16.msra.mxu1 %v7719_v39  ;;  %3165 = vmatprep.subr.bf16.mxu0 %v7724_v40  ;;  %v7814_v39 = vld [vmem:[%s9143_s25 + $0x4] ss:$16 sps:$4 sm:$0xff]   ;;  %v7817_v40 = vld [vmem:[%s9143_s25 + $0xc] ss:$16 sps:$4 sm:$0xff]  }
 0x3ac   : > { %3206 = vmatprep.subr.bf16.mxu1 %v7727_v41  ;;  %3195 = vmatprep.mubr.bf16.mxu0 %v9324_v48  ;;  %v7740_v48 = vld [vmem:[%s9169_s19 + $0x488] ss:$16 sps:$4 sm:$0xff]   ;;  %v7812_v41 = vld [vmem:[%s9143_s25] ss:$16 sps:$4 sm:$0xff]  }
 0x3ad   : > { %3236 = vmatprep.mubr.bf16.mxu1 %v9328_v49  ;;  %v7743_v49 = vld [vmem:[%s9169_s19 + $0x688] ss:$16 sps:$4 sm:$0xff]  }
 0x3ae   : > { %3166 = vmatpush1.bf16.msra.mxu0 %v7722_v42  ;;  %v7815_v42 = vld [vmem:[%s9143_s25 + $0x8] ss:$16 sps:$4 sm:$0xff]  }
 0x3af   : > { %3207 = vmatpush1.bf16.msra.mxu1 %v7725_v43  ;;  %3167 = vmatprep.subr.bf16.mxu0 %v7730_v58  ;;  %v7820_v43 = vld [vmem:[%s9143_s25 + $0x24] ss:$16 sps:$4 sm:$0xff]   ;;  %v7823_v58 = vld [vmem:[%s9143_s25 + $0x2c] ss:$16 sps:$4 sm:$0xff]  }
 0x3b0   : > { %3208 = vmatprep.subr.bf16.mxu1 %v7733_v62  ;;  %v7818_v62 = vld [vmem:[%s9143_s25 + $0x20] ss:$16 sps:$4 sm:$0xff]  }
 0x3b2   : > { %3168 = vmatpush1.bf16.msra.mxu0 %v7728_v44  ;;  %v7821_v44 = vld [vmem:[%s9143_s25 + $0x28] ss:$16 sps:$4 sm:$0xff]  }
 0x3b3   : > { %3209 = vmatpush1.bf16.msra.mxu1 %v7731_v46  ;;  %3169 = vmatprep.subr.bf16.mxu0 %v7736_v17  ;;  %v7826_v46 = vld [vmem:[%s9143_s25 + $0x44] ss:$16 sps:$4 sm:$0xff]   ;;  %v7829_v17 = vld [vmem:[%s9143_s25 + $0x4c] ss:$16 sps:$4 sm:$0xff]  }
 0x3b4   : > { %3210 = vmatprep.subr.bf16.mxu1 %v7739_v18  ;;  %v7827_v18 = vld [vmem:[%s9143_s25 + $0x48] ss:$16 sps:$4 sm:$0xff]  }
 0x3b6   : > { %3170 = vmatpush1.bf16.msra.mxu0 %v7734_v47  ;;  %v7832_v47 = vld [vmem:[%s9143_s25 + $0x64] ss:$16 sps:$4 sm:$0xff]  }
 0x3b7   : > { %3211 = vmatpush1.bf16.msra.mxu1 %v7737_v50  ;;  %3171 = vmatprep.subr.bf16.mxu0 %v7742_v51  ;;  %v7835_v50 = vld [vmem:[%s9143_s25 + $0x6c] ss:$16 sps:$4 sm:$0xff]  }
 0x3b8   : > { %3212 = vmatprep.subr.bf16.mxu1 %v7745_v52  ;;  %v7833_v52 = vld [vmem:[%s9143_s25 + $0x68] ss:$16 sps:$4 sm:$0xff]  }
 0x3ba   : > { %3172 = vmatpush1.bf16.msra.mxu0 %v7740_v48  ;;  %v7838_v48 = vld [vmem:[%s9143_s25 + $0x84] ss:$16 sps:$4 sm:$0xff]  }
 0x3bb   : > { %3213 = vmatpush1.bf16.msra.mxu1 %v7743_v49  ;;  %3173 = vmatprep.subr.bf16.mxu0 %v7748_v53  ;;  %v7841_v49 = vld [vmem:[%s9143_s25 + $0x8c] ss:$16 sps:$4 sm:$0xff]  }
 0x3bc   : > { %3214 = vmatprep.subr.bf16.mxu1 %v7751_v54 }
 0x3be   : > { %3174 = vmatpush1.bf16.msra.mxu0 %v7746_v55  ;;  %v7836_v55 = vld [vmem:[%s9143_s25 + $0x80] ss:$16 sps:$4 sm:$0xff]  }
 0x3bf   : > { %3215 = vmatpush1.bf16.msra.mxu1 %v7749_v56  ;;  %3175 = vmatprep.subr.bf16.mxu0 %v7754_v57  ;;  %v7839_v56 = vld [vmem:[%s9143_s25 + $0x88] ss:$16 sps:$4 sm:$0xff]   ;;  %v9549_v57 = vld [vmem:[%s862_s16] sm:$0xf] }
 0x3c0   : > { %3216 = vmatprep.subr.bf16.mxu1 %v7757_v59  ;;  %v7844_v59 = vld [vmem:[%s9143_s25 + $0xa4] ss:$16 sps:$4 sm:$0xff]  }
 0x3c2   : > { %3176 = vmatpush1.bf16.msra.mxu0 %v7752_v60  ;;  %v7847_v60 = vld [vmem:[%s9143_s25 + $0xac] ss:$16 sps:$4 sm:$0xff]  }
 0x3c3   : > { %3217 = vmatpush1.bf16.msra.mxu1 %v7755_v61  ;;  %3177 = vmatprep.subr.bf16.mxu0 %v7760_v63 }
 0x3c4   : > { %3218 = vmatprep.subr.bf16.mxu1 %v7763_v0  ;;  %v7842_v0 = vld [vmem:[%s9143_s25 + $0xa0] ss:$16 sps:$4 sm:$0xff]  }
 0x3c6   : > { %3178 = vmatpush1.bf16.msra.mxu0 %v7758_v1  ;;  %v7845_v1 = vld [vmem:[%s9143_s25 + $0xa8] ss:$16 sps:$4 sm:$0xff]  }
 0x3c7   : > { %3219 = vmatpush1.bf16.msra.mxu1 %v7761_v2  ;;  %3179 = vmatprep.subr.bf16.mxu0 %v7766_v3  ;;  %v7850_v2 = vld [vmem:[%s9143_s25 + $0xc4] ss:$16 sps:$4 sm:$0xff]   ;;  %v7853_v3 = vld [vmem:[%s9143_s25 + $0xcc] ss:$16 sps:$4 sm:$0xff]  }
 0x3c8   : > { %3220 = vmatprep.subr.bf16.mxu1 %v7769_v4 }
 0x3ca   : > { %3180 = vmatpush1.bf16.msra.mxu0 %v7764_v5 }
 0x3cb   : > { %3221 = vmatpush1.bf16.msra.mxu1 %v7767_v6  ;;  %3181 = vmatprep.subr.bf16.mxu0 %v7772_v7 }
 0x3cc   : > { %3222 = vmatprep.subr.bf16.mxu1 %v7775_v8 }
 0x3ce   : > { %3182 = vmatpush1.bf16.msra.mxu0 %v7770_v9 }
 0x3cf   : > { %3223 = vmatpush1.bf16.msra.mxu1 %v7773_v10  ;;  %3183 = vmatprep.subr.bf16.mxu0 %v7778_v11 }
 0x3d0   : > { %3224 = vmatprep.subr.bf16.mxu1 %v7781_v12  ;;  %v7848_v12 = vld [vmem:[%s9143_s25 + $0xc0] ss:$16 sps:$4 sm:$0xff]  }
 0x3d2   : > { %3184 = vmatpush1.bf16.msra.mxu0 %v7776_v13  ;;  %v7851_v13 = vld [vmem:[%s9143_s25 + $0xc8] ss:$16 sps:$4 sm:$0xff]  }
 0x3d3   : > { %3225 = vmatpush1.bf16.msra.mxu1 %v7779_v14  ;;  %3185 = vmatprep.subr.bf16.mxu0 %v7784_v15 }
 0x3d4   : > { %3226 = vmatprep.subr.bf16.mxu1 %v7787_v16 }
 0x3d6   : > { %3186 = vmatpush1.bf16.msra.mxu0 %v7782_v19  ;;  %v7856_v19 = vld [vmem:[%s9143_s25 + $0xe4] ss:$16 sps:$4 sm:$0xff]  }
 0x3d7   : > { %3227 = vmatpush1.bf16.msra.mxu1 %v7785_v20  ;;  %3187 = vmatprep.subr.bf16.mxu0 %v7790_v21  ;;  %v7859_v20 = vld [vmem:[%s9143_s25 + $0xec] ss:$16 sps:$4 sm:$0xff]  }
 0x3d8   : > { %3228 = vmatprep.subr.bf16.mxu1 %v7793_v22  ;;  %v7854_v22 = vld [vmem:[%s9143_s25 + $0xe0] ss:$16 sps:$4 sm:$0xff]  }
 0x3da   : > { %3188 = vmatpush1.bf16.msra.mxu0 %v7788_v23  ;;  %v7857_v23 = vld [vmem:[%s9143_s25 + $0xe8] ss:$16 sps:$4 sm:$0xff]  }
 0x3db   : > { %3229 = vmatpush1.bf16.msra.mxu1 %v7791_v24  ;;  %3189 = vmatprep.subr.bf16.mxu0 %v7796_v25  ;;  %v7862_v24 = vld [vmem:[%s9153_s9 + $0x4] ss:$8 sps:$4 sm:$0xff]  }
 0x3dc   : > { %3230 = vmatprep.subr.bf16.mxu1 %v7799_v26  ;;  %v7865_v25 = vld [vmem:[%s9153_s9 + $0x104] ss:$8 sps:$4 sm:$0xff]   ;;  %v3311_v26 = vld [vmem:[%s796_s27] sm:$0xf]  ;;  %s10175_s27 = sld [smem:[#allocation60_spill]] (!%p7230_p0) }
 0x3de   : > { %3190 = vmatpush1.bf16.msra.mxu0 %v7794_v27  ;;  %v7860_v27 = vld [vmem:[%s9153_s9] ss:$8 sps:$4 sm:$0xff]  }
 0x3df   : > { %3231 = vmatpush1.bf16.msra.mxu1 %v7797_v30  ;;  %3191 = vmatprep.subr.bf16.mxu0 %v7802_v31  ;;  %v7863_v30 = vld [vmem:[%s9153_s9 + $0x100] ss:$8 sps:$4 sm:$0xff]   ;;  %v7868_v31 = vld [vmem:[%s9153_s9 + $0x14] ss:$8 sps:$4 sm:$0xff]  }
 0x3e0   : > { %3232 = vmatprep.subr.bf16.mxu1 %v7805_v32  ;;  %v7871_v32 = vld [vmem:[%s9153_s9 + $0x114] ss:$8 sps:$4 sm:$0xff]  }
 0x3e2   : > { %3192 = vmatpush1.bf16.msra.mxu0 %v7800_v33  ;;  %v7866_v33 = vld [vmem:[%s9153_s9 + $0x10] ss:$8 sps:$4 sm:$0xff]  }
 0x3e3   : > { %3233 = vmatpush1.bf16.msra.mxu1 %v7803_v34  ;;  %3193 = vmatprep.subr.bf16.mxu0 %v7808_v35  ;;  %v7869_v34 = vld [vmem:[%s9153_s9 + $0x110] ss:$8 sps:$4 sm:$0xff]   ;;  %v7874_v35 = vld [vmem:[%s9153_s9 + $0x24] ss:$8 sps:$4 sm:$0xff]  }
 0x3e4   : > { %3234 = vmatprep.subr.bf16.mxu1 %v7811_v36  ;;  %v7877_v36 = vld [vmem:[%s9153_s9 + $0x124] ss:$8 sps:$4 sm:$0xff]  }
 0x3e6   : > { %3194 = vmatpush1.bf16.msra.mxu0 %v7806_v37  ;;  %v7872_v37 = vld [vmem:[%s9153_s9 + $0x20] ss:$8 sps:$4 sm:$0xff]  }
 0x3e7   : > { %3235 = vmatpush1.bf16.msra.mxu1 %v7809_v38  ;;  %3526 = vmatprep.subr.bf16.mxu0 %v7814_v39  ;;  %v7875_v38 = vld [vmem:[%s9153_s9 + $0x120] ss:$8 sps:$4 sm:$0xff]   ;;  %v7880_v39 = vld [vmem:[%s9153_s9 + $0x34] ss:$8 sps:$4 sm:$0xff]  }
 0x3e8   : > { %3567 = vmatprep.subr.bf16.mxu1 %v7817_v40  ;;  %v7883_v40 = vld [vmem:[%s9153_s9 + $0x134] ss:$8 sps:$4 sm:$0xff]  }
 0x3e9   : > { %3196 = vmatmul.mubr.bf16.vlgmr.msra.gmra.mrb[12].mxu0 %v9372_v28  ;;  %v1589_v28 = vlaneseq }
 0x3ea   : > { %3237 = vmatmul.mubr.bf16.vlgmr.msra.gmra.mrb[12].mxu1 %v9376_v29  ;;  %3527 = vmatpush1.bf16.msra.mxu0 %v7812_v41  ;;  %v7824_v29 = vld [vmem:[%s9143_s25 + $0x40] ss:$16 sps:$4 sm:$0xff]  }
 0x3eb   : > { %3568 = vmatpush1.bf16.msra.mxu1 %v7815_v42  ;;  %3528 = vmatprep.subr.bf16.mxu0 %v7820_v43  ;;  %v9533_v51 = vshrl.u32 %v1589_v28, 7  ;;  %v7878_v41 = vld [vmem:[%s9153_s9 + $0x30] ss:$8 sps:$4 sm:$0xff]   ;;  %v7886_v43 = vld [vmem:[%s9153_s9 + $0x44] ss:$8 sps:$4 sm:$0xff]  }
 0x3ec   : > { %3569 = vmatprep.subr.bf16.mxu1 %v7823_v58  ;;  %3558 = vmatprep.mubr.bf16.mxu0 %v8520_v45  ;;  %v7881_v42 = vld [vmem:[%s9153_s9 + $0x130] ss:$8 sps:$4 sm:$0xff]   ;;  %v7889_v58 = vld [vmem:[%s9153_s9 + $0x144] ss:$8 sps:$4 sm:$0xff]  }
 0x3ed   : > { %3599 = vmatprep.mubr.bf16.mxu1 %v8520_v45  ;;  %v7830_v45 = vld [vmem:[%s9143_s25 + $0x60] ss:$16 sps:$4 sm:$0xff]   ;;  %v9540_v53 = vsub.s32 0, %v9533_v51  ;;  %v9543_v54 = vsub.s32 1, %v9533_v51 }
 0x3ee   : > { %3529 = vmatpush1.bf16.msra.mxu0 %v7818_v62  ;;  %v7884_v62 = vld [vmem:[%s9153_s9 + $0x40] ss:$8 sps:$4 sm:$0xff]   ;;  %v7890_v28 = vld [vmem:[%s9153_s9 + $0x50] ss:$8 sps:$4 sm:$0xff]  }
 0x3ef   : > { %3570 = vmatpush1.bf16.msra.mxu1 %v7821_v44  ;;  %3530 = vmatprep.subr.bf16.mxu0 %v7826_v46  ;;  %v1592_v61 = vrot.slane %v9549_v57, %v9540_v53  ;;  %v1596_v63 = vrot.slane %v9549_v57, %v9543_v54  ;;  %v7887_v44 = vld [vmem:[%s9153_s9 + $0x140] ss:$8 sps:$4 sm:$0xff]   ;;  %v7892_v46 = vld [vmem:[%s9153_s9 + $0x54] ss:$8 sps:$4 sm:$0xff]  }
 0x3f0   : > { %3571 = vmatprep.subr.bf16.mxu1 %v7829_v17  ;;  %v7895_v17 = vld [vmem:[%s9153_s9 + $0x154] ss:$8 sps:$4 sm:$0xff]  }
 0x3f2   : > { %3531 = vmatpush1.bf16.msra.mxu0 %v7824_v29  ;;  %v7893_v29 = vld [vmem:[%s9153_s9 + $0x150] ss:$8 sps:$4 sm:$0xff]  }
 0x3f3   : > { %3572 = vmatpush1.bf16.msra.mxu1 %v7827_v18  ;;  %3532 = vmatprep.subr.bf16.mxu0 %v7832_v47  ;;  %v7898_v18 = vld [vmem:[%s9153_s9 + $0x64] ss:$8 sps:$4 sm:$0xff]  }
 0x3f4   : > { %3573 = vmatprep.subr.bf16.mxu1 %v7835_v50  ;;  %v7901_v47 = vld [vmem:[%s9153_s9 + $0x164] ss:$8 sps:$4 sm:$0xff]  }
 0x3f6   : > { %3533 = vmatpush1.bf16.msra.mxu0 %v7830_v45 }
 0x3f7   : > { %3574 = vmatpush1.bf16.msra.mxu1 %v7833_v52  ;;  %3534 = vmatprep.subr.bf16.mxu0 %v7838_v48  ;;  %v7896_v52 = vld [vmem:[%s9153_s9 + $0x60] ss:$8 sps:$4 sm:$0xff]  }
 0x3f8   : > { %3575 = vmatprep.subr.bf16.mxu1 %v7841_v49  ;;  %v7899_v48 = vld [vmem:[%s9153_s9 + $0x160] ss:$8 sps:$4 sm:$0xff]  }
 0x3fa   : > { %3535 = vmatpush1.bf16.msra.mxu0 %v7836_v55 }
 0x3fb   : > { %3576 = vmatpush1.bf16.msra.mxu1 %v7839_v56  ;;  %3536 = vmatprep.subr.bf16.mxu0 %v7844_v59 }
 0x3fc   : > { %3577 = vmatprep.subr.bf16.mxu1 %v7847_v60  ;;  %v2951_v4 = vpop.f32.mrb[0].mxu0 }
 0x3fd   : > { %v2992_v5 = vpop.f32.mrb[0].mxu1  ;;  %v2952_v6 = vadd.f32 %v2951_v4, %v1592_v61  ;;  %v2953_v7 = vpop.f32.mrb[1].mxu0 }
 0x3fe   : > { %v2994_v8 = vpop.f32.mrb[1].mxu1  ;;  %v2954_v9 = vadd.f32 %v2953_v7, %v1596_v63  ;;  %v2955_v10 = vpop.f32.mrb[2].mxu0  ;;  %3537 = vmatpush1.bf16.msra.mxu0 %v7842_v0  ;;  %v7910_v7 = vld [vmem:[%s9153_s9 + $0x84] ss:$8 sps:$4 sm:$0xff]  }
 0x3ff   : > { %v2996_v11 = vpop.f32.mrb[2].mxu1  ;;  %3578 = vmatpush1.bf16.msra.mxu1 %v7845_v1  ;;  %v9563_v14 = vadd.f32 %v2992_v5, %v2952_v6  ;;  %v2956_v15 = vpop.f32.mrb[3].mxu0  ;;  %3538 = vmatprep.subr.bf16.mxu0 %v7850_v2  ;;  %v7904_v2 = vld [vmem:[%s9153_s9 + $0x74] ss:$8 sps:$4 sm:$0xff]   ;;  %v7902_v5 = vld [vmem:[%s9153_s9 + $0x70] ss:$8 sps:$4 sm:$0xff]  }
 0x400   : > { %v2997_v16 = vpop.f32.mrb[3].mxu1  ;;  %3579 = vmatprep.subr.bf16.mxu1 %v7853_v3  ;;  %v9567_v21 = vadd.f32 %v2994_v8, %v2954_v9  ;;  %v7907_v3 = vld [vmem:[%s9153_s9 + $0x174] ss:$8 sps:$4 sm:$0xff]   ;;  %v7905_v6 = vld [vmem:[%s9153_s9 + $0x170] ss:$8 sps:$4 sm:$0xff]  }
 0x401   : > { %v7913_v8 = vld [vmem:[%s9153_s9 + $0x184] ss:$8 sps:$4 sm:$0xff]   ;;  %v7908_v9 = vld [vmem:[%s9153_s9 + $0x80] ss:$8 sps:$4 sm:$0xff]   ;;  %v7916_v11 = vld [vmem:[%s9153_s9 + $0x94] ss:$8 sps:$4 sm:$0xff]  }
 0x402   : > { %3539 = vmatpush1.bf16.msra.mxu0 %v7848_v12  ;;  %v7911_v10 = vld [vmem:[%s9153_s9 + $0x180] ss:$8 sps:$4 sm:$0xff]   ;;  %v7914_v12 = vld [vmem:[%s9153_s9 + $0x90] ss:$8 sps:$4 sm:$0xff]   ;;  %v7922_v15 = vld [vmem:[%s9153_s9 + $0xa4] ss:$8 sps:$4 sm:$0xff]  }
 0x403   : > { %3580 = vmatpush1.bf16.msra.mxu1 %v7851_v13  ;;  %3540 = vmatprep.subr.bf16.mxu0 %v7856_v19  ;;  %v7917_v13 = vld [vmem:[%s9153_s9 + $0x190] ss:$8 sps:$4 sm:$0xff]   ;;  %v7925_v16 = vld [vmem:[%s9153_s9 + $0x1a4] ss:$8 sps:$4 sm:$0xff]   ;;  %v7920_v19 = vld [vmem:[%s9153_s9 + $0xa0] ss:$8 sps:$4 sm:$0xff]  }
 0x404   : > { %3581 = vmatprep.subr.bf16.mxu1 %v7859_v20  ;;  %v7923_v20 = vld [vmem:[%s9153_s9 + $0x1a0] ss:$8 sps:$4 sm:$0xff]  }
 0x406   : > { %3541 = vmatpush1.bf16.msra.mxu0 %v7854_v22  ;;  %v7931_v22 = vld [vmem:[%s9153_s9 + $0x1b4] ss:$8 sps:$4 sm:$0xff]  }
 0x407   : > { %3582 = vmatpush1.bf16.msra.mxu1 %v7857_v23  ;;  %3820 = vmatprep.subr.bf16.mxu0 %v7862_v24  ;;  %v7926_v23 = vld [vmem:[%s9153_s9 + $0xb0] ss:$8 sps:$4 sm:$0xff]  }
 0x408   : > { %4078 = vmatprep.subr.bf16.mxu1 %v7865_v25  ;;  %v7929_v24 = vld [vmem:[%s9153_s9 + $0x1b0] ss:$8 sps:$4 sm:$0xff]   ;;  %v7934_v25 = vld [vmem:[%s9153_s9 + $0xc4] ss:$8 sps:$4 sm:$0xff]  }
 0x409   : > { %3559 = vmatmul.mubr.bf16.vlgmr.msra.gmra.mrb[16].mxu0 %v3311_v26 }
 0x40a   : > { %3600 = vmatmul.mubr.bf16.vlgmr.msra.gmra.mrb[16].mxu1 %v3311_v26  ;;  %3821 = vmatpush1.bf16.msra.mxu0 %v7860_v27  ;;  %v7937_v26 = vld [vmem:[%s9153_s9 + $0x1c4] ss:$8 sps:$4 sm:$0xff]   ;;  %v7932_v27 = vld [vmem:[%s9153_s9 + $0xc0] ss:$8 sps:$4 sm:$0xff]  }
 0x40b   : > { %4079 = vmatpush1.bf16.msra.mxu1 %v7863_v30  ;;  %3822 = vmatprep.subr.bf16.mxu0 %v7868_v31  ;;  %v7935_v30 = vld [vmem:[%s9153_s9 + $0x1c0] ss:$8 sps:$4 sm:$0xff]   ;;  %v7940_v31 = vld [vmem:[%s9153_s9 + $0xd4] ss:$8 sps:$4 sm:$0xff]  }
 0x40c   : > { %4080 = vmatprep.subr.bf16.mxu1 %v7871_v32  ;;  %v7943_v32 = vld [vmem:[%s9153_s9 + $0x1d4] ss:$8 sps:$4 sm:$0xff]  }
 0x40e   : > { %3823 = vmatpush1.bf16.msra.mxu0 %v7866_v33  ;;  %v7938_v33 = vld [vmem:[%s9153_s9 + $0xd0] ss:$8 sps:$4 sm:$0xff]  }
 0x40f   : > { %4081 = vmatpush1.bf16.msra.mxu1 %v7869_v34  ;;  %3824 = vmatprep.subr.bf16.mxu0 %v7874_v35  ;;  %v7941_v34 = vld [vmem:[%s9153_s9 + $0x1d0] ss:$8 sps:$4 sm:$0xff]   ;;  %v7946_v35 = vld [vmem:[%s9153_s9 + $0xe4] ss:$8 sps:$4 sm:$0xff]  }
 0x410   : > { %4082 = vmatprep.subr.bf16.mxu1 %v7877_v36  ;;  %v7949_v36 = vld [vmem:[%s9153_s9 + $0x1e4] ss:$8 sps:$4 sm:$0xff]  }
 0x412   : > { %3825 = vmatpush1.bf16.msra.mxu0 %v7872_v37  ;;  %v7944_v37 = vld [vmem:[%s9153_s9 + $0xe0] ss:$8 sps:$4 sm:$0xff]  }
 0x413   : > { %4083 = vmatpush1.bf16.msra.mxu1 %v7875_v38  ;;  %3826 = vmatprep.subr.bf16.mxu0 %v7880_v39  ;;  %v7947_v38 = vld [vmem:[%s9153_s9 + $0x1e0] ss:$8 sps:$4 sm:$0xff]   ;;  %v7952_v39 = vld [vmem:[%s9153_s9 + $0xf4] ss:$8 sps:$4 sm:$0xff]  }
 0x414   : > { %4084 = vmatprep.subr.bf16.mxu1 %v7883_v40  ;;  %v7955_v40 = vld [vmem:[%s9153_s9 + $0x1f4] ss:$8 sps:$4 sm:$0xff]  }
 0x416   : > { %3827 = vmatpush1.bf16.msra.mxu0 %v7878_v41  ;;  %v7950_v41 = vld [vmem:[%s9153_s9 + $0xf0] ss:$8 sps:$4 sm:$0xff]  }
 0x417   : > { %4085 = vmatpush1.bf16.msra.mxu1 %v7881_v42  ;;  %3828 = vmatprep.subr.bf16.mxu0 %v7886_v43  ;;  %v7953_v42 = vld [vmem:[%s9153_s9 + $0x1f0] ss:$8 sps:$4 sm:$0xff]  }
 0x418   : > { %4086 = vmatprep.subr.bf16.mxu1 %v7889_v58  ;;  %v9644_v43 = vld [vmem:[%s9196_s4] sm:$0xff] }
 0x419   : > { %v9647_v58 = vld [vmem:[%s9196_s4 + $0x20] sm:$0xff] }
 0x41a   : > { %3829 = vmatpush1.bf16.msra.mxu0 %v7884_v62  ;;  %v9650_v62 = vld [vmem:[%s9196_s4 + $0x400] sm:$0xff] }
 0x41b   : > { %4087 = vmatpush1.bf16.msra.mxu1 %v7887_v44  ;;  %3830 = vmatprep.subr.bf16.mxu0 %v7892_v46  ;;  %v6974_v44 = vcombine.low %v9644_v43, %v9647_v58  ;;  %v6975_v46 = vcombine.high %v9644_v43, %v9647_v58 }
 0x41c   : > { %4088 = vmatprep.subr.bf16.mxu1 %v7895_v17  ;;  %v9657_v17 = vld [vmem:[%s9196_s4 + $0x420] sm:$0xff] }
 0x41e   : > { %3831 = vmatpush1.bf16.msra.mxu0 %v7890_v28  ;;  %v7102_v28 = vcombine.low %v9650_v62, %v9657_v17 }
 0x41f   : > { %4089 = vmatpush1.bf16.msra.mxu1 %v7893_v29  ;;  %3832 = vmatprep.subr.bf16.mxu0 %v7898_v18  ;;  %v7103_v29 = vcombine.high %v9650_v62, %v9657_v17  ;;  %v9664_v18 = vsub.s32 2, %v9533_v51  ;;  %v4172_v17 = vld [vmem:[%s9196_s4 + $0x100] sm:$0xff] }
 0x420   : > { %4090 = vmatprep.subr.bf16.mxu1 %v7901_v47  ;;  %v9667_v47 = vsub.s32 3, %v9533_v51 }
 0x422   : > { %3833 = vmatpush1.bf16.msra.mxu0 %v7896_v52 }
 0x423   : > { %4091 = vmatpush1.bf16.msra.mxu1 %v7899_v48  ;;  %3834 = vmatprep.subr.bf16.mxu0 %v7904_v2 }
 0x424   : > { %4092 = vmatprep.subr.bf16.mxu1 %v7907_v3 }
 0x426   : > { %3835 = vmatpush1.bf16.msra.mxu0 %v7902_v5 }
 0x427   : > { %4093 = vmatpush1.bf16.msra.mxu1 %v7905_v6  ;;  %3836 = vmatprep.subr.bf16.mxu0 %v7910_v7 }
 0x428   : > { %4094 = vmatprep.subr.bf16.mxu1 %v7913_v8 }
 0x42a   : > { %3837 = vmatpush1.bf16.msra.mxu0 %v7908_v9 }
 0x42b   : > { %4095 = vmatpush1.bf16.msra.mxu1 %v7911_v10  ;;  %3838 = vmatprep.subr.bf16.mxu0 %v7916_v11 }
 0x42e   : > { %3839 = vmatpush1.bf16.msra.mxu0 %v7914_v12 }
 0x42f   : > { %3840 = vmatprep.subr.bf16.mxu0 %v7922_v15 }
 0x432   : > { %3841 = vmatpush1.bf16.msra.mxu0 %v7920_v19 }
 0x43c   : > { %v3033_v50 = vpop.f32.mrb[4].mxu0 }
 0x43d   : > { %v3074_v45 = vpop.f32.mrb[4].mxu1  ;;  %v3034_v49 = vadd.f32 %v3033_v50, %v9563_v14  ;;  %v3035_v55 = vpop.f32.mrb[5].mxu0  ;;  %v7919_v14 = vld [vmem:[%s9153_s9 + $0x194] ss:$8 sps:$4 sm:$0xff]   ;;  %v1600_v50 = vrot.slane %v9549_v57, %v9664_v18 }
 0x43e   : > { %v3076_v56 = vpop.f32.mrb[5].mxu1  ;;  %v3036_v59 = vadd.f32 %v3035_v55, %v9567_v21  ;;  %v3037_v60 = vpop.f32.mrb[6].mxu0  ;;  %4096 = vmatprep.subr.bf16.mxu1 %v7919_v14  ;;  %v7928_v21 = vld [vmem:[%s9153_s9 + $0xb4] ss:$8 sps:$4 sm:$0xff]  }
 0x43f   : > { %v3078_v61 = vpop.f32.mrb[6].mxu1  ;;  %v9603_v63 = vadd.f32 %v3074_v45, %v3034_v49  ;;  %v3038_v0 = vpop.f32.mrb[7].mxu0  ;;  %4097 = vmatpush1.bf16.msra.mxu1 %v7917_v13  ;;  %3842 = vmatprep.subr.bf16.mxu0 %v7928_v21  ;;  %v1604_v45 = vrot.slane %v9549_v57, %v9667_v47 }
 0x440   : > { %v3079_v1 = vpop.f32.mrb[7].mxu1  ;;  %v9607_v4 = vadd.f32 %v3076_v56, %v3036_v59  ;;  %4098 = vmatprep.subr.bf16.mxu1 %v7925_v16  ;;  %3843 = vmatpush1.bf16.msra.mxu0 %v7926_v23  ;;  %v3344_v16 = vld [vmem:[%s814_s3] sm:$0xf] }
 0x441   : > { %3844 = vmatprep.subr.bf16.mxu0 %v7934_v25  ;;  %v3349_v19 = vrot.slane %v3344_v16, %v9540_v53  ;;  %v3353_v21 = vrot.slane %v3344_v16, %v9543_v54 }
 0x443   : > { %4099 = vmatpush1.bf16.msra.mxu1 %v7923_v20  ;;  %v3357_v20 = vrot.slane %v3344_v16, %v9664_v18 }
 0x444   : > { %4100 = vmatprep.subr.bf16.mxu1 %v7931_v22  ;;  %3845 = vmatpush1.bf16.msra.mxu0 %v7932_v27  ;;  %v3361_v22 = vrot.slane %v3344_v16, %v9667_v47  ;;  %v4180_v16 = vld [vmem:[%s9196_s4 + $0x140] sm:$0xff] }
 0x445   : > { %3846 = vmatprep.subr.bf16.mxu0 %v7940_v31 }
 0x447   : > { %4101 = vmatpush1.bf16.msra.mxu1 %v7929_v24 }
 0x448   : > { %4102 = vmatprep.subr.bf16.mxu1 %v7937_v26  ;;  %3847 = vmatpush1.bf16.msra.mxu0 %v7938_v33 }
 0x449   : > { %3848 = vmatprep.subr.bf16.mxu0 %v7946_v35 }
 0x44b   : > { %4103 = vmatpush1.bf16.msra.mxu1 %v7935_v30 }
 0x44c   : > { %4104 = vmatprep.subr.bf16.mxu1 %v7943_v32  ;;  %3849 = vmatpush1.bf16.msra.mxu0 %v7944_v37 }
 0x44d   : > { %3850 = vmatprep.subr.bf16.mxu0 %v7952_v39  ;;  %v4148_v39 = vld [vmem:[%s9196_s4 + $0x40] sm:$0xff] }
 0x44f   : > { %4105 = vmatpush1.bf16.msra.mxu1 %v7941_v34 }
 0x450   : > { %4106 = vmatprep.subr.bf16.mxu1 %v7949_v36  ;;  %3851 = vmatpush1.bf16.msra.mxu0 %v7950_v41 }
 0x451   : > { %5690 = vmatprep.subr.bf16.mxu0 %v6975_v46  ;;  %v4276_v46 = vld [vmem:[%s9196_s4 + $0x440] sm:$0xff] }
 0x453   : > { %4107 = vmatpush1.bf16.msra.mxu1 %v7947_v38 }
 0x454   : > { %4108 = vmatprep.subr.bf16.mxu1 %v7955_v40 }
 0x457   : > { %4109 = vmatpush1.bf16.msra.mxu1 %v7953_v42  ;;  %v4152_v42 = vld [vmem:[%s9196_s4 + $0x60] sm:$0xff] }
 0x458   : > { %5731 = vmatprep.subr.bf16.mxu1 %v7103_v29  ;;  %v4280_v29 = vld [vmem:[%s9196_s4 + $0x460] sm:$0xff] }
 0x47c   : > { %v3115_v52 = vpop.f32.mrb[8].mxu0 }
 0x47d   : > { %v3156_v48 = vpop.f32.mrb[8].mxu1  ;;  %v3116_v49 = vadd.f32 %v3115_v52, %v1600_v50  ;;  %v3117_v55 = vpop.f32.mrb[9].mxu0 }
 0x47e   : > { %v3158_v56 = vpop.f32.mrb[9].mxu1  ;;  %v3118_v59 = vadd.f32 %v3117_v55, %v1604_v45  ;;  %v3119_v60 = vpop.f32.mrb[10].mxu0  ;;  %v7111_v55 = vcombine.high %v4276_v46, %v4280_v29 }
 0x47f   : > { %v3160_v61 = vpop.f32.mrb[10].mxu1  ;;  %v3157_v0 = vadd.f32 %v3156_v48, %v3116_v49  ;;  %v3120_v1 = vpop.f32.mrb[11].mxu0  ;;  %v6983_v49 = vcombine.high %v4148_v39, %v4152_v42  ;;  %v4284_v60 = vld [vmem:[%s9196_s4 + $0x480] sm:$0xff] }
 0x480   : > { %v3161_v2 = vpop.f32.mrb[11].mxu1  ;;  %v3159_v3 = vadd.f32 %v3158_v56, %v3118_v59  ;;  %v4156_v56 = vld [vmem:[%s9196_s4 + $0x80] sm:$0xff]  ;;  %v7110_v1 = vcombine.low %v4276_v46, %v4280_v29 }
 0x481   : > { %v4160_v59 = vld [vmem:[%s9196_s4 + $0xa0] sm:$0xff] }
 0x482   : > { %v4288_v61 = vld [vmem:[%s9196_s4 + $0x4a0] sm:$0xff]  ;;  %v6991_v2 = vcombine.high %v4156_v56, %v4160_v59  ;;  %v6990_v43 = vcombine.low %v4156_v56, %v4160_v59 }
 0x483   : > { %v7118_v58 = vcombine.low %v4284_v60, %v4288_v61  ;;  %v4204_v29 = vld [vmem:[%s9196_s4 + $0x200] sm:$0xff] }
 0x484   : > { %v4212_v59 = vld [vmem:[%s9196_s4 + $0x240] sm:$0xff] }
 0x4bc   : > { %v3197_v5 = vpop.f32.mrb[12].mxu0 }
 0x4bd   : > { %v3238_v6 = vpop.f32.mrb[12].mxu1  ;;  %v3198_v7 = vadd.f32 %v3197_v5, %v3157_v0  ;;  %v3199_v8 = vpop.f32.mrb[13].mxu0  ;;  %v6982_v0 = vcombine.low %v4148_v39, %v4152_v42  ;;  %v4164_v5 = vld [vmem:[%s9196_s4 + $0xc0] sm:$0xff] }
 0x4be   : > { %v3240_v9 = vpop.f32.mrb[13].mxu1  ;;  %v3200_v10 = vadd.f32 %v3199_v8, %v3159_v3  ;;  %v3201_v57 = vpop.f32.mrb[14].mxu0  ;;  %v7119_v3 = vcombine.high %v4284_v60, %v4288_v61  ;;  %v4296_v8 = vld [vmem:[%s9196_s4 + $0x4e0] sm:$0xff] }
 0x4bf   : > { %v3242_v11 = vpop.f32.mrb[14].mxu1  ;;  %v9673_v12 = vadd.f32 %v3238_v6, %v3198_v7  ;;  %v3202_v13 = vpop.f32.mrb[15].mxu0  ;;  %v4168_v6 = vld [vmem:[%s9196_s4 + $0xe0] sm:$0xff] }
 0x4c0   : > { %v3243_v14 = vpop.f32.mrb[15].mxu1  ;;  %v9675_v15 = vadd.f32 %v3240_v9, %v3200_v10  ;;  %v4292_v7 = vld [vmem:[%s9196_s4 + $0x4c0] sm:$0xff]  ;;  %v6999_v62 = vcombine.high %v4164_v5, %v4168_v6  ;;  %v6998_v57 = vcombine.low %v4164_v5, %v4168_v6 }
 0x4c1   : > { %v4300_v9 = vld [vmem:[%s9196_s4 + $0x500] sm:$0xff]  ;;  %v7126_v11 = vcombine.low %v4292_v7, %v4296_v8 }
 0x4c2   : > { %v4304_v10 = vld [vmem:[%s9196_s4 + $0x520] sm:$0xff] }
 0x4c3   : > { %v7135_v14 = vcombine.high %v4300_v9, %v4304_v10  ;;  %v4328_v39 = vld [vmem:[%s9196_s4 + $0x5e0] sm:$0xff] }
 0x4c4   : > { %v4216_v60 = vld [vmem:[%s9196_s4 + $0x260] sm:$0xff] }
 0x4c5   : > { %v4340_v61 = vld [vmem:[%s9196_s4 + $0x640] sm:$0xff] }
 0x4c6   : > { %v4220_v6 = vld [vmem:[%s9196_s4 + $0x280] sm:$0xff] }
 0x4dc   : > { %v3560_v23 = vpop.f32.mrb[16].mxu0 }
 0x4dd   : > { %v3601_v24 = vpop.f32.mrb[16].mxu1  ;;  %v3561_v25 = vadd.f32 %v3560_v23, %v3349_v19  ;;  %v3562_v27 = vpop.f32.mrb[17].mxu0  ;;  %v4184_v19 = vld [vmem:[%s9196_s4 + $0x160] sm:$0xff]  ;;  %v7134_v23 = vcombine.low %v4300_v9, %v4304_v10 }
 0x4de   : > { %v3602_v26 = vadd.f32 %v3601_v24, %v3357_v20  ;;  %v3603_v30 = vpop.f32.mrb[17].mxu1  ;;  %v3563_v31 = vadd.f32 %v3562_v27, %v3353_v21  ;;  %v3564_v33 = vpop.f32.mrb[18].mxu0  ;;  %v4308_v20 = vld [vmem:[%s9196_s4 + $0x540] sm:$0xff]  ;;  %v7015_v24 = vcombine.high %v4180_v16, %v4184_v19 }
 0x4df   : > { %v3604_v32 = vadd.f32 %v3603_v30, %v3361_v22  ;;  %v3605_v34 = vpop.f32.mrb[18].mxu1  ;;  %v3608_v35 = vmax.f32 %v3561_v25, 0.0  ;;  %v3565_v37 = vpop.f32.mrb[19].mxu0  ;;  %v4312_v21 = vld [vmem:[%s9196_s4 + $0x560] sm:$0xff] }
 0x4e0   : > { %v3610_v36 = vmax.f32 %v3602_v26, 0.0  ;;  %v3606_v38 = vpop.f32.mrb[19].mxu1  ;;  %v3609_v40 = vmax.f32 %v3563_v31, 0.0  ;;  %v7143_v25 = vcombine.high %v4308_v20, %v4312_v21  ;;  %v4188_v26 = vld [vmem:[%s9196_s4 + $0x180] sm:$0xff]  ;;  %v7142_v33 = vcombine.low %v4308_v20, %v4312_v21 }
 0x4e1   : > { %v3611_v41 = vmax.f32 %v3604_v32, 0.0  ;;  %v3612_v52 = vpack.c.bf16 %v3608_v35, %v3608_v35  ;;  %v4192_v27 = vld [vmem:[%s9196_s4 + $0x1a0] sm:$0xff]  ;;  %v7014_v32 = vcombine.low %v4180_v16, %v4184_v19 }
 0x4e2   : > { %v3613_v50 = vpack.c.bf16 %v3609_v40, %v3609_v40  ;;  %v3614_v48 = vpack.c.bf16 %v3610_v36, %v3610_v36  ;;  %v4316_v30 = vld [vmem:[%s9196_s4 + $0x580] sm:$0xff]  ;;  %v7023_v34 = vcombine.high %v4188_v26, %v4192_v27  ;;  %v7022_v40 = vcombine.low %v4188_v26, %v4192_v27 }
 0x4e3   : > { %v3615_v45 = vpack.c.bf16 %v3611_v41, %v3611_v41  ;;  %v4320_v31 = vld [vmem:[%s9196_s4 + $0x5a0] sm:$0xff] }
 0x4e4   : > { %3852 = vmatprep.mubr.bf16.mxu0 %v3613_v50  ;;  %v7151_v35 = vcombine.high %v4316_v30, %v4320_v31  ;;  %v4196_v36 = vld [vmem:[%s9196_s4 + $0x1c0] sm:$0xff]  ;;  %v7150_v41 = vcombine.low %v4316_v30, %v4320_v31 }
 0x4e5   : > { %4110 = vmatprep.mubr.bf16.mxu1 %v3615_v45  ;;  %3853 = vmatmul.mubr.bf16.vlgmr.msra.gmra.mrb[20].mxu0 %v3612_v52  ;;  %v4200_v37 = vld [vmem:[%s9196_s4 + $0x1e0] sm:$0xff] }
 0x4e6   : > { %4111 = vmatmul.mubr.bf16.vlgmr.msra.gmra.mrb[20].mxu1 %v3614_v48  ;;  %5691 = vmatpush1.bf16.msra.mxu0 %v6974_v44  ;;  %v7127_v44 = vcombine.high %v4292_v7, %v4296_v8  ;;  %v4324_v38 = vld [vmem:[%s9196_s4 + $0x5c0] sm:$0xff]  ;;  %v7031_v42 = vcombine.high %v4196_v36, %v4200_v37  ;;  %v7030_v48 = vcombine.low %v4196_v36, %v4200_v37 }
 0x4e7   : > { %5732 = vmatpush1.bf16.msra.mxu1 %v7102_v28  ;;  %5692 = vmatprep.subr.bf16.mxu0 %v6983_v49  ;;  %v4176_v28 = vld [vmem:[%s9196_s4 + $0x120] sm:$0xff]  ;;  %v7159_v46 = vcombine.high %v4324_v38, %v4328_v39  ;;  %v7158_v49 = vcombine.low %v4324_v38, %v4328_v39 }
 0x4e8   : > { %5733 = vmatprep.subr.bf16.mxu1 %v7111_v55  ;;  %v7007_v13 = vcombine.high %v4172_v17, %v4176_v28  ;;  %v7006_v22 = vcombine.low %v4172_v17, %v4176_v28  ;;  %v4208_v50 = vld [vmem:[%s9196_s4 + $0x220] sm:$0xff] }
 0x4e9   : > { %v4332_v45 = vld [vmem:[%s9196_s4 + $0x600] sm:$0xff]  ;;  %v7039_v55 = vcombine.high %v4204_v29, %v4208_v50 }
 0x4ea   : > { %5693 = vmatpush1.bf16.msra.mxu0 %v6982_v0  ;;  %v4336_v52 = vld [vmem:[%s9196_s4 + $0x620] sm:$0xff] }
 0x4eb   : > { %5734 = vmatpush1.bf16.msra.mxu1 %v7110_v1  ;;  %5694 = vmatprep.subr.bf16.mxu0 %v6991_v2  ;;  %v7167_v56 = vcombine.high %v4332_v45, %v4336_v52  ;;  %v4344_v0 = vld [vmem:[%s9196_s4 + $0x660] sm:$0xff]  ;;  %v7038_v1 = vcombine.low %v4204_v29, %v4208_v50  ;;  %v7166_v2 = vcombine.low %v4332_v45, %v4336_v52 }
 0x4ec   : > { %5735 = vmatprep.subr.bf16.mxu1 %v7119_v3  ;;  %v7047_v3 = vcombine.high %v4212_v59, %v4216_v60  ;;  %v7175_v5 = vcombine.high %v4340_v61, %v4344_v0  ;;  %v4224_v7 = vld [vmem:[%s9196_s4 + $0x2a0] sm:$0xff] }
 0x4ed   : > { %v4348_v8 = vld [vmem:[%s9196_s4 + $0x680] sm:$0xff] }
 0x4ee   : > { %5695 = vmatpush1.bf16.msra.mxu0 %v6990_v43  ;;  %v4352_v43 = vld [vmem:[%s9196_s4 + $0x6a0] sm:$0xff] }
 0x4ef   : > { %5736 = vmatpush1.bf16.msra.mxu1 %v7118_v58  ;;  %5696 = vmatprep.subr.bf16.mxu0 %v6999_v62  ;;  %v7046_v58 = vcombine.low %v4212_v59, %v4216_v60  ;;  %v7174_v62 = vcombine.low %v4340_v61, %v4344_v0  ;;  %v7183_v17 = vcombine.high %v4348_v8, %v4352_v43  ;;  %v4228_v28 = vld [vmem:[%s9196_s4 + $0x2c0] sm:$0xff]  ;;  %v9750_v0 = vld [vmem:[%s9196_s4 + $0x8] sm:$0xff] }
 0x4f0   : > { %5737 = vmatprep.subr.bf16.mxu1 %v7127_v44  ;;  %v7055_v44 = vcombine.high %v4220_v6, %v4224_v7  ;;  %v4232_v9 = vld [vmem:[%s9196_s4 + $0x2e0] sm:$0xff] }
 0x4f1   : > { %v4356_v10 = vld [vmem:[%s9196_s4 + $0x6c0] sm:$0xff] }
 0x4f2   : > { %5697 = vmatpush1.bf16.msra.mxu0 %v6998_v57  ;;  %v4360_v57 = vld [vmem:[%s9196_s4 + $0x6e0] sm:$0xff] }
 0x4f3   : > { %5738 = vmatpush1.bf16.msra.mxu1 %v7126_v11  ;;  %5698 = vmatprep.subr.bf16.mxu0 %v7007_v13  ;;  %v7054_v11 = vcombine.low %v4220_v6, %v4224_v7  ;;  %v7182_v13 = vcombine.low %v4348_v8, %v4352_v43  ;;  %v7191_v16 = vcombine.high %v4356_v10, %v4360_v57  ;;  %v4236_v19 = vld [vmem:[%s9196_s4 + $0x300] sm:$0xff]  ;;  %v3246_v43 = vld [vmem:[%s871_s5] sm:$0xf] }
 0x4f4   : > { %5739 = vmatprep.subr.bf16.mxu1 %v7135_v14  ;;  %v7063_v14 = vcombine.high %v4228_v28, %v4232_v9  ;;  %v4240_v20 = vld [vmem:[%s9196_s4 + $0x320] sm:$0xff] }
 0x4f5   : > { %v4364_v21 = vld [vmem:[%s9196_s4 + $0x700] sm:$0xff] }
 0x4f6   : > { %5699 = vmatpush1.bf16.msra.mxu0 %v7006_v22  ;;  %v4368_v22 = vld [vmem:[%s9196_s4 + $0x720] sm:$0xff] }
 0x4f7   : > { %5740 = vmatpush1.bf16.msra.mxu1 %v7134_v23  ;;  %5700 = vmatprep.subr.bf16.mxu0 %v7015_v24  ;;  %v7062_v23 = vcombine.low %v4228_v28, %v4232_v9  ;;  %v7190_v24 = vcombine.low %v4356_v10, %v4360_v57  ;;  %v7199_v26 = vcombine.high %v4364_v21, %v4368_v22  ;;  %v4244_v27 = vld [vmem:[%s9196_s4 + $0x340] sm:$0xff]  ;;  %v3277_v9 = vld [vmem:[%s880_s28] sm:$0xf] }
 0x4f8   : > { %5741 = vmatprep.subr.bf16.mxu1 %v7143_v25  ;;  %v7071_v25 = vcombine.high %v4236_v19, %v4240_v20  ;;  %v4248_v30 = vld [vmem:[%s9196_s4 + $0x360] sm:$0xff]  ;;  %v3268_v28 = vrot.slane %v3246_v43, %v9667_v47 }
 0x4f9   : > { %v4372_v31 = vld [vmem:[%s9196_s4 + $0x740] sm:$0xff]  ;;  %v7078_v37 = vcombine.low %v4244_v27, %v4248_v30 }
 0x4fa   : > { %5701 = vmatpush1.bf16.msra.mxu0 %v7014_v32  ;;  %v4376_v32 = vld [vmem:[%s9196_s4 + $0x760] sm:$0xff] }
 0x4fb   : > { %5742 = vmatpush1.bf16.msra.mxu1 %v7142_v33  ;;  %5702 = vmatprep.subr.bf16.mxu0 %v7023_v34  ;;  %v7070_v33 = vcombine.low %v4236_v19, %v4240_v20  ;;  %v7198_v34 = vcombine.low %v4364_v21, %v4368_v22  ;;  %v7207_v36 = vcombine.high %v4372_v31, %v4376_v32  ;;  %v4252_v39 = vld [vmem:[%s9196_s4 + $0x380] sm:$0xff] }
 0x4fc   : > { %5743 = vmatprep.subr.bf16.mxu1 %v7151_v35  ;;  %v7079_v35 = vcombine.high %v4244_v27, %v4248_v30  ;;  %v7206_v38 = vcombine.low %v4372_v31, %v4376_v32  ;;  %v4260_v52 = vld [vmem:[%s9196_s4 + $0x3c0] sm:$0xff]  ;;  %v3286_v19 = vrot.slane %v3277_v9, %v9543_v54  ;;  %v3294_v20 = vrot.slane %v3277_v9, %v9667_v47 }
 0x4fe   : > { %5703 = vmatpush1.bf16.msra.mxu0 %v7022_v40  ;;  %v4256_v40 = vld [vmem:[%s9196_s4 + $0x3a0] sm:$0xff] }
 0x4ff   : > { %5744 = vmatpush1.bf16.msra.mxu1 %v7150_v41  ;;  %5704 = vmatprep.subr.bf16.mxu0 %v7031_v42  ;;  %v4380_v41 = vld [vmem:[%s9196_s4 + $0x780] sm:$0xff]  ;;  %v7087_v42 = vcombine.high %v4252_v39, %v4256_v40  ;;  %v7086_v29 = vcombine.low %v4252_v39, %v4256_v40 }
 0x500   : > { %5745 = vmatprep.subr.bf16.mxu1 %v7159_v46  ;;  %v4384_v46 = vld [vmem:[%s9196_s4 + $0x7a0] sm:$0xff] }
 0x501   : > { %v7214_v50 = vcombine.low %v4380_v41, %v4384_v46  ;;  %v7215_v45 = vcombine.high %v4380_v41, %v4384_v46 }
 0x502   : > { %5705 = vmatpush1.bf16.msra.mxu0 %v7030_v48  ;;  %v4264_v48 = vld [vmem:[%s9196_s4 + $0x3e0] sm:$0xff] }
 0x503   : > { %5746 = vmatpush1.bf16.msra.mxu1 %v7158_v49  ;;  %5706 = vmatprep.subr.bf16.mxu0 %v7039_v55  ;;  %v4388_v49 = vld [vmem:[%s9196_s4 + $0x7c0] sm:$0xff]  ;;  %v7095_v55 = vcombine.high %v4260_v52, %v4264_v48  ;;  %v7094_v59 = vcombine.low %v4260_v52, %v4264_v48 }
 0x504   : > { %5747 = vmatprep.subr.bf16.mxu1 %v7167_v56  ;;  %v4392_v56 = vld [vmem:[%s9196_s4 + $0x7e0] sm:$0xff] }
 0x505   : > { %v7222_v60 = vcombine.low %v4388_v49, %v4392_v56  ;;  %v7223_v61 = vcombine.high %v4388_v49, %v4392_v56 }
 0x506   : > { %5707 = vmatpush1.bf16.msra.mxu0 %v7038_v1  ;;  %v9753_v1 = vld [vmem:[%s9196_s4 + $0x28] sm:$0xff] }
 0x507   : > { %5748 = vmatpush1.bf16.msra.mxu1 %v7166_v2  ;;  %5708 = vmatprep.subr.bf16.mxu0 %v7047_v3  ;;  %v9756_v2 = vld [vmem:[%s9196_s4 + $0x408] sm:$0xff]  ;;  %v6977_v3 = vcombine.high %v9750_v0, %v9753_v1  ;;  %v6976_v6 = vcombine.low %v9750_v0, %v9753_v1 }
 0x508   : > { %5749 = vmatprep.subr.bf16.mxu1 %v7175_v5  ;;  %v9761_v5 = vld [vmem:[%s9196_s4 + $0x428] sm:$0xff] }
 0x509   : > { %v7104_v7 = vcombine.low %v9756_v2, %v9761_v5  ;;  %v7105_v8 = vcombine.high %v9756_v2, %v9761_v5  ;;  %v4169_v0 = vld [vmem:[%s9196_s4 + $0xe8] sm:$0xff] }
 0x50a   : > { %5709 = vmatpush1.bf16.msra.mxu0 %v7046_v58  ;;  %v3256_v58 = vrot.slane %v3246_v43, %v9540_v53  ;;  %v4293_v1 = vld [vmem:[%s9196_s4 + $0x4c8] sm:$0xff] }
 0x50b   : > { %5750 = vmatpush1.bf16.msra.mxu1 %v7174_v62  ;;  %5710 = vmatprep.subr.bf16.mxu0 %v7055_v44  ;;  %v3264_v62 = vrot.slane %v3246_v43, %v9664_v18  ;;  %v3250_v44 = vpop.permute.xlu0 %3249 }
 0x50c   : > { %5751 = vmatprep.subr.bf16.mxu1 %v7183_v17  ;;  %v3260_v17 = vrot.slane %v3246_v43, %v9543_v54  ;;  %v3273_v10 = vmul.f32 %v3256_v58, %v3250_v44 }
 0x50d   : > { %v3275_v57 = vmul.f32 %v3264_v62, %v3250_v44 }
 0x50e   : > { %5711 = vmatpush1.bf16.msra.mxu0 %v7054_v11  ;;  %v3282_v11 = vrot.slane %v3277_v9, %v9540_v53 }
 0x50f   : > { %5752 = vmatpush1.bf16.msra.mxu1 %v7182_v13  ;;  %5712 = vmatprep.subr.bf16.mxu0 %v7063_v14  ;;  %v3290_v13 = vrot.slane %v3277_v9, %v9664_v18  ;;  %v3274_v14 = vmul.f32 %v3260_v17, %v3250_v44  ;;  %v4157_v17 = vld [vmem:[%s9196_s4 + $0x88] sm:$0xff] }
 0x510   : > { %5753 = vmatprep.subr.bf16.mxu1 %v7191_v16  ;;  %v3276_v16 = vmul.f32 %v3268_v28, %v3250_v44  ;;  %v3299_v21 = vadd.f32 %v3282_v11, %v3273_v10  ;;  %v4161_v10 = vld [vmem:[%s9196_s4 + $0xa8] sm:$0xff] }
 0x511   : > { %v3301_v22 = vadd.f32 %v3290_v13, %v3275_v57  ;;  %v4285_v57 = vld [vmem:[%s9196_s4 + $0x488] sm:$0xff]  ;;  %v6992_v2 = vcombine.low %v4157_v17, %v4161_v10 }
 0x512   : > { %5713 = vmatpush1.bf16.msra.mxu0 %v7062_v23  ;;  %v3300_v23 = vadd.f32 %v3286_v19, %v3274_v14  ;;  %v3303_v27 = vadd.f32 %v3299_v21, %v9603_v63  ;;  %v4289_v11 = vld [vmem:[%s9196_s4 + $0x4a8] sm:$0xff] }
 0x513   : > { %5754 = vmatpush1.bf16.msra.mxu1 %v7190_v24  ;;  %5714 = vmatprep.subr.bf16.mxu0 %v7071_v25  ;;  %v3302_v24 = vadd.f32 %v3294_v20, %v3276_v16  ;;  %v3648_v25 = vld [vmem:[%s832_s24] sm:$0x3]  ;;  %v3305_v30 = vadd.f32 %v3301_v22, %v9673_v12  ;;  %v6993_v16 = vcombine.high %v4157_v17, %v4161_v10  ;;  %v4165_v20 = vld [vmem:[%s9196_s4 + $0xc8] sm:$0xff] }
 0x514   : > { %5755 = vmatprep.subr.bf16.mxu1 %v7199_v26  ;;  %v6936_v26 = vld [vmem:[%s832_s24 + $0x2] sm:$0x3]  ;;  %v3653_v31 = vrot.slane %v3648_v25, %v9540_v53  ;;  %v3307_v39 = vmul.f32 2.0, %v3303_v27  ;;  %v7121_v19 = vcombine.high %v4285_v57, %v4289_v11  ;;  %v7120_v5 = vcombine.low %v4285_v57, %v4289_v11  ;;  %v4173_v22 = vld [vmem:[%s9196_s4 + $0x108] sm:$0xff] }
 0x515   : > { %v3911_v32 = vrot.slane %v6936_v26, %v9540_v53  ;;  %v3309_v40 = vmul.f32 2.0, %v3305_v30  ;;  %v4213_v10 = vld [vmem:[%s9196_s4 + $0x248] sm:$0xff] }
 0x516   : > { %5715 = vmatpush1.bf16.msra.mxu0 %v7070_v33  ;;  %v3304_v33 = vadd.f32 %v3300_v23, %v9607_v4  ;;  %v4177_v23 = vld [vmem:[%s9196_s4 + $0x128] sm:$0xff] }
 0x517   : > { %5756 = vmatpush1.bf16.msra.mxu1 %v7198_v34  ;;  %5716 = vmatprep.subr.bf16.mxu0 %v7079_v35  ;;  %v3306_v34 = vadd.f32 %v3302_v24, %v9675_v15  ;;  %v3657_v35 = vrot.slane %v3648_v25, %v9543_v54  ;;  %v4301_v24 = vld [vmem:[%s9196_s4 + $0x508] sm:$0xff]  ;;  %v7009_v30 = vcombine.high %v4173_v22, %v4177_v23 }
 0x518   : > { %5757 = vmatprep.subr.bf16.mxu1 %v7207_v36  ;;  %v3915_v36 = vrot.slane %v6936_v26, %v9543_v54  ;;  %v3308_v46 = vmul.f32 2.0, %v3304_v33  ;;  %v4305_v25 = vld [vmem:[%s9196_s4 + $0x528] sm:$0xff]  ;;  %v7000_v26 = vcombine.low %v4165_v20, %v4169_v0 }
 0x519   : > { %v3310_v4 = vmul.f32 2.0, %v3306_v34  ;;  %v4185_v33 = vld [vmem:[%s9196_s4 + $0x168] sm:$0xff] }
 0x51a   : > { %5717 = vmatpush1.bf16.msra.mxu0 %v7078_v37  ;;  %v4309_v34 = vld [vmem:[%s9196_s4 + $0x548] sm:$0xff] }
 0x51b   : > { %5758 = vmatpush1.bf16.msra.mxu1 %v7206_v38  ;;  %5718 = vmatprep.subr.bf16.mxu0 %v7087_v42  ;;  %v4217_v57 = vld [vmem:[%s9196_s4 + $0x268] sm:$0xff] }
 0x51c   : > { %5759 = vmatprep.subr.bf16.mxu1 %v7215_v45  ;;  %v4341_v11 = vld [vmem:[%s9196_s4 + $0x648] sm:$0xff] }
 0x51e   : > { %5719 = vmatpush1.bf16.msra.mxu0 %v7086_v29 }
 0x51f   : > { %5760 = vmatpush1.bf16.msra.mxu1 %v7214_v50  ;;  %5720 = vmatprep.subr.bf16.mxu0 %v7095_v55 }
 0x520   : > { %5761 = vmatprep.subr.bf16.mxu1 %v7223_v61  ;;  %v4153_v61 = vld [vmem:[%s9196_s4 + $0x68] sm:$0xff] }
 0x522   : > { %5721 = vmatpush1.bf16.msra.mxu0 %v7094_v59 }
 0x523   : > { %5762 = vmatpush1.bf16.msra.mxu1 %v7222_v60  ;;  %5772 = vmatprep.subr.bf16.mxu0 %v6977_v3  ;;  %v4149_v60 = vld [vmem:[%s9196_s4 + $0x48] sm:$0xff] }
 0x524   : > { %5813 = vmatprep.subr.bf16.mxu1 %v7105_v8  ;;  %v4277_v3 = vld [vmem:[%s9196_s4 + $0x448] sm:$0xff]  ;;  %v6985_v28 = vcombine.high %v4149_v60, %v4153_v61  ;;  %v6984_v13 = vcombine.low %v4149_v60, %v4153_v61 }
 0x525   : > { %v4281_v8 = vld [vmem:[%s9196_s4 + $0x468] sm:$0xff] }
 0x526   : > { %v7113_v9 = vcombine.high %v4277_v3, %v4281_v8  ;;  %v7112_v14 = vcombine.low %v4277_v3, %v4281_v8  ;;  %v4209_v60 = vld [vmem:[%s9196_s4 + $0x228] sm:$0xff] }
 0x527   : > { %v4333_v61 = vld [vmem:[%s9196_s4 + $0x608] sm:$0xff] }
 0x528   : > { %v4337_v3 = vld [vmem:[%s9196_s4 + $0x628] sm:$0xff] }
 0x5b8   : > { %v3854_v37 = vpop.f32.mrb[20].mxu0 }
 0x5b9   : > { %v4112_v38 = vpop.f32.mrb[20].mxu1  ;;  %v3855_v41 = vadd.f32 %v3854_v37, %v3653_v31  ;;  %v3856_v12 = vpop.f32.mrb[21].mxu0  ;;  %v7137_v31 = vcombine.high %v4301_v24, %v4305_v25  ;;  %v7136_v37 = vcombine.low %v4301_v24, %v4305_v25  ;;  %v4233_v24 = vld [vmem:[%s9196_s4 + $0x2e8] sm:$0xff] }
 0x5ba   : > { %v4113_v63 = vadd.f32 %v4112_v38, %v3911_v32  ;;  %v4114_v42 = vpop.f32.mrb[21].mxu1  ;;  %v3857_v29 = vadd.f32 %v3856_v12, %v3657_v35  ;;  %v3858_v50 = vpop.f32.mrb[22].mxu0  ;;  %v4181_v32 = vld [vmem:[%s9196_s4 + $0x148] sm:$0xff] }
 0x5bb   : > { %v4115_v15 = vadd.f32 %v4114_v42, %v3915_v36  ;;  %v4116_v45 = vpop.f32.mrb[22].mxu1  ;;  %v3861_v52 = vadd.f32 %v3855_v41, %v3307_v39  ;;  %v3859_v49 = vpop.f32.mrb[23].mxu0  ;;  %v4313_v35 = vld [vmem:[%s9196_s4 + $0x568] sm:$0xff]  ;;  %v7008_v36 = vcombine.low %v4173_v22, %v4177_v23  ;;  %v7017_v38 = vcombine.high %v4181_v32, %v4185_v33 }
 0x5bc   : > { %v4119_v48 = vadd.f32 %v4113_v63, %v3309_v40  ;;  %v4117_v55 = vpop.f32.mrb[23].mxu1  ;;  %v3862_v56 = vadd.f32 %v3857_v29, %v3308_v46  ;;  %v7145_v39 = vcombine.high %v4309_v34, %v4313_v35  ;;  %v4189_v40 = vld [vmem:[%s9196_s4 + $0x188] sm:$0xff]  ;;  %v7016_v42 = vcombine.low %v4181_v32, %v4185_v33 }
 0x5bd   : > { %v4120_v59 = vadd.f32 %v4115_v15, %v3310_v4  ;;  %v9801_v62 = vpack.c.bf16 %v3861_v52, %v3861_v52  ;;  %v4193_v41 = vld [vmem:[%s9196_s4 + $0x1a8] sm:$0xff]  ;;  %v7144_v46 = vcombine.low %v4309_v34, %v4313_v35 }
 0x5be   : > { %v9797_v43 = vpack.c.bf16 %v3862_v56, %v3862_v56  ;;  %v9803_v44 = vpack.c.bf16 %v4119_v48, %v4119_v48  ;;  %v4317_v63 = vld [vmem:[%s9196_s4 + $0x588] sm:$0xff]  ;;  %v7025_v4 = vcombine.high %v4189_v40, %v4193_v41  ;;  %v7024_v48 = vcombine.low %v4189_v40, %v4193_v41 }
 0x5bf   : > { %v9799_v58 = vpack.c.bf16 %v4120_v59, %v4120_v59  ;;  %v4321_v12 = vld [vmem:[%s9196_s4 + $0x5a8] sm:$0xff] }
 0x5c0   : > { %5722 = vmatprep.mubr.bf16.mxu0 %v9797_v43  ;;  %v7153_v29 = vcombine.high %v4317_v63, %v4321_v12  ;;  %v4197_v15 = vld [vmem:[%s9196_s4 + $0x1c8] sm:$0xff]  ;;  %v7152_v49 = vcombine.low %v4317_v63, %v4321_v12 }
 0x5c1   : > { %5763 = vmatprep.mubr.bf16.mxu1 %v9799_v58  ;;  %5723 = vmatmul.mubr.bf16.vlgmr.msra.gmra.mrb[24].mxu0 %v9801_v62  ;;  %v4201_v50 = vld [vmem:[%s9196_s4 + $0x1e8] sm:$0xff] }
 0x5c2   : > { %5764 = vmatmul.mubr.bf16.vlgmr.msra.gmra.mrb[24].mxu1 %v9803_v44  ;;  %5773 = vmatpush1.bf16.msra.mxu0 %v6976_v6  ;;  %v4297_v6 = vld [vmem:[%s9196_s4 + $0x4e8] sm:$0xff]  ;;  %v7033_v55 = vcombine.high %v4197_v15, %v4201_v50  ;;  %v7032_v8 = vcombine.low %v4197_v15, %v4201_v50 }
 0x5c3   : > { %5814 = vmatpush1.bf16.msra.mxu1 %v7104_v7  ;;  %5804 = vmatprep.mubr.bf16.mxu0 %v9797_v43  ;;  %v7001_v7 = vcombine.high %v4165_v20, %v4169_v0  ;;  %v7129_v21 = vcombine.high %v4293_v1, %v4297_v6  ;;  %v7128_v27 = vcombine.low %v4293_v1, %v4297_v6  ;;  %v4325_v45 = vld [vmem:[%s9196_s4 + $0x5c8] sm:$0xff] }
 0x5c4   : > { %5845 = vmatprep.mubr.bf16.mxu1 %v9799_v58  ;;  %5774 = vmatprep.subr.bf16.mxu0 %v6985_v28  ;;  %v4329_v52 = vld [vmem:[%s9196_s4 + $0x5e8] sm:$0xff] }
 0x5c5   : > { %5815 = vmatprep.subr.bf16.mxu1 %v7113_v9  ;;  %v7161_v56 = vcombine.high %v4325_v45, %v4329_v52  ;;  %v4205_v59 = vld [vmem:[%s9196_s4 + $0x208] sm:$0xff]  ;;  %v7160_v17 = vcombine.low %v4325_v45, %v4329_v52  ;;  %v7169_v9 = vcombine.high %v4333_v61, %v4337_v3 }
 0x5c6   : > { %5775 = vmatpush1.bf16.msra.mxu0 %v6984_v13  ;;  %v7041_v28 = vcombine.high %v4205_v59, %v4209_v60  ;;  %v4345_v13 = vld [vmem:[%s9196_s4 + $0x668] sm:$0xff] }
 0x5c7   : > { %5816 = vmatpush1.bf16.msra.mxu1 %v7112_v14  ;;  %5776 = vmatprep.subr.bf16.mxu0 %v6993_v16  ;;  %v7040_v14 = vcombine.low %v4205_v59, %v4209_v60  ;;  %v7168_v16 = vcombine.low %v4333_v61, %v4337_v3  ;;  %v7177_v20 = vcombine.high %v4341_v11, %v4345_v13  ;;  %v4221_v0 = vld [vmem:[%s9196_s4 + $0x288] sm:$0xff] }
 0x5c8   : > { %5817 = vmatprep.subr.bf16.mxu1 %v7121_v19  ;;  %v7049_v19 = vcombine.high %v4213_v10, %v4217_v57  ;;  %v4225_v1 = vld [vmem:[%s9196_s4 + $0x2a8] sm:$0xff] }
 0x5c9   : > { %v4349_v6 = vld [vmem:[%s9196_s4 + $0x688] sm:$0xff] }
 0x5ca   : > { %5777 = vmatpush1.bf16.msra.mxu0 %v6992_v2  ;;  %v4353_v2 = vld [vmem:[%s9196_s4 + $0x6a8] sm:$0xff] }
 0x5cb   : > { %5818 = vmatpush1.bf16.msra.mxu1 %v7120_v5  ;;  %5778 = vmatprep.subr.bf16.mxu0 %v7001_v7  ;;  %v7048_v5 = vcombine.low %v4213_v10, %v4217_v57  ;;  %v7176_v7 = vcombine.low %v4341_v11, %v4345_v13  ;;  %v7185_v22 = vcombine.high %v4349_v6, %v4353_v2  ;;  %v4229_v23 = vld [vmem:[%s9196_s4 + $0x2c8] sm:$0xff]  ;;  %v4142_v57 = vld [vmem:[%s9196_s4 + $0x10] sm:$0xff] }
 0x5cc   : > { %5819 = vmatprep.subr.bf16.mxu1 %v7129_v21  ;;  %v7057_v21 = vcombine.high %v4221_v0, %v4225_v1  ;;  %v4357_v25 = vld [vmem:[%s9196_s4 + $0x6c8] sm:$0xff]  ;;  %v4146_v11 = vld [vmem:[%s9196_s4 + $0x30] sm:$0xff] }
 0x5cd   : > { %v4237_v33 = vld [vmem:[%s9196_s4 + $0x308] sm:$0xff]  ;;  %v4270_v13 = vld [vmem:[%s9196_s4 + $0x410] sm:$0xff] }
 0x5ce   : > { %5779 = vmatpush1.bf16.msra.mxu0 %v7000_v26  ;;  %v4361_v26 = vld [vmem:[%s9196_s4 + $0x6e8] sm:$0xff] }
 0x5cf   : > { %5820 = vmatpush1.bf16.msra.mxu1 %v7128_v27  ;;  %5780 = vmatprep.subr.bf16.mxu0 %v7009_v30  ;;  %v7056_v27 = vcombine.low %v4221_v0, %v4225_v1  ;;  %v7184_v30 = vcombine.low %v4349_v6, %v4353_v2  ;;  %v7193_v32 = vcombine.high %v4357_v25, %v4361_v26  ;;  %v4241_v34 = vld [vmem:[%s9196_s4 + $0x328] sm:$0xff]  ;;  %v4150_v1 = vld [vmem:[%s9196_s4 + $0x50] sm:$0xff] }
 0x5d0   : > { %5821 = vmatprep.subr.bf16.mxu1 %v7137_v31  ;;  %v7065_v31 = vcombine.high %v4229_v23, %v4233_v24  ;;  %v4365_v35 = vld [vmem:[%s9196_s4 + $0x708] sm:$0xff]  ;;  %v4154_v6 = vld [vmem:[%s9196_s4 + $0x70] sm:$0xff] }
 0x5d1   : > { %v4245_v41 = vld [vmem:[%s9196_s4 + $0x348] sm:$0xff]  ;;  %v4278_v2 = vld [vmem:[%s9196_s4 + $0x450] sm:$0xff] }
 0x5d2   : > { %5781 = vmatpush1.bf16.msra.mxu0 %v7008_v36  ;;  %v4369_v36 = vld [vmem:[%s9196_s4 + $0x728] sm:$0xff] }
 0x5d3   : > { %5822 = vmatpush1.bf16.msra.mxu1 %v7136_v37  ;;  %5782 = vmatprep.subr.bf16.mxu0 %v7017_v38  ;;  %v7064_v37 = vcombine.low %v4229_v23, %v4233_v24  ;;  %v7192_v38 = vcombine.low %v4357_v25, %v4361_v26  ;;  %v7201_v40 = vcombine.high %v4365_v35, %v4369_v36  ;;  %v4249_v63 = vld [vmem:[%s9196_s4 + $0x368] sm:$0xff]  ;;  %v4158_v24 = vld [vmem:[%s9196_s4 + $0x90] sm:$0xff] }
 0x5d4   : > { %5823 = vmatprep.subr.bf16.mxu1 %v7145_v39  ;;  %v7073_v39 = vcombine.high %v4237_v33, %v4241_v34  ;;  %v4373_v12 = vld [vmem:[%s9196_s4 + $0x748] sm:$0xff]  ;;  %v4162_v25 = vld [vmem:[%s9196_s4 + $0xb0] sm:$0xff] }
 0x5d5   : > { %v4253_v50 = vld [vmem:[%s9196_s4 + $0x388] sm:$0xff]  ;;  %v4286_v26 = vld [vmem:[%s9196_s4 + $0x490] sm:$0xff] }
 0x5d6   : > { %5783 = vmatpush1.bf16.msra.mxu0 %v7016_v42  ;;  %v4377_v42 = vld [vmem:[%s9196_s4 + $0x768] sm:$0xff] }
 0x5d7   : > { %5824 = vmatpush1.bf16.msra.mxu1 %v7144_v46  ;;  %5784 = vmatprep.subr.bf16.mxu0 %v7025_v4  ;;  %v7072_v46 = vcombine.low %v4237_v33, %v4241_v34  ;;  %v7200_v4 = vcombine.low %v4365_v35, %v4369_v36  ;;  %v7209_v15 = vcombine.high %v4373_v12, %v4377_v42  ;;  %v4257_v45 = vld [vmem:[%s9196_s4 + $0x3a8] sm:$0xff]  ;;  %v4166_v34 = vld [vmem:[%s9196_s4 + $0xd0] sm:$0xff] }
 0x5d8   : > { %5825 = vmatprep.subr.bf16.mxu1 %v7153_v29  ;;  %v7081_v29 = vcombine.high %v4245_v41, %v4249_v63  ;;  %v4381_v52 = vld [vmem:[%s9196_s4 + $0x788] sm:$0xff]  ;;  %v4170_v35 = vld [vmem:[%s9196_s4 + $0xf0] sm:$0xff] }
 0x5d9   : > { %v4261_v60 = vld [vmem:[%s9196_s4 + $0x3c8] sm:$0xff]  ;;  %v4294_v36 = vld [vmem:[%s9196_s4 + $0x4d0] sm:$0xff] }
 0x5da   : > { %5785 = vmatpush1.bf16.msra.mxu0 %v7024_v48  ;;  %v4385_v48 = vld [vmem:[%s9196_s4 + $0x7a8] sm:$0xff] }
 0x5db   : > { %5826 = vmatpush1.bf16.msra.mxu1 %v7152_v49  ;;  %5786 = vmatprep.subr.bf16.mxu0 %v7033_v55  ;;  %v7080_v49 = vcombine.low %v4245_v41, %v4249_v63  ;;  %v7208_v55 = vcombine.low %v4373_v12, %v4377_v42  ;;  %v7217_v59 = vcombine.high %v4381_v52, %v4385_v48  ;;  %v4265_v61 = vld [vmem:[%s9196_s4 + $0x3e8] sm:$0xff]  ;;  %v4174_v63 = vld [vmem:[%s9196_s4 + $0x110] sm:$0xff] }
 0x5dc   : > { %5827 = vmatprep.subr.bf16.mxu1 %v7161_v56  ;;  %v7089_v56 = vcombine.high %v4253_v50, %v4257_v45  ;;  %v4389_v3 = vld [vmem:[%s9196_s4 + $0x7c8] sm:$0xff]  ;;  %v4178_v12 = vld [vmem:[%s9196_s4 + $0x130] sm:$0xff] }
 0x5dd   : > { %v4302_v42 = vld [vmem:[%s9196_s4 + $0x510] sm:$0xff] }
 0x5de   : > { %5787 = vmatpush1.bf16.msra.mxu0 %v7032_v8  ;;  %v4393_v8 = vld [vmem:[%s9196_s4 + $0x7e8] sm:$0xff] }
 0x5df   : > { %5828 = vmatpush1.bf16.msra.mxu1 %v7160_v17  ;;  %5788 = vmatprep.subr.bf16.mxu0 %v7041_v28  ;;  %v7088_v17 = vcombine.low %v4253_v50, %v4257_v45  ;;  %v7216_v28 = vcombine.low %v4381_v52, %v4385_v48  ;;  %v7225_v10 = vcombine.high %v4389_v3, %v4393_v8  ;;  %v4182_v45 = vld [vmem:[%s9196_s4 + $0x150] sm:$0xff] }
 0x5e0   : > { %5829 = vmatprep.subr.bf16.mxu1 %v7169_v9  ;;  %v7097_v9 = vcombine.high %v4261_v60, %v4265_v61  ;;  %v4186_v52 = vld [vmem:[%s9196_s4 + $0x170] sm:$0xff] }
 0x5e1   : > { %v4310_v48 = vld [vmem:[%s9196_s4 + $0x550] sm:$0xff] }
 0x5e2   : > { %5789 = vmatpush1.bf16.msra.mxu0 %v7040_v14  ;;  %v4274_v14 = vld [vmem:[%s9196_s4 + $0x430] sm:$0xff] }
 0x5e3   : > { %5830 = vmatpush1.bf16.msra.mxu1 %v7168_v16  ;;  %5790 = vmatprep.subr.bf16.mxu0 %v7049_v19  ;;  %v7096_v16 = vcombine.low %v4261_v60, %v4265_v61  ;;  %v7224_v19 = vcombine.low %v4389_v3, %v4393_v8  ;;  %v7107_v0 = vcombine.high %v4270_v13, %v4274_v14  ;;  %v4190_v61 = vld [vmem:[%s9196_s4 + $0x190] sm:$0xff] }
 0x5e4   : > { %5831 = vmatprep.subr.bf16.mxu1 %v7177_v20  ;;  %v6979_v20 = vcombine.high %v4142_v57, %v4146_v11  ;;  %v4194_v3 = vld [vmem:[%s9196_s4 + $0x1b0] sm:$0xff] }
 0x5e5   : > { %v4318_v8 = vld [vmem:[%s9196_s4 + $0x590] sm:$0xff] }
 0x5e6   : > { %5791 = vmatpush1.bf16.msra.mxu0 %v7048_v5  ;;  %v4282_v5 = vld [vmem:[%s9196_s4 + $0x470] sm:$0xff] }
 0x5e7   : > { %5832 = vmatpush1.bf16.msra.mxu1 %v7176_v7  ;;  %5792 = vmatprep.subr.bf16.mxu0 %v7057_v21  ;;  %v6978_v7 = vcombine.low %v4142_v57, %v4146_v11  ;;  %v7106_v21 = vcombine.low %v4270_v13, %v4274_v14  ;;  %v7115_v23 = vcombine.high %v4278_v2, %v4282_v5  ;;  %v4198_v11 = vld [vmem:[%s9196_s4 + $0x1d0] sm:$0xff] }
 0x5e8   : > { %5833 = vmatprep.subr.bf16.mxu1 %v7185_v22  ;;  %v6987_v22 = vcombine.high %v4150_v1, %v4154_v6  ;;  %v4202_v13 = vld [vmem:[%s9196_s4 + $0x1f0] sm:$0xff] }
 0x5e9   : > { %v4326_v14 = vld [vmem:[%s9196_s4 + $0x5d0] sm:$0xff] }
 0x5ea   : > { %5793 = vmatpush1.bf16.msra.mxu0 %v7056_v27  ;;  %v4290_v27 = vld [vmem:[%s9196_s4 + $0x4b0] sm:$0xff] }
 0x5eb   : > { %5834 = vmatpush1.bf16.msra.mxu1 %v7184_v30  ;;  %5794 = vmatprep.subr.bf16.mxu0 %v7065_v31  ;;  %v6986_v30 = vcombine.low %v4150_v1, %v4154_v6  ;;  %v7114_v31 = vcombine.low %v4278_v2, %v4282_v5  ;;  %v7123_v33 = vcombine.high %v4286_v26, %v4290_v27  ;;  %v4206_v6 = vld [vmem:[%s9196_s4 + $0x210] sm:$0xff] }
 0x5ec   : > { %5835 = vmatprep.subr.bf16.mxu1 %v7193_v32  ;;  %v6995_v32 = vcombine.high %v4158_v24, %v4162_v25  ;;  %v4210_v2 = vld [vmem:[%s9196_s4 + $0x230] sm:$0xff] }
 0x5ed   : > { %v4334_v5 = vld [vmem:[%s9196_s4 + $0x610] sm:$0xff] }
 0x5ee   : > { %5795 = vmatpush1.bf16.msra.mxu0 %v7064_v37  ;;  %v4298_v37 = vld [vmem:[%s9196_s4 + $0x4f0] sm:$0xff] }
 0x5ef   : > { %5836 = vmatpush1.bf16.msra.mxu1 %v7192_v38  ;;  %5796 = vmatprep.subr.bf16.mxu0 %v7073_v39  ;;  %v6994_v38 = vcombine.low %v4158_v24, %v4162_v25  ;;  %v7122_v39 = vcombine.low %v4286_v26, %v4290_v27  ;;  %v7131_v41 = vcombine.high %v4294_v36, %v4298_v37  ;;  %v4214_v25 = vld [vmem:[%s9196_s4 + $0x250] sm:$0xff] }
 0x5f0   : > { %5837 = vmatprep.subr.bf16.mxu1 %v7201_v40  ;;  %v7003_v40 = vcombine.high %v4166_v34, %v4170_v35  ;;  %v4218_v26 = vld [vmem:[%s9196_s4 + $0x270] sm:$0xff] }
 0x5f1   : > { %v4342_v27 = vld [vmem:[%s9196_s4 + $0x650] sm:$0xff] }
 0x5f2   : > { %5797 = vmatpush1.bf16.msra.mxu0 %v7072_v46  ;;  %v4306_v46 = vld [vmem:[%s9196_s4 + $0x530] sm:$0xff] }
 0x5f3   : > { %5838 = vmatpush1.bf16.msra.mxu1 %v7200_v4  ;;  %5798 = vmatprep.subr.bf16.mxu0 %v7081_v29  ;;  %v7002_v4 = vcombine.low %v4166_v34, %v4170_v35  ;;  %v7130_v29 = vcombine.low %v4294_v36, %v4298_v37  ;;  %v7139_v50 = vcombine.high %v4302_v42, %v4306_v46  ;;  %v4222_v35 = vld [vmem:[%s9196_s4 + $0x290] sm:$0xff] }
 0x5f4   : > { %5839 = vmatprep.subr.bf16.mxu1 %v7209_v15  ;;  %v7011_v15 = vcombine.high %v4174_v63, %v4178_v12  ;;  %v4226_v36 = vld [vmem:[%s9196_s4 + $0x2b0] sm:$0xff] }
 0x5f5   : > { %v4350_v37 = vld [vmem:[%s9196_s4 + $0x690] sm:$0xff] }
 0x5f6   : > { %5799 = vmatpush1.bf16.msra.mxu0 %v7080_v49  ;;  %v4314_v49 = vld [vmem:[%s9196_s4 + $0x570] sm:$0xff] }
 0x5f7   : > { %5840 = vmatpush1.bf16.msra.mxu1 %v7208_v55  ;;  %5800 = vmatprep.subr.bf16.mxu0 %v7089_v56  ;;  %v7010_v55 = vcombine.low %v4174_v63, %v4178_v12  ;;  %v7138_v56 = vcombine.low %v4302_v42, %v4306_v46  ;;  %v7147_v60 = vcombine.high %v4310_v48, %v4314_v49  ;;  %v4230_v12 = vld [vmem:[%s9196_s4 + $0x2d0] sm:$0xff] }
 0x5f8   : > { %5841 = vmatprep.subr.bf16.mxu1 %v7217_v59  ;;  %v7019_v59 = vcombine.high %v4182_v45, %v4186_v52  ;;  %v4234_v42 = vld [vmem:[%s9196_s4 + $0x2f0] sm:$0xff] }
 0x5f9   : > { %v4358_v46 = vld [vmem:[%s9196_s4 + $0x6d0] sm:$0xff] }
 0x5fa   : > { %5801 = vmatpush1.bf16.msra.mxu0 %v7088_v17  ;;  %v4322_v17 = vld [vmem:[%s9196_s4 + $0x5b0] sm:$0xff] }
 0x5fb   : > { %5842 = vmatpush1.bf16.msra.mxu1 %v7216_v28  ;;  %5802 = vmatprep.subr.bf16.mxu0 %v7097_v9  ;;  %v7018_v28 = vcombine.low %v4182_v45, %v4186_v52  ;;  %v7146_v9 = vcombine.low %v4310_v48, %v4314_v49  ;;  %v7155_v57 = vcombine.high %v4318_v8, %v4322_v17  ;;  %v4238_v52 = vld [vmem:[%s9196_s4 + $0x310] sm:$0xff] }
 0x5fc   : > { %5843 = vmatprep.subr.bf16.mxu1 %v7225_v10  ;;  %v7027_v10 = vcombine.high %v4190_v61, %v4194_v3  ;;  %v4242_v48 = vld [vmem:[%s9196_s4 + $0x330] sm:$0xff] }
 0x5fd   : > { %v4366_v49 = vld [vmem:[%s9196_s4 + $0x710] sm:$0xff] }
 0x5fe   : > { %5803 = vmatpush1.bf16.msra.mxu0 %v7096_v16  ;;  %v4330_v16 = vld [vmem:[%s9196_s4 + $0x5f0] sm:$0xff] }
 0x5ff   : > { %5844 = vmatpush1.bf16.msra.mxu1 %v7224_v19  ;;  %5854 = vmatprep.subr.bf16.mxu0 %v6979_v20  ;;  %v7026_v19 = vcombine.low %v4190_v61, %v4194_v3  ;;  %v7154_v20 = vcombine.low %v4318_v8, %v4322_v17  ;;  %v7163_v1 = vcombine.high %v4326_v14, %v4330_v16  ;;  %v4246_v3 = vld [vmem:[%s9196_s4 + $0x350] sm:$0xff] }
 0x600   : > { %5895 = vmatprep.subr.bf16.mxu1 %v7107_v0  ;;  %v7035_v0 = vcombine.high %v4198_v11, %v4202_v13  ;;  %v4250_v8 = vld [vmem:[%s9196_s4 + $0x370] sm:$0xff] }
 0x601   : > { %5805 = vmatmul.mubr.bf16.vlgmr.msra.gmra.mrb[28].mxu0 %v9801_v62  ;;  %v4374_v17 = vld [vmem:[%s9196_s4 + $0x750] sm:$0xff] }
 0x602   : > { %5846 = vmatmul.mubr.bf16.vlgmr.msra.gmra.mrb[28].mxu1 %v9803_v44  ;;  %5855 = vmatpush1.bf16.msra.mxu0 %v6978_v7  ;;  %v4338_v7 = vld [vmem:[%s9196_s4 + $0x630] sm:$0xff] }
 0x603   : > { %5886 = vmatprep.mubr.bf16.mxu0 %v9797_v43  ;;  %5896 = vmatpush1.bf16.msra.mxu1 %v7106_v21  ;;  %v7034_v21 = vcombine.low %v4198_v11, %v4202_v13  ;;  %v7171_v24 = vcombine.high %v4334_v5, %v4338_v7  ;;  %v4254_v13 = vld [vmem:[%s9196_s4 + $0x390] sm:$0xff] }
 0x604   : > { %5927 = vmatprep.mubr.bf16.mxu1 %v9799_v58  ;;  %5856 = vmatprep.subr.bf16.mxu0 %v6987_v22  ;;  %v7162_v22 = vcombine.low %v4326_v14, %v4330_v16  ;;  %v4258_v14 = vld [vmem:[%s9196_s4 + $0x3b0] sm:$0xff] }
 0x605   : > { %5897 = vmatprep.subr.bf16.mxu1 %v7115_v23  ;;  %v7043_v23 = vcombine.high %v4206_v6, %v4210_v2  ;;  %v4382_v16 = vld [vmem:[%s9196_s4 + $0x790] sm:$0xff] }
 0x606   : > { %5857 = vmatpush1.bf16.msra.mxu0 %v6986_v30  ;;  %v4346_v30 = vld [vmem:[%s9196_s4 + $0x670] sm:$0xff] }
 0x607   : > { %5898 = vmatpush1.bf16.msra.mxu1 %v7114_v31  ;;  %5858 = vmatprep.subr.bf16.mxu0 %v6995_v32  ;;  %v7042_v31 = vcombine.low %v4206_v6, %v4210_v2  ;;  %v7170_v32 = vcombine.low %v4334_v5, %v4338_v7  ;;  %v7179_v34 = vcombine.high %v4342_v27, %v4346_v30  ;;  %v4262_v2 = vld [vmem:[%s9196_s4 + $0x3d0] sm:$0xff] }
 0x608   : > { %5899 = vmatprep.subr.bf16.mxu1 %v7123_v33  ;;  %v7051_v33 = vcombine.high %v4214_v25, %v4218_v26  ;;  %v4266_v5 = vld [vmem:[%s9196_s4 + $0x3f0] sm:$0xff] }
 0x609   : > { %v4390_v7 = vld [vmem:[%s9196_s4 + $0x7d0] sm:$0xff] }
 0x60a   : > { %5859 = vmatpush1.bf16.msra.mxu0 %v6994_v38  ;;  %v4354_v38 = vld [vmem:[%s9196_s4 + $0x6b0] sm:$0xff] }
 0x60b   : > { %5900 = vmatpush1.bf16.msra.mxu1 %v7122_v39  ;;  %5860 = vmatprep.subr.bf16.mxu0 %v7003_v40  ;;  %v7050_v39 = vcombine.low %v4214_v25, %v4218_v26  ;;  %v7178_v40 = vcombine.low %v4342_v27, %v4346_v30  ;;  %v7187_v63 = vcombine.high %v4350_v37, %v4354_v38  ;;  %v4143_v26 = vld [vmem:[%s9196_s4 + $0x18] sm:$0xff] }
 0x60c   : > { %5901 = vmatprep.subr.bf16.mxu1 %v7131_v41  ;;  %v7059_v41 = vcombine.high %v4222_v35, %v4226_v36  ;;  %v4147_v27 = vld [vmem:[%s9196_s4 + $0x38] sm:$0xff] }
 0x60d   : > { %v4271_v30 = vld [vmem:[%s9196_s4 + $0x418] sm:$0xff] }
 0x60e   : > { %5861 = vmatpush1.bf16.msra.mxu0 %v7002_v4  ;;  %v4362_v4 = vld [vmem:[%s9196_s4 + $0x6f0] sm:$0xff] }
 0x60f   : > { %5902 = vmatpush1.bf16.msra.mxu1 %v7130_v29  ;;  %5862 = vmatprep.subr.bf16.mxu0 %v7011_v15  ;;  %v7058_v29 = vcombine.low %v4222_v35, %v4226_v36  ;;  %v7186_v15 = vcombine.low %v4350_v37, %v4354_v38  ;;  %v7195_v45 = vcombine.high %v4358_v46, %v4362_v4  ;;  %v4151_v36 = vld [vmem:[%s9196_s4 + $0x58] sm:$0xff] }
 0x610   : > { %5903 = vmatprep.subr.bf16.mxu1 %v7139_v50  ;;  %v7067_v50 = vcombine.high %v4230_v12, %v4234_v42  ;;  %v4155_v37 = vld [vmem:[%s9196_s4 + $0x78] sm:$0xff]  ;;  %v6980_v38 = vcombine.low %v4143_v26, %v4147_v27 }
 0x612   : > { %5863 = vmatpush1.bf16.msra.mxu0 %v7010_v55  ;;  %v4370_v55 = vld [vmem:[%s9196_s4 + $0x730] sm:$0xff] }
 0x613   : > { %5904 = vmatpush1.bf16.msra.mxu1 %v7138_v56  ;;  %5864 = vmatprep.subr.bf16.mxu0 %v7019_v59  ;;  %v7066_v56 = vcombine.low %v4230_v12, %v4234_v42  ;;  %v7194_v59 = vcombine.low %v4358_v46, %v4362_v4  ;;  %v7203_v61 = vcombine.high %v4366_v49, %v4370_v55  ;;  %v4159_v12 = vld [vmem:[%s9196_s4 + $0x98] sm:$0xff] }
 0x614   : > { %5905 = vmatprep.subr.bf16.mxu1 %v7147_v60  ;;  %v7075_v60 = vcombine.high %v4238_v52, %v4242_v48  ;;  %v4163_v42 = vld [vmem:[%s9196_s4 + $0xb8] sm:$0xff] }
 0x615   : > { %v4287_v4 = vld [vmem:[%s9196_s4 + $0x498] sm:$0xff] }
 0x616   : > { %5865 = vmatpush1.bf16.msra.mxu0 %v7018_v28  ;;  %v4378_v28 = vld [vmem:[%s9196_s4 + $0x770] sm:$0xff] }
 0x617   : > { %5906 = vmatpush1.bf16.msra.mxu1 %v7146_v9  ;;  %5866 = vmatprep.subr.bf16.mxu0 %v7027_v10  ;;  %v7074_v9 = vcombine.low %v4238_v52, %v4242_v48  ;;  %v7202_v10 = vcombine.low %v4366_v49, %v4370_v55  ;;  %v7211_v11 = vcombine.high %v4374_v17, %v4378_v28  ;;  %v4167_v48 = vld [vmem:[%s9196_s4 + $0xd8] sm:$0xff] }
 0x618   : > { %5907 = vmatprep.subr.bf16.mxu1 %v7155_v57  ;;  %v7083_v57 = vcombine.high %v4246_v3, %v4250_v8  ;;  %v4171_v49 = vld [vmem:[%s9196_s4 + $0xf8] sm:$0xff] }
 0x619   : > { %v4295_v55 = vld [vmem:[%s9196_s4 + $0x4d8] sm:$0xff] }
 0x61a   : > { %5867 = vmatpush1.bf16.msra.mxu0 %v7026_v19  ;;  %v4386_v19 = vld [vmem:[%s9196_s4 + $0x7b0] sm:$0xff] }
 0x61b   : > { %5908 = vmatpush1.bf16.msra.mxu1 %v7154_v20  ;;  %5868 = vmatprep.subr.bf16.mxu0 %v7035_v0  ;;  %v7082_v20 = vcombine.low %v4246_v3, %v4250_v8  ;;  %v7210_v0 = vcombine.low %v4374_v17, %v4378_v28  ;;  %v7219_v6 = vcombine.high %v4382_v16, %v4386_v19  ;;  %v4179_v3 = vld [vmem:[%s9196_s4 + $0x138] sm:$0xff] }
 0x61c   : > { %5909 = vmatprep.subr.bf16.mxu1 %v7163_v1  ;;  %v7091_v1 = vcombine.high %v4254_v13, %v4258_v14  ;;  %v4303_v8 = vld [vmem:[%s9196_s4 + $0x518] sm:$0xff]  ;;  %v7004_v28 = vcombine.low %v4167_v48, %v4171_v49 }
 0x61d   : > { %v4307_v17 = vld [vmem:[%s9196_s4 + $0x538] sm:$0xff] }
 0x61e   : > { %5869 = vmatpush1.bf16.msra.mxu0 %v7034_v21  ;;  %v4394_v21 = vld [vmem:[%s9196_s4 + $0x7f0] sm:$0xff] }
 0x61f   : > { %5910 = vmatpush1.bf16.msra.mxu1 %v7162_v22  ;;  %5870 = vmatprep.subr.bf16.mxu0 %v7043_v23  ;;  %v7090_v22 = vcombine.low %v4254_v13, %v4258_v14  ;;  %v7218_v23 = vcombine.low %v4382_v16, %v4386_v19  ;;  %v7227_v25 = vcombine.high %v4390_v7, %v4394_v21  ;;  %v4187_v13 = vld [vmem:[%s9196_s4 + $0x178] sm:$0xff] }
 0x620   : > { %5911 = vmatprep.subr.bf16.mxu1 %v7171_v24  ;;  %v7099_v24 = vcombine.high %v4262_v2, %v4266_v5  ;;  %v4311_v14 = vld [vmem:[%s9196_s4 + $0x558] sm:$0xff] }
 0x621   : > { %v4315_v16 = vld [vmem:[%s9196_s4 + $0x578] sm:$0xff] }
 0x622   : > { %5871 = vmatpush1.bf16.msra.mxu0 %v7042_v31  ;;  %v4275_v31 = vld [vmem:[%s9196_s4 + $0x438] sm:$0xff] }
 0x623   : > { %5912 = vmatpush1.bf16.msra.mxu1 %v7170_v32  ;;  %5872 = vmatprep.subr.bf16.mxu0 %v7051_v33  ;;  %v7098_v32 = vcombine.low %v4262_v2, %v4266_v5  ;;  %v7226_v33 = vcombine.low %v4390_v7, %v4394_v21  ;;  %v7109_v35 = vcombine.high %v4271_v30, %v4275_v31  ;;  %v4195_v2 = vld [vmem:[%s9196_s4 + $0x1b8] sm:$0xff] }
 0x624   : > { %5913 = vmatprep.subr.bf16.mxu1 %v7179_v34  ;;  %v6981_v34 = vcombine.high %v4143_v26, %v4147_v27  ;;  %v4319_v5 = vld [vmem:[%s9196_s4 + $0x598] sm:$0xff] }
 0x625   : > { %v4323_v7 = vld [vmem:[%s9196_s4 + $0x5b8] sm:$0xff] }
 0x626   : > { %5873 = vmatpush1.bf16.msra.mxu0 %v7050_v39  ;;  %v4279_v39 = vld [vmem:[%s9196_s4 + $0x458] sm:$0xff] }
 0x627   : > { %5914 = vmatpush1.bf16.msra.mxu1 %v7178_v40  ;;  %5874 = vmatprep.subr.bf16.mxu0 %v7059_v41  ;;  %v4283_v40 = vld [vmem:[%s9196_s4 + $0x478] sm:$0xff]  ;;  %v7108_v41 = vcombine.low %v4271_v30, %v4275_v31 }
 0x628   : > { %5915 = vmatprep.subr.bf16.mxu1 %v7187_v63  ;;  %v6989_v63 = vcombine.high %v4151_v36, %v4155_v37  ;;  %v7117_v46 = vcombine.high %v4279_v39, %v4283_v40  ;;  %v4203_v26 = vld [vmem:[%s9196_s4 + $0x1f8] sm:$0xff] }
 0x629   : > { %v4327_v27 = vld [vmem:[%s9196_s4 + $0x5d8] sm:$0xff] }
 0x62a   : > { %5875 = vmatpush1.bf16.msra.mxu0 %v7058_v29  ;;  %v4291_v29 = vld [vmem:[%s9196_s4 + $0x4b8] sm:$0xff] }
 0x62b   : > { %5916 = vmatpush1.bf16.msra.mxu1 %v7186_v15  ;;  %5876 = vmatprep.subr.bf16.mxu0 %v7067_v50  ;;  %v6988_v15 = vcombine.low %v4151_v36, %v4155_v37  ;;  %v7116_v50 = vcombine.low %v4279_v39, %v4283_v40  ;;  %v7125_v52 = vcombine.high %v4287_v4, %v4291_v29  ;;  %v4331_v30 = vld [vmem:[%s9196_s4 + $0x5f8] sm:$0xff] }
 0x62c   : > { %5917 = vmatprep.subr.bf16.mxu1 %v7195_v45  ;;  %v6997_v45 = vcombine.high %v4159_v12, %v4163_v42  ;;  %v4211_v36 = vld [vmem:[%s9196_s4 + $0x238] sm:$0xff]  ;;  %v7164_v40 = vcombine.low %v4327_v27, %v4331_v30 }
 0x62d   : > { %v4335_v37 = vld [vmem:[%s9196_s4 + $0x618] sm:$0xff] }
 0x62e   : > { %5877 = vmatpush1.bf16.msra.mxu0 %v7066_v56  ;;  %v4299_v56 = vld [vmem:[%s9196_s4 + $0x4f8] sm:$0xff] }
 0x62f   : > { %5918 = vmatpush1.bf16.msra.mxu1 %v7194_v59  ;;  %5878 = vmatprep.subr.bf16.mxu0 %v7075_v60  ;;  %v6996_v59 = vcombine.low %v4159_v12, %v4163_v42  ;;  %v7005_v60 = vcombine.high %v4167_v48, %v4171_v49  ;;  %v4215_v12 = vld [vmem:[%s9196_s4 + $0x258] sm:$0xff] }
 0x630   : > { %5919 = vmatprep.subr.bf16.mxu1 %v7203_v61  ;;  %v4175_v61 = vld [vmem:[%s9196_s4 + $0x118] sm:$0xff] }
 0x631   : > { %v7012_v19 = vcombine.low %v4175_v61, %v4179_v3  ;;  %v4219_v42 = vld [vmem:[%s9196_s4 + $0x278] sm:$0xff] }
 0x632   : > { %5879 = vmatpush1.bf16.msra.mxu0 %v7074_v9  ;;  %v7132_v9 = vcombine.low %v4295_v55, %v4299_v56  ;;  %v4227_v48 = vld [vmem:[%s9196_s4 + $0x2b8] sm:$0xff] }
 0x633   : > { %5920 = vmatpush1.bf16.msra.mxu1 %v7202_v10  ;;  %5880 = vmatprep.subr.bf16.mxu0 %v7083_v57  ;;  %v7013_v10 = vcombine.high %v4175_v61, %v4179_v3  ;;  %v7141_v57 = vcombine.high %v4303_v8, %v4307_v17  ;;  %v4351_v49 = vld [vmem:[%s9196_s4 + $0x698] sm:$0xff] }
 0x634   : > { %5921 = vmatprep.subr.bf16.mxu1 %v7211_v11  ;;  %v4183_v11 = vld [vmem:[%s9196_s4 + $0x158] sm:$0xff] }
 0x635   : > { %v7020_v21 = vcombine.low %v4183_v11, %v4187_v13  ;;  %v4235_v61 = vld [vmem:[%s9196_s4 + $0x2f8] sm:$0xff] }
 0x636   : > { %5881 = vmatpush1.bf16.msra.mxu0 %v7082_v20  ;;  %v7140_v20 = vcombine.low %v4303_v8, %v4307_v17  ;;  %v4359_v3 = vld [vmem:[%s9196_s4 + $0x6d8] sm:$0xff] }
 0x637   : > { %5922 = vmatpush1.bf16.msra.mxu1 %v7210_v0  ;;  %5882 = vmatprep.subr.bf16.mxu0 %v7091_v1  ;;  %v7021_v0 = vcombine.high %v4183_v11, %v4187_v13  ;;  %v7149_v1 = vcombine.high %v4311_v14, %v4315_v16  ;;  %v4363_v8 = vld [vmem:[%s9196_s4 + $0x6f8] sm:$0xff] }
 0x638   : > { %5923 = vmatprep.subr.bf16.mxu1 %v7219_v6  ;;  %v4191_v6 = vld [vmem:[%s9196_s4 + $0x198] sm:$0xff] }
 0x639   : > { %v7028_v31 = vcombine.low %v4191_v6, %v4195_v2  ;;  %v4243_v11 = vld [vmem:[%s9196_s4 + $0x338] sm:$0xff] }
 0x63a   : > { %5883 = vmatpush1.bf16.msra.mxu0 %v7090_v22  ;;  %v7148_v22 = vcombine.low %v4311_v14, %v4315_v16  ;;  %v4367_v13 = vld [vmem:[%s9196_s4 + $0x718] sm:$0xff] }
 0x63b   : > { %5924 = vmatpush1.bf16.msra.mxu1 %v7218_v23  ;;  %5884 = vmatprep.subr.bf16.mxu0 %v7099_v24  ;;  %v7029_v23 = vcombine.high %v4191_v6, %v4195_v2  ;;  %v7157_v24 = vcombine.high %v4319_v5, %v4323_v7  ;;  %v4371_v14 = vld [vmem:[%s9196_s4 + $0x738] sm:$0xff] }
 0x63c   : > { %5925 = vmatprep.subr.bf16.mxu1 %v7227_v25  ;;  %v4199_v25 = vld [vmem:[%s9196_s4 + $0x1d8] sm:$0xff] }
 0x63d   : > { %v7036_v39 = vcombine.low %v4199_v25, %v4203_v26  ;;  %v4251_v6 = vld [vmem:[%s9196_s4 + $0x378] sm:$0xff] }
 0x63e   : > { %5885 = vmatpush1.bf16.msra.mxu0 %v7098_v32  ;;  %v7156_v32 = vcombine.low %v4319_v5, %v4323_v7  ;;  %v4375_v2 = vld [vmem:[%s9196_s4 + $0x758] sm:$0xff] }
 0x63f   : > { %5926 = vmatpush1.bf16.msra.mxu1 %v7226_v33  ;;  %5936 = vmatprep.subr.bf16.mxu0 %v6981_v34  ;;  %v7037_v33 = vcombine.high %v4199_v25, %v4203_v26  ;;  %v7165_v34 = vcombine.high %v4327_v27, %v4331_v30  ;;  %v4379_v5 = vld [vmem:[%s9196_s4 + $0x778] sm:$0xff] }
 0x640   : > { %5977 = vmatprep.subr.bf16.mxu1 %v7109_v35  ;;  %v4207_v35 = vld [vmem:[%s9196_s4 + $0x218] sm:$0xff] }
 0x641   : > { %5887 = vmatmul.mubr.bf16.vlgmr.msra.gmra.mrb[32].mxu0 %v9801_v62  ;;  %v4259_v25 = vld [vmem:[%s9196_s4 + $0x3b8] sm:$0xff] }
 0x642   : > { %5928 = vmatmul.mubr.bf16.vlgmr.msra.gmra.mrb[32].mxu1 %v9803_v44  ;;  %5937 = vmatpush1.bf16.msra.mxu0 %v6980_v38  ;;  %v4339_v38 = vld [vmem:[%s9196_s4 + $0x638] sm:$0xff] }
 0x643   : > { %5968 = vmatprep.mubr.bf16.mxu0 %v9797_v43  ;;  %5978 = vmatpush1.bf16.msra.mxu1 %v7108_v41  ;;  %v7124_v43 = vcombine.low %v4287_v4, %v4291_v29  ;;  %v7045_v41 = vcombine.high %v4207_v35, %v4211_v36  ;;  %v4347_v4 = vld [vmem:[%s9196_s4 + $0x678] sm:$0xff]  ;;  %v7044_v29 = vcombine.low %v4207_v35, %v4211_v36 }
 0x644   : > { %6009 = vmatprep.mubr.bf16.mxu1 %v9799_v58  ;;  %5938 = vmatprep.subr.bf16.mxu0 %v6989_v63  ;;  %v7133_v58 = vcombine.high %v4295_v55, %v4299_v56  ;;  %v7173_v63 = vcombine.high %v4335_v37, %v4339_v38  ;;  %v4355_v55 = vld [vmem:[%s9196_s4 + $0x6b8] sm:$0xff]  ;;  %v7052_v56 = vcombine.low %v4215_v12, %v4219_v42 }
 0x645   : > { %5979 = vmatprep.subr.bf16.mxu1 %v7117_v46  ;;  %v4343_v46 = vld [vmem:[%s9196_s4 + $0x658] sm:$0xff] }
 0x646   : > { %5939 = vmatpush1.bf16.msra.mxu0 %v6988_v15  ;;  %v7172_v15 = vcombine.low %v4335_v37, %v4339_v38  ;;  %v4383_v26 = vld [vmem:[%s9196_s4 + $0x798] sm:$0xff] }
 0x647   : > { %5980 = vmatpush1.bf16.msra.mxu1 %v7116_v50  ;;  %5940 = vmatprep.subr.bf16.mxu0 %v6997_v45  ;;  %v7053_v50 = vcombine.high %v4215_v12, %v4219_v42  ;;  %v7181_v45 = vcombine.high %v4343_v46, %v4347_v4  ;;  %v4387_v27 = vld [vmem:[%s9196_s4 + $0x7b8] sm:$0xff] }
 0x648   : > { %5981 = vmatprep.subr.bf16.mxu1 %v7125_v52  ;;  %v4223_v52 = vld [vmem:[%s9196_s4 + $0x298] sm:$0xff] }
 0x649   : > { %v7060_v17 = vcombine.low %v4223_v52, %v4227_v48  ;;  %v4267_v35 = vld [vmem:[%s9196_s4 + $0x3f8] sm:$0xff] }
 0x64a   : > { %5941 = vmatpush1.bf16.msra.mxu0 %v6996_v59  ;;  %v7180_v59 = vcombine.low %v4343_v46, %v4347_v4  ;;  %v4391_v36 = vld [vmem:[%s9196_s4 + $0x7d8] sm:$0xff]  ;;  %v4130_v46 = vld [vmem:[#allocation3] sm:$0xff] }
 0x64b   : > { %5982 = vmatpush1.bf16.msra.mxu1 %v7124_v43  ;;  %5942 = vmatprep.subr.bf16.mxu0 %v7005_v60  ;;  %v7061_v43 = vcombine.high %v4223_v52, %v4227_v48  ;;  %v7189_v60 = vcombine.high %v4351_v49, %v4355_v55  ;;  %v4395_v37 = vld [vmem:[%s9196_s4 + $0x7f8] sm:$0xff] }
 0x64c   : > { %5983 = vmatprep.subr.bf16.mxu1 %v7133_v58  ;;  %v4231_v58 = vld [vmem:[%s9196_s4 + $0x2d8] sm:$0xff]  ;;  %v7228_v12 = vcombine.low %v4391_v36, %v4395_v37 }
 0x64d   : > { %v7068_v16 = vcombine.low %v4231_v58, %v4235_v61 }
 0x64e   : > { %5943 = vmatpush1.bf16.msra.mxu0 %v7004_v28  ;;  %v7188_v28 = vcombine.low %v4351_v49, %v4355_v55 }
 0x64f   : > { %5984 = vmatpush1.bf16.msra.mxu1 %v7132_v9  ;;  %5944 = vmatprep.subr.bf16.mxu0 %v7013_v10  ;;  %v7069_v9 = vcombine.high %v4231_v58, %v4235_v61  ;;  %v7197_v10 = vcombine.high %v4359_v3, %v4363_v8 }
 0x650   : > { %5985 = vmatprep.subr.bf16.mxu1 %v7141_v57  ;;  %v4239_v57 = vld [vmem:[%s9196_s4 + $0x318] sm:$0xff] }
 0x651   : > { %v7076_v7 = vcombine.low %v4239_v57, %v4243_v11 }
 0x652   : > { %5945 = vmatpush1.bf16.msra.mxu0 %v7012_v19  ;;  %v7196_v19 = vcombine.low %v4359_v3, %v4363_v8  ;;  %v4133_v3 = vld [vmem:[#allocation3 + $0x18] sm:$0xff] }
 0x653   : > { %5986 = vmatpush1.bf16.msra.mxu1 %v7140_v20  ;;  %5946 = vmatprep.subr.bf16.mxu0 %v7021_v0  ;;  %v7077_v20 = vcombine.high %v4239_v57, %v4243_v11  ;;  %v7205_v0 = vcombine.high %v4367_v13, %v4371_v14 }
 0x654   : > { %5987 = vmatprep.subr.bf16.mxu1 %v7149_v1  ;;  %v4247_v1 = vld [vmem:[%s9196_s4 + $0x358] sm:$0xff] }
 0x655   : > { %v7084_v30 = vcombine.low %v4247_v1, %v4251_v6 }
 0x656   : > { %5947 = vmatpush1.bf16.msra.mxu0 %v7020_v21  ;;  %v7204_v21 = vcombine.low %v4367_v13, %v4371_v14 }
 0x657   : > { %5988 = vmatpush1.bf16.msra.mxu1 %v7148_v22  ;;  %5948 = vmatprep.subr.bf16.mxu0 %v7029_v23  ;;  %v7085_v22 = vcombine.high %v4247_v1, %v4251_v6  ;;  %v7213_v23 = vcombine.high %v4375_v2, %v4379_v5  ;;  %v4135_v1 = vld [vmem:[#allocation3 + $0x28] sm:$0xff] }
 0x658   : > { %5989 = vmatprep.subr.bf16.mxu1 %v7157_v24  ;;  %v4255_v24 = vld [vmem:[%s9196_s4 + $0x398] sm:$0xff] }
 0x659   : > { %v7092_v38 = vcombine.low %v4255_v24, %v4259_v25 }
 0x65a   : > { %5949 = vmatpush1.bf16.msra.mxu0 %v7028_v31  ;;  %v7212_v31 = vcombine.low %v4375_v2, %v4379_v5 }
 0x65b   : > { %5990 = vmatpush1.bf16.msra.mxu1 %v7156_v32  ;;  %5950 = vmatprep.subr.bf16.mxu0 %v7037_v33  ;;  %v7093_v32 = vcombine.high %v4255_v24, %v4259_v25  ;;  %v7221_v33 = vcombine.high %v4383_v26, %v4387_v27 }
 0x65c   : > { %5991 = vmatprep.subr.bf16.mxu1 %v7165_v34  ;;  %v4263_v34 = vld [vmem:[%s9196_s4 + $0x3d8] sm:$0xff] }
 0x65e   : > { %5951 = vmatpush1.bf16.msra.mxu0 %v7036_v39  ;;  %v7220_v39 = vcombine.low %v4383_v26, %v4387_v27  ;;  %v4136_v26 = vld [vmem:[#allocation3 + $0x30] sm:$0xff] }
 0x65f   : > { %5992 = vmatpush1.bf16.msra.mxu1 %v7164_v40  ;;  %5952 = vmatprep.subr.bf16.mxu0 %v7045_v41  ;;  %v7101_v40 = vcombine.high %v4263_v34, %v4267_v35  ;;  %v7229_v41 = vcombine.high %v4391_v36, %v4395_v37 }
 0x660   : > { %5993 = vmatprep.subr.bf16.mxu1 %v7173_v63  ;;  %v7100_v63 = vcombine.low %v4263_v34, %v4267_v35 }
 0x662   : > { %5953 = vmatpush1.bf16.msra.mxu0 %v7044_v29 }
 0x663   : > { %5994 = vmatpush1.bf16.msra.mxu1 %v7172_v15  ;;  %5954 = vmatprep.subr.bf16.mxu0 %v7053_v50  ;;  %v4131_v50 = vld [vmem:[#allocation3 + $0x8] sm:$0xff] }
 0x664   : > { %5995 = vmatprep.subr.bf16.mxu1 %v7181_v45 }
 0x666   : > { %5955 = vmatpush1.bf16.msra.mxu0 %v7052_v56 }
 0x667   : > { %5996 = vmatpush1.bf16.msra.mxu1 %v7180_v59  ;;  %5956 = vmatprep.subr.bf16.mxu0 %v7061_v43 }
 0x668   : > { %5997 = vmatprep.subr.bf16.mxu1 %v7189_v60 }
 0x66a   : > { %5957 = vmatpush1.bf16.msra.mxu0 %v7060_v17 }
 0x66b   : > { %5998 = vmatpush1.bf16.msra.mxu1 %v7188_v28  ;;  %5958 = vmatprep.subr.bf16.mxu0 %v7069_v9 }
 0x66c   : > { %5999 = vmatprep.subr.bf16.mxu1 %v7197_v10 }
 0x66e   : > { %5959 = vmatpush1.bf16.msra.mxu0 %v7068_v16  ;;  %v4134_v16 = vld [vmem:[#allocation3 + $0x20] sm:$0xff] }
 0x66f   : > { %6000 = vmatpush1.bf16.msra.mxu1 %v7196_v19  ;;  %5960 = vmatprep.subr.bf16.mxu0 %v7077_v20 }
 0x670   : > { %6001 = vmatprep.subr.bf16.mxu1 %v7205_v0 }
 0x672   : > { %5961 = vmatpush1.bf16.msra.mxu0 %v7076_v7 }
 0x673   : > { %6002 = vmatpush1.bf16.msra.mxu1 %v7204_v21  ;;  %5962 = vmatprep.subr.bf16.mxu0 %v7085_v22 }
 0x674   : > { %6003 = vmatprep.subr.bf16.mxu1 %v7213_v23 }
 0x676   : > { %5963 = vmatpush1.bf16.msra.mxu0 %v7084_v30 }
 0x677   : > { %6004 = vmatpush1.bf16.msra.mxu1 %v7212_v31  ;;  %5964 = vmatprep.subr.bf16.mxu0 %v7093_v32  ;;  %v4137_v32 = vld [vmem:[#allocation3 + $0x38] sm:$0xff] }
 0x678   : > { %6005 = vmatprep.subr.bf16.mxu1 %v7221_v33 }
 0x67a   : > { %5965 = vmatpush1.bf16.msra.mxu0 %v7092_v38 }
 0x67b   : > { %6006 = vmatpush1.bf16.msra.mxu1 %v7220_v39  ;;  %5966 = vmatprep.subr.bf16.mxu0 %v7101_v40 }
 0x67c   : > { %6007 = vmatprep.subr.bf16.mxu1 %v7229_v41  ;;  %v6066_v41 = vsub.s32 (!%p7230_p0), 4, %v9533_v51 }
 0x67e   : > { %5967 = vmatpush1.bf16.msra.mxu0 %v7100_v63  ;;  %v6070_v63 = vsub.s32 (!%p7230_p0), 5, %v9533_v51 }
 0x67f   : > { %6008 = vmatpush1.bf16.msra.mxu1 %v7228_v12 }
 0x681   : > { %5969 = vmatmul.mubr.bf16.vlgmr.msra.gmra.mrb[36].mxu0 %v9801_v62  ;;  %v4132_v62 = vld [vmem:[#allocation3 + $0x10] sm:$0xff] }
 0x682   : > { %6010 = vmatmul.mubr.bf16.vlgmr.msra.gmra.mrb[36].mxu1 %v9803_v44 }
 0x694   : > { %v5724_v42 = vpop.f32.mrb[24].mxu0 }
 0x695   : > { %v5765_v4 = vpop.f32.mrb[24].mxu1  ;;  %v5726_v15 = vpop.f32.mrb[25].mxu0 }
 0x696   : > { %v5766_v29 = vadd.f32 %v5765_v4, %v5724_v42  ;;  %v5767_v45 = vpop.f32.mrb[25].mxu1  ;;  %v5728_v48 = vpop.f32.mrb[26].mxu0 }
 0x697   : > { %v5768_v52 = vadd.f32 %v5767_v45, %v5726_v15  ;;  %v5769_v49 = vpop.f32.mrb[26].mxu1  ;;  %v5729_v56 = vpop.f32.mrb[27].mxu0  ;;  %v6074_v15 = vsub.s32 (!%p7230_p0), 6, %v9533_v51 }
 0x698   : > { %v6018_v55 = vadd.f32 %v5766_v29, %v4130_v46  ;;  %v5770_v59 = vpop.f32.mrb[27].mxu1  ;;  %v6046_v29 = vld [vmem:[#allocation24] sm:$0xff] (!%p7230_p0) }
 0x699   : > { %v6019_v43 = vadd.f32 %v5768_v52, %v4131_v50  ;;  %v6051_v45 = vrot.slane (!%p7230_p0), %v6046_v29, %v9540_v53  ;;  %v6055_v52 = vrot.slane (!%p7230_p0), %v6046_v29, %v9543_v54  ;;  %v6059_v48 = vrot.slane (!%p7230_p0), %v6046_v29, %v9664_v18 }
 0x69a   : > { %6026 = vst [vmem:[#allocation3] sm:$0xff] %v6018_v55  ;;  %v6063_v49 = vrot.slane (!%p7230_p0), %v6046_v29, %v9667_v47  ;;  %v6067_v55 = vrot.slane (!%p7230_p0), %v6046_v29, %v6066_v41  ;;  %v6071_v56 = vrot.slane (!%p7230_p0), %v6046_v29, %v6070_v63  ;;  %v6078_v59 = vsub.s32 (!%p7230_p0), 7, %v9533_v51 }
 0x69b   : > { %6027 = vst [vmem:[#allocation3 + $0x8] sm:$0xff] %v6019_v43 }
 0x6a1   : > { %v6038_v12 = vld [vmem:[#allocation3] sm:$0xff] (!%p7230_p0) }
 0x6a2   : > { %v6039_v42 = vld [vmem:[#allocation3 + $0x8] sm:$0xff] (!%p7230_p0) }
 0x6d4   : > { %v5806_v60 = vpop.f32.mrb[28].mxu0 }
 0x6d5   : > { %v5847_v58 = vpop.f32.mrb[28].mxu1  ;;  %v5808_v61 = vpop.f32.mrb[29].mxu0 }
 0x6d6   : > { %v5848_v44 = vadd.f32 %v5847_v58, %v5806_v60  ;;  %v5849_v8 = vpop.f32.mrb[29].mxu1  ;;  %v5810_v28 = vpop.f32.mrb[30].mxu0  ;;  %v6088_v60 = vadd.f32 (!%p7230_p0), %v6051_v45, %v6038_v12 }
 0x6d7   : > { %v5850_v17 = vadd.f32 %v5849_v8, %v5808_v61  ;;  %v5851_v9 = vpop.f32.mrb[30].mxu1  ;;  %v5811_v57 = vpop.f32.mrb[31].mxu0  ;;  %v6075_v61 = vrot.slane (!%p7230_p0), %v6046_v29, %v6074_v15  ;;  %v6104_v8 = vld [vmem:[#allocation25] sm:$0xff] (!%p7230_p0) }
 0x6d8   : > { %v6020_v10 = vadd.f32 %v5848_v44, %v4132_v62  ;;  %v5852_v11 = vpop.f32.mrb[31].mxu1  ;;  %v6089_v62 = vadd.f32 (!%p7230_p0), %v6055_v52, %v6039_v42  ;;  %v6096_v28 = vmax.f32 (!%p7230_p0), %v6088_v60, 0.0  ;;  %v6079_v57 = vrot.slane (!%p7230_p0), %v6046_v29, %v6078_v59 }
 0x6d9   : > { %v6021_v13 = vadd.f32 %v5850_v17, %v4133_v3  ;;  %v6113_v51 = vrot.slane (!%p7230_p0), %v6104_v8, %v9543_v54 }
 0x6da   : > { %6028 = vst [vmem:[#allocation3 + $0x10] sm:$0xff] %v6020_v10  ;;  %v6097_v9 = vmax.f32 (!%p7230_p0), %v6089_v62, 0.0 }
 0x6db   : > { %6029 = vst [vmem:[#allocation3 + $0x18] sm:$0xff] %v6021_v13 }
 0x6e1   : > { %v6040_v46 = vld [vmem:[#allocation3 + $0x10] sm:$0xff] (!%p7230_p0) }
 0x6e2   : > { %v6041_v4 = vld [vmem:[#allocation3 + $0x18] sm:$0xff] (!%p7230_p0)  ;;  %v6090_v58 = vadd.f32 (!%p7230_p0), %v6059_v48, %v6040_v46 }
 0x6e3   : > { %v6091_v44 = vadd.f32 (!%p7230_p0), %v6063_v49, %v6041_v4 }
 0x6e4   : > { %v6098_v10 = vmax.f32 (!%p7230_p0), %v6090_v58, 0.0 }
 0x6e5   : > { %v6099_v13 = vmax.f32 (!%p7230_p0), %v6091_v44, 0.0 }
 0x714   : > { %v5888_v14 = vpop.f32.mrb[32].mxu0 }
 0x715   : > { %v5929_v19 = vpop.f32.mrb[32].mxu1  ;;  %v5890_v20 = vpop.f32.mrb[33].mxu0 }
 0x716   : > { %v5930_v0 = vadd.f32 %v5929_v19, %v5888_v14  ;;  %v5931_v6 = vpop.f32.mrb[33].mxu1  ;;  %v5892_v2 = vpop.f32.mrb[34].mxu0  ;;  %v6117_v19 = vrot.slane (!%p7230_p0), %v6104_v8, %v9664_v18 }
 0x717   : > { %v5932_v5 = vadd.f32 %v5931_v6, %v5890_v20  ;;  %v5933_v7 = vpop.f32.mrb[34].mxu1  ;;  %v5893_v21 = vpop.f32.mrb[35].mxu0  ;;  %v6121_v20 = vrot.slane (!%p7230_p0), %v6104_v8, %v9667_v47  ;;  %v6125_v6 = vrot.slane (!%p7230_p0), %v6104_v8, %v6066_v41 }
 0x718   : > { %v6022_v22 = vadd.f32 %v5930_v0, %v4134_v16  ;;  %v5934_v23 = vpop.f32.mrb[35].mxu1  ;;  %v6109_v16 = vrot.slane (!%p7230_p0), %v6104_v8, %v9540_v53  ;;  %v6148_v7 = vmul.f32 (!%p7230_p0), %v6117_v19, %v6098_v10 }
 0x719   : > { %v6023_v24 = vadd.f32 %v5932_v5, %v4135_v1  ;;  %v6147_v5 = vmul.f32 (!%p7230_p0), %v6113_v51, %v6097_v9  ;;  %v6129_v23 = vrot.slane (!%p7230_p0), %v6104_v8, %v6070_v63 }
 0x71a   : > { %6030 = vst [vmem:[#allocation3 + $0x20] sm:$0xff] %v6022_v22  ;;  %v6146_v2 = vmul.f32 (!%p7230_p0), %v6109_v16, %v6096_v28 }
 0x71b   : > { %6031 = vst [vmem:[#allocation3 + $0x28] sm:$0xff] %v6023_v24  ;;  %v6149_v24 = vmul.f32 (!%p7230_p0), %v6121_v20, %v6099_v13 }
 0x721   : > { %v6042_v50 = vld [vmem:[#allocation3 + $0x20] sm:$0xff] (!%p7230_p0) }
 0x722   : > { %v6043_v43 = vld [vmem:[#allocation3 + $0x28] sm:$0xff] (!%p7230_p0)  ;;  %v6092_v3 = vadd.f32 (!%p7230_p0), %v6067_v55, %v6042_v50 }
 0x723   : > { %v6093_v11 = vadd.f32 (!%p7230_p0), %v6071_v56, %v6043_v43 }
 0x724   : > { %v6100_v1 = vmax.f32 (!%p7230_p0), %v6092_v3, 0.0 }
 0x725   : > { %v6101_v22 = vmax.f32 (!%p7230_p0), %v6093_v11, 0.0 }
 0x726   : > { %v6150_v53 = vmul.f32 (!%p7230_p0), %v6125_v6, %v6100_v1 }
 0x727   : > { %v6151_v18 = vmul.f32 (!%p7230_p0), %v6129_v23, %v6101_v22 }
 0x754   : > { %v5970_v25 = vpop.f32.mrb[36].mxu0 }
 0x755   : > { %v6011_v27 = vpop.f32.mrb[36].mxu1  ;;  %v5972_v30 = vpop.f32.mrb[37].mxu0  ;;  %6037 = sbr.rel (%p7230_p0) target bundleno = 2071 (0x817), region = 156 }
 0x756   : > { %v6012_v31 = vadd.f32 %v6011_v27, %v5970_v25  ;;  %v6013_v33 = vpop.f32.mrb[37].mxu1  ;;  %v5974_v34 = vpop.f32.mrb[38].mxu0  ;;  %v6154_v25 = vadd.f32 (!%p7230_p0), %v6147_v5, %v6146_v2  ;;  %v6133_v27 = vrot.slane (!%p7230_p0), %v6104_v8, %v6074_v15 }
 0x757   : > { %v6014_v35 = vadd.f32 %v6013_v33, %v5972_v30  ;;  %v6015_v36 = vpop.f32.mrb[38].mxu1  ;;  %v5975_v37 = vpop.f32.mrb[39].mxu0 }
 0x758   : > { %v6024_v38 = vadd.f32 %v6012_v31, %v4136_v26  ;;  %v6016_v39 = vpop.f32.mrb[39].mxu1  ;;  %v6155_v30 = vadd.f32 (!%p7230_p0), %v6154_v25, %v6148_v7  ;;  %v6137_v31 = vrot.slane (!%p7230_p0), %v6104_v8, %v6078_v59 }
 0x759   : > { %v6025_v40 = vadd.f32 %v6014_v35, %v4137_v32 }
 0x75a   : > { %6032 = vst [vmem:[#allocation3 + $0x30] sm:$0xff] %v6024_v38  ;;  %v6156_v32 = vadd.f32 (!%p7230_p0), %v6155_v30, %v6149_v24  ;;  %v7231_v38 = vld [vmem:[#allocation5] ss:$0 sm:$0xff] (!%p7230_p0) }
 0x75b   : > { %6033 = vst [vmem:[#allocation3 + $0x38] sm:$0xff] %v6025_v40 }
 0x75c   : > { %v6157_v33 = vadd.f32 %v6156_v32, %v6150_v53 }
 0x75e   : > { %v6158_v35 = vadd.f32 %v6157_v33, %v6151_v18 }
 0x761   : > { %v6044_v17 = vld [vmem:[#allocation3 + $0x30] sm:$0xff] }
 0x762   : > { %v6045_v14 = vld [vmem:[#allocation3 + $0x38] sm:$0xff]  ;;  %v6094_v0 = vadd.f32 %v6075_v61, %v6044_v17 }
 0x763   : > { %v6095_v21 = vadd.f32 %v6079_v57, %v6045_v14 }
 0x764   : > { %v6102_v26 = vmax.f32 %v6094_v0, 0.0 }
 0x765   : > { %v6103_v54 = vmax.f32 %v6095_v21, 0.0 }
 0x766   : > { %v6152_v47 = vmul.f32 %v6133_v27, %v6102_v26 }
 0x767   : > { %v6153_v34 = vmul.f32 %v6137_v31, %v6103_v54 }
 0x768   : > { %v6159_v36 = vadd.f32 %v6158_v35, %v6152_v47 }
 0x76a   : > { %v6160_v37 = vadd.f32 %v6159_v36, %v6153_v34 }
 0x76c   : > { %6161 = vadd.xlane.f32.xlu0 %v6160_v37 }
 0x7f9   : > { %v6162_v39 = vpop.xlane.xlu0 %6161 }
 0x7fa   : > { %v6170_v40 = vadd.f32 %v7231_v38, %v6162_v39 }
 0x7fc   : > { %v7232_v41 = vmul.f32 -1.442695, %v6170_v40 }
 0x7fe   : > { %7956 = vpow2.f32 %v7232_v41 }
 0x808   : > { %v7957_v63 = vpop.eup %7956 }
 0x809   : > { %v6174_v12 = vadd.f32 1.0, %v7957_v63 }
 0x80b   : > { %7958 = vrcp.f32 %v6174_v12 }
 0x815   : > { %v7959_v42 = vpop.eup %7958 }
 0x816   : > { %6178 = vst.msk [vmem:[%s10175_s27] sm:$0xff] %vm6177_vm1, %v7959_v42 }
 0x817 PF: > { %s10176_s20 = sld [smem:[#allocation41_spill]]  ;;  %s10177_s26 = sld [smem:[#allocation38_spill]] }
 0x818   : > { %s10178_s27 = sld [smem:[#allocation39_spill]]  ;;  %s10179_s28 = sld [smem:[#allocation46_spill]] }
 0x819   : > { %s10180_s14 = sld [smem:[#allocation45_spill]]  ;;  %s10181_s29 = smov %s8490_s0 }
 0x81d   : > { %s40_s16 = sadd.s32 1, %s10176_s20  }
 0x81e   : > { %p37_p3 = scmp.ge.s32.totalorder %s40_s16, 4  }
 0x81f   : > { %s10182_s0 = smov %s10180_s14 }
 0x820   :  { %39 = sbr.rel (!%p37_p3) target bundleno = 25 (0x19), region = 265 }
 0x827   :  { %6198 = vsyncpa [#allocation7], 1 }
 0x828   :  { %6200 = vsyncpa [#allocation7 + $0x1], 1 }
 0x829   :  { %6201 = vsyncpa [#allocation9], 1 }
 0x82a   :  { %6203 = vsyncpa [#allocation9 + $0x1], 1 }
 0x82b   :  { %6204 = vsyncpa [#allocation12], 1 }
 0x82c   :  { %6206 = vsyncpa [#allocation12 + $0x1], 1 }
 0x82d   :  { %6207 = vsyncpa [#allocation15], 1 }
 0x82e   :  { %6208 = vsyncpa [#allocation18], 1 }

</bundles_post_ra>
